<compile_context>
chip_gen: v6e
topology: v6e:2x2x1
jax: 0.10.0
libtpu: 0.0.40
codegen_flags: <defaults>
</compile_context>

<pallas_src>
import functools

import jax
import jax.numpy as jnp
from jax.experimental import pallas as pl
from jax.experimental.pallas import tpu as pltpu


# ----------------------------------------------------------------------------
# Fused kernel: all layers, one batch tile, one sample per grid step.
# ----------------------------------------------------------------------------
def _mfvi_fused_kernel(x_ref, *rest, cfg):
    """rest = [wmu, swsq, bmu, sb, epsW, epsB] * L  followed by the output ref."""
    L = len(cfg)
    o_ref = rest[6 * L]

    h = x_ref[...].astype(jnp.float32)                       # (bm, n_in) f32
    for l, (relu, residual) in enumerate(cfg):
        wmu_ref, swsq_ref, bmu_ref, sb_ref, epsw_ref, epsb_ref = rest[6 * l: 6 * l + 6]
        mxu_dtype = wmu_ref.dtype                             # bf16 (perf) / f32 (check)

        # Two MXU matmuls against the resident (pre-cast) weight tiles.
        act_mu = jnp.dot(h.astype(mxu_dtype), wmu_ref[...],
                         preferred_element_type=jnp.float32)
        act_var = jnp.dot((h * h).astype(mxu_dtype), swsq_ref[...],
                          preferred_element_type=jnp.float32)

        # f32 epilogue: local-reparameterisation noise + bias.
        act = (act_mu
               + jnp.sqrt(1e-4 + act_var) * epsw_ref[...]
               + bmu_ref[...]
               + sb_ref[...] * epsb_ref[...])
        if relu:
            act = jnp.maximum(act, 0.0)
        if residual:
            act = h + act
        h = act

    o_ref[...] = h.astype(o_ref.dtype)


# ----------------------------------------------------------------------------
# Wrapper: one pallas_call for the whole forward (all samples, all layers).
# ----------------------------------------------------------------------------
@functools.partial(jax.jit, static_argnames=("cfg", "block_m"))
def mfvi_forward_pallas(x, layers, eps, *, cfg, block_m):
    """Full MFVI_regression_homo forward.

    Args:
      x:      (B, input_dim) f32
      layers: tuple per Bayes-linear layer of (W_mu, std_w_sq, b_mu, std_b),
              W_mu / std_w_sq pre-cast to the desired MXU dtype.
      eps:    tuple per layer of (eps_W, eps_b), each (Nsamples, B, n_out) f32.
      cfg:    tuple per layer of (relu, residual) bools (static).
    Returns: (Nsamples, B, output_dim) f32
    """
    B, in_dim = x.shape
    L = len(cfg)
    assert len(layers) == L and len(eps) == L
    Nsamples = eps[0][0].shape[0]
    out_dim = layers[-1][0].shape[1]
    assert B % block_m == 0, f"batch {B} must be divisible by block_m {block_m}"

    num_tiles = B // block_m
    grid = (num_tiles, Nsamples)

    in_specs = [pl.BlockSpec((block_m, in_dim), lambda i, s: (i, 0))]   # x tile
    args = [x]
    for (wmu, swsq, bmu, sb), (eW, eB) in zip(layers, eps):
        n_in, n_out = wmu.shape
        in_specs += [
            pl.BlockSpec((n_in, n_out), lambda i, s: (0, 0)),           # W_mu (resident)
            pl.BlockSpec((n_in, n_out), lambda i, s: (0, 0)),           # softplus(W_p)^2
            pl.BlockSpec((1, n_out), lambda i, s: (0, 0)),              # b_mu
            pl.BlockSpec((1, n_out), lambda i, s: (0, 0)),              # softplus(b_p)
            pl.BlockSpec((None, block_m, n_out), lambda i, s: (s, i, 0)),  # eps_W
            pl.BlockSpec((None, block_m, n_out), lambda i, s: (s, i, 0)),  # eps_b
        ]
        args += [wmu, swsq, bmu, sb, eW, eB]

    kernel = functools.partial(_mfvi_fused_kernel, cfg=cfg)
    return pl.pallas_call(
        kernel,
        out_shape=jax.ShapeDtypeStruct((Nsamples, B, out_dim), jnp.float32),
        grid_spec=pltpu.PrefetchScalarGridSpec(
            num_scalar_prefetch=0,
            grid=grid,
            in_specs=in_specs,
            out_specs=pl.BlockSpec((None, block_m, out_dim), lambda i, s: (s, i, 0)),
        ),
        compiler_params=pltpu.CompilerParams(
            dimension_semantics=("parallel", "parallel")),
    )(*args)


# ----------------------------------------------------------------------------
# Parameter / noise preparation (softplus hoisted out of the kernel).
# ----------------------------------------------------------------------------
def prepare_layer_params(W_mu, W_p, b_mu, b_p, *, mxu_dtype):
    std_w = jax.nn.softplus(W_p)
    std_b = jax.nn.softplus(b_p)
    return (W_mu.astype(mxu_dtype),
            (std_w * std_w).astype(mxu_dtype),
            b_mu.astype(jnp.float32),
            std_b.astype(jnp.float32))


def sample_eps(key, dims, batch, Nsamples):
    eps = []
    for (_n_in, n_out) in dims:
        key, k1, k2 = jax.random.split(key, 3)
        eps.append((jax.random.normal(k1, (Nsamples, batch, n_out), jnp.float32),
                    jax.random.normal(k2, (Nsamples, batch, n_out), jnp.float32)))
    return tuple(eps)


# ----------------------------------------------------------------------------
# Pure-JAX reference (same external eps) for validation.
# ----------------------------------------------------------------------------
def mfvi_forward_ref(x, params, cfg, eps):
    Nsamples = eps[0][0].shape[0]
    hp = jax.lax.Precision.HIGHEST
    preds = []
    for s in range(Nsamples):
        h = x
        for (W_mu, W_p, b_mu, b_p), (relu, residual), (eW, eB) in zip(params, cfg, eps):
            std_w = jax.nn.softplus(W_p)
            std_b = jax.nn.softplus(b_p)
            act_mu = jnp.dot(h, W_mu, precision=hp)
            act_std = jnp.sqrt(1e-4 + jnp.dot(h * h, std_w * std_w, precision=hp))
            act = act_mu + act_std * eW[s] + b_mu + std_b * eB[s]
            if relu:
                act = jnp.maximum(act, 0.0)
            if residual:
                act = h + act
            h = act
        preds.append(h)
    return jnp.stack(preds, axis=0)


# ----------------------------------------------------------------------------
# Self-test.
# ----------------------------------------------------------------------------
if __name__ == "__main__":
    input_dim, output_dim, width, n_layers = 8, 8, 128, 3
    batch, Nsamples = 256, 3
    block_m = 128                       # -> 2 batch tiles (megacore-friendly)

    # Layer topology: n_layers + 1 Bayes-linear layers, (relu, residual) flags.
    dims = [(input_dim, width)] + [(width, width)] * (n_layers - 1) + [(width, output_dim)]
    cfg = ((True, False),) + ((True, True),) * (n_layers - 1) + ((False, False),)

    key = jax.random.PRNGKey(0)
    params = []
    for (n_in, n_out) in dims:
        key, k1, k2, k3, k4 = jax.random.split(key, 5)
        params.append((
            jax.random.uniform(k1, (n_in, n_out), jnp.float32, -0.01, 0.01),  # W_mu
            jax.random.uniform(k2, (n_in, n_out), jnp.float32, -3.0, -2.0),   # W_p
            jax.random.uniform(k3, (1, n_out), jnp.float32, -0.01, 0.01),     # b_mu
            jax.random.uniform(k4, (1, n_out), jnp.float32, -3.0, -2.0),      # b_p
        ))

    key, kx = jax.random.split(key)
    x = jax.random.normal(kx, (batch, input_dim), jnp.float32)

    key, keps = jax.random.split(key)
    eps = sample_eps(keps, dims, batch, Nsamples)     # fresh N(0,1) per forward

    prepared_f32 = tuple(prepare_layer_params(*p, mxu_dtype=jnp.float32) for p in params)
    prepared_bf16 = tuple(prepare_layer_params(*p, mxu_dtype=jnp.bfloat16) for p in params)

    # --- Check 1: f32 MXU operands vs. pure-JAX reference (bit-accurate path) --
    got_f32 = mfvi_forward_pallas(x, prepared_f32, eps, cfg=cfg, block_m=block_m)
    got_f32 = jax.block_until_ready(got_f32)
    ref = mfvi_forward_ref(x, params, cfg, eps)
    assert got_f32.shape == (Nsamples, batch, output_dim)
    assert jnp.allclose(got_f32, ref, atol=1e-4, rtol=1e-4), "f32 full-model mismatch"

    # --- Check 2: performance path (bf16 MXU operands), relaxed tolerance -----
    got_bf16 = mfvi_forward_pallas(x, prepared_bf16, eps, cfg=cfg, block_m=block_m)
    got_bf16 = jax.block_until_ready(got_bf16)
    assert got_bf16.shape == (Nsamples, batch, output_dim)
    assert jnp.allclose(got_bf16, ref, atol=5e-2, rtol=5e-2), "bf16 full-model mismatch"
    assert bool(jnp.all(jnp.isfinite(got_bf16))), "non-finite prediction"

    print("KERNEL_OK")
</pallas_src>

<mosaic_0001>
module attributes {stable_mosaic.version = 11 : i64} {
  func.func @_mfvi_fused_kernel(%arg0: i32, %arg1: i32, %arg2: memref<128x8xf32, #tpu.memory_space<vmem>>, %arg3: memref<8x128xf32, #tpu.memory_space<vmem>>, %arg4: memref<8x128xf32, #tpu.memory_space<vmem>>, %arg5: memref<1x128xf32, #tpu.memory_space<vmem>>, %arg6: memref<1x128xf32, #tpu.memory_space<vmem>>, %arg7: memref<1x128x128xf32, #tpu.memory_space<vmem>>, %arg8: memref<1x128x128xf32, #tpu.memory_space<vmem>>, %arg9: memref<128x128xf32, #tpu.memory_space<vmem>>, %arg10: memref<128x128xf32, #tpu.memory_space<vmem>>, %arg11: memref<1x128xf32, #tpu.memory_space<vmem>>, %arg12: memref<1x128xf32, #tpu.memory_space<vmem>>, %arg13: memref<1x128x128xf32, #tpu.memory_space<vmem>>, %arg14: memref<1x128x128xf32, #tpu.memory_space<vmem>>, %arg15: memref<128x128xf32, #tpu.memory_space<vmem>>, %arg16: memref<128x128xf32, #tpu.memory_space<vmem>>, %arg17: memref<1x128xf32, #tpu.memory_space<vmem>>, %arg18: memref<1x128xf32, #tpu.memory_space<vmem>>, %arg19: memref<1x128x128xf32, #tpu.memory_space<vmem>>, %arg20: memref<1x128x128xf32, #tpu.memory_space<vmem>>, %arg21: memref<128x8xf32, #tpu.memory_space<vmem>>, %arg22: memref<128x8xf32, #tpu.memory_space<vmem>>, %arg23: memref<1x8xf32, #tpu.memory_space<vmem>>, %arg24: memref<1x8xf32, #tpu.memory_space<vmem>>, %arg25: memref<1x128x8xf32, #tpu.memory_space<vmem>>, %arg26: memref<1x128x8xf32, #tpu.memory_space<vmem>>, %arg27: memref<1x128x8xf32, #tpu.memory_space<vmem>>) attributes {dimension_semantics = [#tpu.dimension_semantics<parallel>, #tpu.dimension_semantics<parallel>], iteration_bounds = array<i64: 2, 3>, scalar_prefetch = 0 : i64, scratch_operands = 0 : i64, tpu.core_type = #tpu.core_type<tc>, window_params = [{transform_indices = @transform_0, window_bounds = array<i64: 128, 8>}, {pipeline_mode = #tpu.pipeline_mode<synchronous>, transform_indices = @transform_1, window_bounds = array<i64: 8, 128>}, {pipeline_mode = #tpu.pipeline_mode<synchronous>, transform_indices = @transform_2, window_bounds = array<i64: 8, 128>}, {pipeline_mode = #tpu.pipeline_mode<synchronous>, transform_indices = @transform_3, window_bounds = array<i64: 1, 128>}, {pipeline_mode = #tpu.pipeline_mode<synchronous>, transform_indices = @transform_4, window_bounds = array<i64: 1, 128>}, {transform_indices = @transform_5, window_bounds = array<i64: 1, 128, 128>}, {transform_indices = @transform_6, window_bounds = array<i64: 1, 128, 128>}, {pipeline_mode = #tpu.pipeline_mode<synchronous>, transform_indices = @transform_7, window_bounds = array<i64: 128, 128>}, {pipeline_mode = #tpu.pipeline_mode<synchronous>, transform_indices = @transform_8, window_bounds = array<i64: 128, 128>}, {pipeline_mode = #tpu.pipeline_mode<synchronous>, transform_indices = @transform_9, window_bounds = array<i64: 1, 128>}, {pipeline_mode = #tpu.pipeline_mode<synchronous>, transform_indices = @transform_10, window_bounds = array<i64: 1, 128>}, {transform_indices = @transform_11, window_bounds = array<i64: 1, 128, 128>}, {transform_indices = @transform_12, window_bounds = array<i64: 1, 128, 128>}, {pipeline_mode = #tpu.pipeline_mode<synchronous>, transform_indices = @transform_13, window_bounds = array<i64: 128, 128>}, {pipeline_mode = #tpu.pipeline_mode<synchronous>, transform_indices = @transform_14, window_bounds = array<i64: 128, 128>}, {pipeline_mode = #tpu.pipeline_mode<synchronous>, transform_indices = @transform_15, window_bounds = array<i64: 1, 128>}, {pipeline_mode = #tpu.pipeline_mode<synchronous>, transform_indices = @transform_16, window_bounds = array<i64: 1, 128>}, {transform_indices = @transform_17, window_bounds = array<i64: 1, 128, 128>}, {transform_indices = @transform_18, window_bounds = array<i64: 1, 128, 128>}, {pipeline_mode = #tpu.pipeline_mode<synchronous>, transform_indices = @transform_19, window_bounds = array<i64: 128, 8>}, {pipeline_mode = #tpu.pipeline_mode<synchronous>, transform_indices = @transform_20, window_bounds = array<i64: 128, 8>}, {pipeline_mode = #tpu.pipeline_mode<synchronous>, transform_indices = @transform_21, window_bounds = array<i64: 1, 8>}, {pipeline_mode = #tpu.pipeline_mode<synchronous>, transform_indices = @transform_22, window_bounds = array<i64: 1, 8>}, {transform_indices = @transform_23, window_bounds = array<i64: 1, 128, 8>}, {transform_indices = @transform_24, window_bounds = array<i64: 1, 128, 8>}, {transform_indices = @transform_25, window_bounds = array<i64: 1, 128, 8>}]} {
    %c0 = arith.constant 0 : index
    %c0_0 = arith.constant 0 : index
    %0 = vector.load %arg2[%c0, %c0_0] : memref<128x8xf32, #tpu.memory_space<vmem>>, vector<128x8xf32>
    %c0_1 = arith.constant 0 : index
    %c0_2 = arith.constant 0 : index
    %1 = vector.load %arg3[%c0_1, %c0_2] : memref<8x128xf32, #tpu.memory_space<vmem>>, vector<8x128xf32>
    %cst = arith.constant dense<0.000000e+00> : vector<128x128xf32>
    %2 = tpu.matmul %0, %1, %cst {dimension_numbers = #tpu.dot_dimension_numbers<[1], [0], [0], [1], [0, 0, 1, 1], [], []>} : vector<128x8xf32>, vector<8x128xf32>, vector<128x128xf32> -> vector<128x128xf32>
    %3 = arith.mulf %0, %0 : vector<128x8xf32>
    %c0_3 = arith.constant 0 : index
    %c0_4 = arith.constant 0 : index
    %4 = vector.load %arg4[%c0_3, %c0_4] : memref<8x128xf32, #tpu.memory_space<vmem>>, vector<8x128xf32>
    %cst_5 = arith.constant dense<0.000000e+00> : vector<128x128xf32>
    %5 = tpu.matmul %3, %4, %cst_5 {dimension_numbers = #tpu.dot_dimension_numbers<[1], [0], [0], [1], [0, 0, 1, 1], [], []>} : vector<128x8xf32>, vector<8x128xf32>, vector<128x128xf32> -> vector<128x128xf32>
    %cst_6 = arith.constant 9.99999974E-5 : f32
    %6 = vector.broadcast %cst_6 : f32 to vector<128x128xf32>
    %7 = arith.addf %6, %5 : vector<128x128xf32>
    %8 = math.sqrt %7 : vector<128x128xf32>
    %c0_7 = arith.constant 0 : index
    %c0_8 = arith.constant 0 : index
    %c0_9 = arith.constant 0 : index
    %9 = vector.load %arg7[%c0_7, %c0_8, %c0_9] : memref<1x128x128xf32, #tpu.memory_space<vmem>>, vector<1x128x128xf32>
    %10 = vector.shape_cast %9 : vector<1x128x128xf32> to vector<128x128xf32>
    %11 = arith.mulf %8, %10 : vector<128x128xf32>
    %12 = arith.addf %2, %11 : vector<128x128xf32>
    %c0_10 = arith.constant 0 : index
    %c0_11 = arith.constant 0 : index
    %13 = vector.load %arg5[%c0_10, %c0_11] : memref<1x128xf32, #tpu.memory_space<vmem>>, vector<1x128xf32>
    %14 = vector.broadcast %13 : vector<1x128xf32> to vector<128x128xf32>
    %15 = arith.addf %12, %14 : vector<128x128xf32>
    %c0_12 = arith.constant 0 : index
    %c0_13 = arith.constant 0 : index
    %16 = vector.load %arg6[%c0_12, %c0_13] : memref<1x128xf32, #tpu.memory_space<vmem>>, vector<1x128xf32>
    %c0_14 = arith.constant 0 : index
    %c0_15 = arith.constant 0 : index
    %c0_16 = arith.constant 0 : index
    %17 = vector.load %arg8[%c0_14, %c0_15, %c0_16] : memref<1x128x128xf32, #tpu.memory_space<vmem>>, vector<1x128x128xf32>
    %18 = vector.shape_cast %17 : vector<1x128x128xf32> to vector<128x128xf32>
    %19 = vector.broadcast %16 : vector<1x128xf32> to vector<128x128xf32>
    %20 = arith.mulf %19, %18 : vector<128x128xf32>
    %21 = arith.addf %15, %20 : vector<128x128xf32>
    %cst_17 = arith.constant 0.000000e+00 : f32
    %22 = vector.broadcast %cst_17 : f32 to vector<128x128xf32>
    %23 = arith.maximumf %21, %22 : vector<128x128xf32>
    %c0_18 = arith.constant 0 : index
    %c0_19 = arith.constant 0 : index
    %24 = vector.load %arg9[%c0_18, %c0_19] : memref<128x128xf32, #tpu.memory_space<vmem>>, vector<128x128xf32>
    %cst_20 = arith.constant dense<0.000000e+00> : vector<128x128xf32>
    %25 = tpu.matmul %23, %24, %cst_20 {dimension_numbers = #tpu.dot_dimension_numbers<[1], [0], [0], [1], [0, 0, 1, 1], [], []>} : vector<128x128xf32>, vector<128x128xf32>, vector<128x128xf32> -> vector<128x128xf32>
    %26 = arith.mulf %23, %23 : vector<128x128xf32>
    %c0_21 = arith.constant 0 : index
    %c0_22 = arith.constant 0 : index
    %27 = vector.load %arg10[%c0_21, %c0_22] : memref<128x128xf32, #tpu.memory_space<vmem>>, vector<128x128xf32>
    %cst_23 = arith.constant dense<0.000000e+00> : vector<128x128xf32>
    %28 = tpu.matmul %26, %27, %cst_23 {dimension_numbers = #tpu.dot_dimension_numbers<[1], [0], [0], [1], [0, 0, 1, 1], [], []>} : vector<128x128xf32>, vector<128x128xf32>, vector<128x128xf32> -> vector<128x128xf32>
    %cst_24 = arith.constant 9.99999974E-5 : f32
    %29 = vector.broadcast %cst_24 : f32 to vector<128x128xf32>
    %30 = arith.addf %29, %28 : vector<128x128xf32>
    %31 = math.sqrt %30 : vector<128x128xf32>
    %c0_25 = arith.constant 0 : index
    %c0_26 = arith.constant 0 : index
    %c0_27 = arith.constant 0 : index
    %32 = vector.load %arg13[%c0_25, %c0_26, %c0_27] : memref<1x128x128xf32, #tpu.memory_space<vmem>>, vector<1x128x128xf32>
    %33 = vector.shape_cast %32 : vector<1x128x128xf32> to vector<128x128xf32>
    %34 = arith.mulf %31, %33 : vector<128x128xf32>
    %35 = arith.addf %25, %34 : vector<128x128xf32>
    %c0_28 = arith.constant 0 : index
    %c0_29 = arith.constant 0 : index
    %36 = vector.load %arg11[%c0_28, %c0_29] : memref<1x128xf32, #tpu.memory_space<vmem>>, vector<1x128xf32>
    %37 = vector.broadcast %36 : vector<1x128xf32> to vector<128x128xf32>
    %38 = arith.addf %35, %37 : vector<128x128xf32>
    %c0_30 = arith.constant 0 : index
    %c0_31 = arith.constant 0 : index
    %39 = vector.load %arg12[%c0_30, %c0_31] : memref<1x128xf32, #tpu.memory_space<vmem>>, vector<1x128xf32>
    %c0_32 = arith.constant 0 : index
    %c0_33 = arith.constant 0 : index
    %c0_34 = arith.constant 0 : index
    %40 = vector.load %arg14[%c0_32, %c0_33, %c0_34] : memref<1x128x128xf32, #tpu.memory_space<vmem>>, vector<1x128x128xf32>
    %41 = vector.shape_cast %40 : vector<1x128x128xf32> to vector<128x128xf32>
    %42 = vector.broadcast %39 : vector<1x128xf32> to vector<128x128xf32>
    %43 = arith.mulf %42, %41 : vector<128x128xf32>
    %44 = arith.addf %38, %43 : vector<128x128xf32>
    %cst_35 = arith.constant 0.000000e+00 : f32
    %45 = vector.broadcast %cst_35 : f32 to vector<128x128xf32>
    %46 = arith.maximumf %44, %45 : vector<128x128xf32>
    %47 = arith.addf %23, %46 : vector<128x128xf32>
    %c0_36 = arith.constant 0 : index
    %c0_37 = arith.constant 0 : index
    %48 = vector.load %arg15[%c0_36, %c0_37] : memref<128x128xf32, #tpu.memory_space<vmem>>, vector<128x128xf32>
    %cst_38 = arith.constant dense<0.000000e+00> : vector<128x128xf32>
    %49 = tpu.matmul %47, %48, %cst_38 {dimension_numbers = #tpu.dot_dimension_numbers<[1], [0], [0], [1], [0, 0, 1, 1], [], []>} : vector<128x128xf32>, vector<128x128xf32>, vector<128x128xf32> -> vector<128x128xf32>
    %50 = arith.mulf %47, %47 : vector<128x128xf32>
    %c0_39 = arith.constant 0 : index
    %c0_40 = arith.constant 0 : index
    %51 = vector.load %arg16[%c0_39, %c0_40] : memref<128x128xf32, #tpu.memory_space<vmem>>, vector<128x128xf32>
    %cst_41 = arith.constant dense<0.000000e+00> : vector<128x128xf32>
    %52 = tpu.matmul %50, %51, %cst_41 {dimension_numbers = #tpu.dot_dimension_numbers<[1], [0], [0], [1], [0, 0, 1, 1], [], []>} : vector<128x128xf32>, vector<128x128xf32>, vector<128x128xf32> -> vector<128x128xf32>
    %cst_42 = arith.constant 9.99999974E-5 : f32
    %53 = vector.broadcast %cst_42 : f32 to vector<128x128xf32>
    %54 = arith.addf %53, %52 : vector<128x128xf32>
    %55 = math.sqrt %54 : vector<128x128xf32>
    %c0_43 = arith.constant 0 : index
    %c0_44 = arith.constant 0 : index
    %c0_45 = arith.constant 0 : index
    %56 = vector.load %arg19[%c0_43, %c0_44, %c0_45] : memref<1x128x128xf32, #tpu.memory_space<vmem>>, vector<1x128x128xf32>
    %57 = vector.shape_cast %56 : vector<1x128x128xf32> to vector<128x128xf32>
    %58 = arith.mulf %55, %57 : vector<128x128xf32>
    %59 = arith.addf %49, %58 : vector<128x128xf32>
    %c0_46 = arith.constant 0 : index
    %c0_47 = arith.constant 0 : index
    %60 = vector.load %arg17[%c0_46, %c0_47] : memref<1x128xf32, #tpu.memory_space<vmem>>, vector<1x128xf32>
    %61 = vector.broadcast %60 : vector<1x128xf32> to vector<128x128xf32>
    %62 = arith.addf %59, %61 : vector<128x128xf32>
    %c0_48 = arith.constant 0 : index
    %c0_49 = arith.constant 0 : index
    %63 = vector.load %arg18[%c0_48, %c0_49] : memref<1x128xf32, #tpu.memory_space<vmem>>, vector<1x128xf32>
    %c0_50 = arith.constant 0 : index
    %c0_51 = arith.constant 0 : index
    %c0_52 = arith.constant 0 : index
    %64 = vector.load %arg20[%c0_50, %c0_51, %c0_52] : memref<1x128x128xf32, #tpu.memory_space<vmem>>, vector<1x128x128xf32>
    %65 = vector.shape_cast %64 : vector<1x128x128xf32> to vector<128x128xf32>
    %66 = vector.broadcast %63 : vector<1x128xf32> to vector<128x128xf32>
    %67 = arith.mulf %66, %65 : vector<128x128xf32>
    %68 = arith.addf %62, %67 : vector<128x128xf32>
    %cst_53 = arith.constant 0.000000e+00 : f32
    %69 = vector.broadcast %cst_53 : f32 to vector<128x128xf32>
    %70 = arith.maximumf %68, %69 : vector<128x128xf32>
    %71 = arith.addf %47, %70 : vector<128x128xf32>
    %c0_54 = arith.constant 0 : index
    %c0_55 = arith.constant 0 : index
    %72 = vector.load %arg21[%c0_54, %c0_55] : memref<128x8xf32, #tpu.memory_space<vmem>>, vector<128x8xf32>
    %cst_56 = arith.constant dense<0.000000e+00> : vector<128x8xf32>
    %73 = tpu.matmul %71, %72, %cst_56 {dimension_numbers = #tpu.dot_dimension_numbers<[1], [0], [0], [1], [0, 0, 1, 1], [], []>} : vector<128x128xf32>, vector<128x8xf32>, vector<128x8xf32> -> vector<128x8xf32>
    %74 = arith.mulf %71, %71 : vector<128x128xf32>
    %c0_57 = arith.constant 0 : index
    %c0_58 = arith.constant 0 : index
    %75 = vector.load %arg22[%c0_57, %c0_58] : memref<128x8xf32, #tpu.memory_space<vmem>>, vector<128x8xf32>
    %cst_59 = arith.constant dense<0.000000e+00> : vector<128x8xf32>
    %76 = tpu.matmul %74, %75, %cst_59 {dimension_numbers = #tpu.dot_dimension_numbers<[1], [0], [0], [1], [0, 0, 1, 1], [], []>} : vector<128x128xf32>, vector<128x8xf32>, vector<128x8xf32> -> vector<128x8xf32>
    %cst_60 = arith.constant 9.99999974E-5 : f32
    %77 = vector.broadcast %cst_60 : f32 to vector<128x8xf32>
    %78 = arith.addf %77, %76 : vector<128x8xf32>
    %79 = math.sqrt %78 : vector<128x8xf32>
    %c0_61 = arith.constant 0 : index
    %c0_62 = arith.constant 0 : index
    %c0_63 = arith.constant 0 : index
    %80 = vector.load %arg25[%c0_61, %c0_62, %c0_63] : memref<1x128x8xf32, #tpu.memory_space<vmem>>, vector<1x128x8xf32>
    %81 = vector.shape_cast %80 : vector<1x128x8xf32> to vector<128x8xf32>
    %82 = arith.mulf %79, %81 : vector<128x8xf32>
    %83 = arith.addf %73, %82 : vector<128x8xf32>
    %c0_64 = arith.constant 0 : index
    %c0_65 = arith.constant 0 : index
    %84 = vector.load %arg23[%c0_64, %c0_65] : memref<1x8xf32, #tpu.memory_space<vmem>>, vector<1x8xf32>
    %85 = vector.broadcast %84 : vector<1x8xf32> to vector<128x8xf32>
    %86 = arith.addf %83, %85 : vector<128x8xf32>
    %c0_66 = arith.constant 0 : index
    %c0_67 = arith.constant 0 : index
    %87 = vector.load %arg24[%c0_66, %c0_67] : memref<1x8xf32, #tpu.memory_space<vmem>>, vector<1x8xf32>
    %c0_68 = arith.constant 0 : index
    %c0_69 = arith.constant 0 : index
    %c0_70 = arith.constant 0 : index
    %88 = vector.load %arg26[%c0_68, %c0_69, %c0_70] : memref<1x128x8xf32, #tpu.memory_space<vmem>>, vector<1x128x8xf32>
    %89 = vector.shape_cast %88 : vector<1x128x8xf32> to vector<128x8xf32>
    %90 = vector.broadcast %87 : vector<1x8xf32> to vector<128x8xf32>
    %91 = arith.mulf %90, %89 : vector<128x8xf32>
    %92 = arith.addf %86, %91 : vector<128x8xf32>
    %c0_71 = arith.constant 0 : index
    %c0_72 = arith.constant 0 : index
    %c0_73 = arith.constant 0 : index
    %93 = vector.load %arg27[%c0_71, %c0_72, %c0_73] : memref<1x128x8xf32, #tpu.memory_space<vmem>>, vector<1x128x8xf32>
    %94 = vector.shape_cast %93 : vector<1x128x8xf32> to vector<128x8xf32>
    %95 = vector.shape_cast %92 : vector<128x8xf32> to vector<1x128x8xf32>
    tpu.vector_store %arg27[%c0_71, %c0_72, %c0_73], %95 {strides = array<i32>} : memref<1x128x8xf32, #tpu.memory_space<vmem>>, vector<1x128x8xf32>,
    return
  }
  func.func @transform_0(%arg0: i32, %arg1: i32) -> (i32, i32) {
    %c0_i32 = arith.constant 0 : i32
    %c0_i32_0 = arith.constant 0 : i32
    return %arg0, %c0_i32 : i32, i32
  }
  func.func @transform_1(%arg0: i32, %arg1: i32) -> (i32, i32) {
    %c0_i32 = arith.constant 0 : i32
    %c0_i32_0 = arith.constant 0 : i32
    %c0_i32_1 = arith.constant 0 : i32
    return %c0_i32, %c0_i32_0 : i32, i32
  }
  func.func @transform_2(%arg0: i32, %arg1: i32) -> (i32, i32) {
    %c0_i32 = arith.constant 0 : i32
    %c0_i32_0 = arith.constant 0 : i32
    %c0_i32_1 = arith.constant 0 : i32
    return %c0_i32, %c0_i32_0 : i32, i32
  }
  func.func @transform_3(%arg0: i32, %arg1: i32) -> (i32, i32) {
    %c0_i32 = arith.constant 0 : i32
    %c0_i32_0 = arith.constant 0 : i32
    %c0_i32_1 = arith.constant 0 : i32
    return %c0_i32, %c0_i32_0 : i32, i32
  }
  func.func @transform_4(%arg0: i32, %arg1: i32) -> (i32, i32) {
    %c0_i32 = arith.constant 0 : i32
    %c0_i32_0 = arith.constant 0 : i32
    %c0_i32_1 = arith.constant 0 : i32
    return %c0_i32, %c0_i32_0 : i32, i32
  }
  func.func @transform_5(%arg0: i32, %arg1: i32) -> (i32, i32, i32) {
    %c0_i32 = arith.constant 0 : i32
    %c0_i32_0 = arith.constant 0 : i32
    return %arg1, %arg0, %c0_i32 : i32, i32, i32
  }
  func.func @transform_6(%arg0: i32, %arg1: i32) -> (i32, i32, i32) {
    %c0_i32 = arith.constant 0 : i32
    %c0_i32_0 = arith.constant 0 : i32
    return %arg1, %arg0, %c0_i32 : i32, i32, i32
  }
  func.func @transform_7(%arg0: i32, %arg1: i32) -> (i32, i32) {
    %c0_i32 = arith.constant 0 : i32
    %c0_i32_0 = arith.constant 0 : i32
    %c0_i32_1 = arith.constant 0 : i32
    return %c0_i32, %c0_i32_0 : i32, i32
  }
  func.func @transform_8(%arg0: i32, %arg1: i32) -> (i32, i32) {
    %c0_i32 = arith.constant 0 : i32
    %c0_i32_0 = arith.constant 0 : i32
    %c0_i32_1 = arith.constant 0 : i32
    return %c0_i32, %c0_i32_0 : i32, i32
  }
  func.func @transform_9(%arg0: i32, %arg1: i32) -> (i32, i32) {
    %c0_i32 = arith.constant 0 : i32
    %c0_i32_0 = arith.constant 0 : i32
    %c0_i32_1 = arith.constant 0 : i32
    return %c0_i32, %c0_i32_0 : i32, i32
  }
  func.func @transform_10(%arg0: i32, %arg1: i32) -> (i32, i32) {
    %c0_i32 = arith.constant 0 : i32
    %c0_i32_0 = arith.constant 0 : i32
    %c0_i32_1 = arith.constant 0 : i32
    return %c0_i32, %c0_i32_0 : i32, i32
  }
  func.func @transform_11(%arg0: i32, %arg1: i32) -> (i32, i32, i32) {
    %c0_i32 = arith.constant 0 : i32
    %c0_i32_0 = arith.constant 0 : i32
    return %arg1, %arg0, %c0_i32 : i32, i32, i32
  }
  func.func @transform_12(%arg0: i32, %arg1: i32) -> (i32, i32, i32) {
    %c0_i32 = arith.constant 0 : i32
    %c0_i32_0 = arith.constant 0 : i32
    return %arg1, %arg0, %c0_i32 : i32, i32, i32
  }
  func.func @transform_13(%arg0: i32, %arg1: i32) -> (i32, i32) {
    %c0_i32 = arith.constant 0 : i32
    %c0_i32_0 = arith.constant 0 : i32
    %c0_i32_1 = arith.constant 0 : i32
    return %c0_i32, %c0_i32_0 : i32, i32
  }
  func.func @transform_14(%arg0: i32, %arg1: i32) -> (i32, i32) {
    %c0_i32 = arith.constant 0 : i32
    %c0_i32_0 = arith.constant 0 : i32
    %c0_i32_1 = arith.constant 0 : i32
    return %c0_i32, %c0_i32_0 : i32, i32
  }
  func.func @transform_15(%arg0: i32, %arg1: i32) -> (i32, i32) {
    %c0_i32 = arith.constant 0 : i32
    %c0_i32_0 = arith.constant 0 : i32
    %c0_i32_1 = arith.constant 0 : i32
    return %c0_i32, %c0_i32_0 : i32, i32
  }
  func.func @transform_16(%arg0: i32, %arg1: i32) -> (i32, i32) {
    %c0_i32 = arith.constant 0 : i32
    %c0_i32_0 = arith.constant 0 : i32
    %c0_i32_1 = arith.constant 0 : i32
    return %c0_i32, %c0_i32_0 : i32, i32
  }
  func.func @transform_17(%arg0: i32, %arg1: i32) -> (i32, i32, i32) {
    %c0_i32 = arith.constant 0 : i32
    %c0_i32_0 = arith.constant 0 : i32
    return %arg1, %arg0, %c0_i32 : i32, i32, i32
  }
  func.func @transform_18(%arg0: i32, %arg1: i32) -> (i32, i32, i32) {
    %c0_i32 = arith.constant 0 : i32
    %c0_i32_0 = arith.constant 0 : i32
    return %arg1, %arg0, %c0_i32 : i32, i32, i32
  }
  func.func @transform_19(%arg0: i32, %arg1: i32) -> (i32, i32) {
    %c0_i32 = arith.constant 0 : i32
    %c0_i32_0 = arith.constant 0 : i32
    %c0_i32_1 = arith.constant 0 : i32
    return %c0_i32, %c0_i32_0 : i32, i32
  }
  func.func @transform_20(%arg0: i32, %arg1: i32) -> (i32, i32) {
    %c0_i32 = arith.constant 0 : i32
    %c0_i32_0 = arith.constant 0 : i32
    %c0_i32_1 = arith.constant 0 : i32
    return %c0_i32, %c0_i32_0 : i32, i32
  }
  func.func @transform_21(%arg0: i32, %arg1: i32) -> (i32, i32) {
    %c0_i32 = arith.constant 0 : i32
    %c0_i32_0 = arith.constant 0 : i32
    %c0_i32_1 = arith.constant 0 : i32
    return %c0_i32, %c0_i32_0 : i32, i32
  }
  func.func @transform_22(%arg0: i32, %arg1: i32) -> (i32, i32) {
    %c0_i32 = arith.constant 0 : i32
    %c0_i32_0 = arith.constant 0 : i32
    %c0_i32_1 = arith.constant 0 : i32
    return %c0_i32, %c0_i32_0 : i32, i32
  }
  func.func @transform_23(%arg0: i32, %arg1: i32) -> (i32, i32, i32) {
    %c0_i32 = arith.constant 0 : i32
    %c0_i32_0 = arith.constant 0 : i32
    return %arg1, %arg0, %c0_i32 : i32, i32, i32
  }
  func.func @transform_24(%arg0: i32, %arg1: i32) -> (i32, i32, i32) {
    %c0_i32 = arith.constant 0 : i32
    %c0_i32_0 = arith.constant 0 : i32
    return %arg1, %arg0, %c0_i32 : i32, i32, i32
  }
  func.func @transform_25(%arg0: i32, %arg1: i32) -> (i32, i32, i32) {
    %c0_i32 = arith.constant 0 : i32
    %c0_i32_0 = arith.constant 0 : i32
    return %arg1, %arg0, %c0_i32 : i32, i32, i32
  }
}

</mosaic_0001>

<bundles_post_ra>
// kernel: mfvi_forward_pallas.1
= control target key start
LH: loop header
LB: loop body
LE: loop exit
PB: predicated region body
PF: predicated region fallthrough
CT: control target
= control target key end

     0   :  { %s7487_s0 = inlined_call_operand.vmem [shape: f32[256,8], index: 0, kind: input, shape index: {}]   ;;  %s7488_s1 = inlined_call_operand.vmem [shape: f32[8,128], index: 1, kind: input, shape index: {}]   ;;  %s7489_s2 = inlined_call_operand.vmem [shape: f32[8,128], index: 2, kind: input, shape index: {}]   ;;  %s7490_s3 = inlined_call_operand.hbm [shape: f32[1,128], index: 3, kind: input, shape index: {}]   ;;  %s7491_s4 = inlined_call_operand.hbm [shape: f32[1,128], index: 4, kind: input, shape index: {}]   ;;  %s7492_s5 = inlined_call_operand.vmem [shape: f32[3,256,128], index: 5, kind: input, shape index: {}]   ;;  %s7493_s6 = inlined_call_operand.vmem [shape: f32[3,256,128], index: 6, kind: input, shape index: {}]   ;;  %s7494_s7 = inlined_call_operand.vmem [shape: f32[128,128], index: 7, kind: input, shape index: {}]   ;;  %s7495_s8 = inlined_call_operand.vmem [shape: f32[128,128], index: 8, kind: input, shape index: {}]   ;;  %s7496_s9 = inlined_call_operand.hbm [shape: f32[1,128], index: 9, kind: input, shape index: {}]   ;;  %s7497_s10 = inlined_call_operand.hbm [shape: f32[1,128], index: 10, kind: input, shape index: {}]   ;;  %s7498_s11 = inlined_call_operand.hbm [shape: f32[3,256,128], index: 11, kind: input, shape index: {}]   ;;  %s7499_s12 = inlined_call_operand.hbm [shape: f32[3,256,128], index: 12, kind: input, shape index: {}]   ;;  %s7500_s13 = inlined_call_operand.vmem [shape: f32[128,128], index: 13, kind: input, shape index: {}]   ;;  %s7501_s14 = inlined_call_operand.vmem [shape: f32[128,128], index: 14, kind: input, shape index: {}]   ;;  %s7502_s15 = inlined_call_operand.hbm [shape: f32[1,128], index: 15, kind: input, shape index: {}]   ;;  %s7503_s16 = inlined_call_operand.hbm [shape: f32[1,128], index: 16, kind: input, shape index: {}]   ;;  %s7504_s17 = inlined_call_operand.hbm [shape: f32[3,256,128], index: 17, kind: input, shape index: {}]   ;;  %s7505_s18 = inlined_call_operand.hbm [shape: f32[3,256,128], index: 18, kind: input, shape index: {}]   ;;  %s7506_s19 = inlined_call_operand.vmem [shape: f32[128,8], index: 19, kind: input, shape index: {}]   ;;  %s7507_s20 = inlined_call_operand.vmem [shape: f32[128,8], index: 20, kind: input, shape index: {}]   ;;  %s7508_s21 = inlined_call_operand.vmem [shape: f32[1,8], index: 21, kind: input, shape index: {}]   ;;  %s7509_s22 = inlined_call_operand.vmem [shape: f32[1,8], index: 22, kind: input, shape index: {}]   ;;  %s7510_s23 = inlined_call_operand.vmem [shape: f32[3,256,8], index: 23, kind: input, shape index: {}]   ;;  %s7511_s24 = inlined_call_operand.vmem [shape: f32[3,256,8], index: 24, kind: input, shape index: {}]   ;;  %s7512_s25 = inlined_call_operand.vmem [shape: f32[3,256,8], index: 25, kind: output, shape index: {}]  }
   0x1   :  { %7532 = sst [smem:[#allocation31_spill]] %s7487_s0 }
   0x2   :  { %7533 = sst [smem:[#allocation32_spill]] %s7488_s1 }
   0x3   :  { %7534 = sst [smem:[#allocation33_spill]] %s7489_s2 }
   0x4   :  { %7535 = sst [smem:[#allocation34_spill]] %s7490_s3 }
   0x5   :  { %7536 = sst [smem:[#allocation35_spill]] %s7491_s4 }
   0x6   :  { %7537 = sst [smem:[#allocation36_spill]] %s7492_s5 }
   0x7   :  { %7538 = sst [smem:[#allocation37_spill]] %s7493_s6 }
   0x8   :  { %7539 = sst [smem:[#allocation38_spill]] %s7494_s7 }
   0x9   :  { %7540 = sst [smem:[#allocation39_spill]] %s7495_s8 }
   0xa   :  { %7541 = sst [smem:[#allocation40_spill]] %s7496_s9 }
   0xb   :  { %7542 = sst [smem:[#allocation41_spill]] %s7497_s10 }
   0xc   :  { %7543 = sst [smem:[#allocation42_spill]] %s7498_s11 }
   0xd   :  { %7544 = sst [smem:[#allocation43_spill]] %s7500_s13 }
   0xe   :  { %7545 = sst [smem:[#allocation44_spill]] %s7501_s14 }
   0xf   :  { %7546 = sst [smem:[#allocation45_spill]] %s7506_s19 }
  0x10   :  { %7547 = sst [smem:[#allocation46_spill]] %s7507_s20 }
  0x11   :  { %7548 = sst [smem:[#allocation47_spill]] %s7508_s21 }
  0x12   :  { %7549 = sst [smem:[#allocation48_spill]] %s7509_s22 }
  0x13   :  { %7550 = sst [smem:[#allocation49_spill]] %s7510_s23 }
  0x14   :  { %7551 = sst [smem:[#allocation50_spill]] %s7511_s24 }
  0x15   :  { %7552 = sst [smem:[#allocation51_spill]] %s7512_s25 }
  0x16   :  { %30 = vsyncpa [#allocation3], 0 }
  0x17   :  { %31 = vsyncpa [#allocation5], 0 }
  0x18   :  { %32 = vsyncpa [#allocation8], 0 }
  0x19   :  { %33 = vsyncpa [#allocation14], 0 }
  0x1a   :  { %35 = vsyncpa [#allocation14 + $0x1], 0  ;;  %s5398_s29 = smov 0   ;;  %s5400_s2 = smov 0  }
  0x1b   :  { %s5402_s6 = smov 0   ;;  %s5404_s30 = smov 0  }
  0x1c   :  { %s5406_s7 = smov 0   ;;  %s5408_s3 = smov 0  }
  0x1d   :  { %s5410_s26 = smov 0   ;;  %s5412_s1 = smov 0  }
  0x1e LB: > { %7553 = sst [smem:[#allocation23_spill]] %s5230_s2  ;;  %s7515_s8 = sadd.s32 4294967295, %s5254_s1   ;;  %s5254_s1 = sphi %s5412_s1, %s41_s1   ;;  %s5250_s26 = sphi %s5410_s26, %s7609_s26   ;;  %s5246_s3 = sphi %s5408_s3, %s7608_s3   ;;  %s5242_s7 = sphi %s5406_s7, %s7607_s7   ;;  %s5238_s30 = sphi %s5404_s30, %s7606_s30   ;;  %s5234_s6 = sphi %s5402_s6, %s7611_s6   ;;  %s5230_s2 = sphi %s5400_s2, %s7610_s2   ;;  %s5226_s29 = sphi %s5398_s29, %s7605_s29  }
  0x1f   : > { %7554 = sst [smem:[#allocation24_spill]] %s5238_s30  ;;  %p3911_p0 = scmp.ge.s32.totalorder %s5254_s1, 1 }
  0x20   : > { %7555 = sst [smem:[#allocation25_spill]] %s5242_s7  ;;  %p5442_p1 = scmp.eq.s32.totalorder %s7515_s8, 0 }
  0x21   : > { %7556 = sst [smem:[#allocation26_spill]] %s5246_s3  ;;  %p672_p2 = scmp.lt.s32.totalorder %s5254_s1, 7 }
  0x22   : > { %7557 = sst [smem:[#allocation27_spill]] %s5250_s26  ;;  %s5256_s28 = smov [#allocation2]  }
  0x23   : > { %s7558_s27 = scalar_select %p5442_p1, 1, 0 }
  0x24   : > { %p5447_p3 = pnand %p3911_p0, %p672_p2  ;;  %s691_s9 = sshll.u32 %s5256_s28, 4  ;;  %s692_s9 = int_to_ptr.vmem [resolvable:$true] %s691_s9 }
  0x25   : > { %s5257_s5 = smov [#allocation4]   ;;  %s5258_s25 = smov [#allocation6]  }
  0x26   : > { %s7559_s4 = scalar_select %p5447_p3, 1, 0 }
  0x27   : > { %p4651_p4 = pneg %p5447_p3  ;;  %s702_s0 = sshll.u32 %s5257_s5, 4  ;;  %s703_s0 = int_to_ptr.vmem [resolvable:$true] %s702_s0 }
  0x28   : > { %s719_s21 = sshll.u32 %s5258_s25, 4  ;;  %s4907_s28 = scalar_lea.vmem %s692_s9, 16  ;;  %s5459_s21 = int_to_ptr.vmem [resolvable:$true] %s719_s21 }
  0x29   : > { %p5455_p5 = pnand %p4651_p4, %p5442_p1  ;;  %p4908_p7 = scmp.ne.s32.totalorder %s692_s9, %s4907_s28 }
  0x2a   : > { %s4914_s5 = scalar_lea.vmem %s692_s9, 32  ;;  %p4915_p10 = scmp.lt.s32.totalorder %s692_s9, %s692_s9 }
  0x2b   : > { %p5463_p6 = pneg %p5455_p5  ;;  %p4916_p11 = scmp.lt.s32.totalorder %s4914_s5, %s4907_s28 }
  0x2d   : > { %p4910_p8 = pnand %p4908_p7, %p5463_p6  ;;  %p4917_p12 = por %p4916_p11, %p4915_p10 }
  0x2f   : > { %p4911_p9 = pneg %p4910_p8 }
  0x31   : > { %p4918_p13 = pnand %p4917_p12, %p4911_p9 }
  0x33   : > { %4921 = shalt.err (!%p4918_p13)
}
  0x34   : > { %s7562_s24 = sld [smem:[#allocation34_spill]]  ;;  %s4933_s20 = scalar_lea.vmem %s703_s0, 16 }
  0x35   : > { %p4934_p0 = scmp.ne.s32.totalorder %s703_s0, %s4933_s20  ;;  %s4940_s19 = scalar_lea.vmem %s703_s0, 32 }
  0x36   : > { %p4941_p7 = scmp.lt.s32.totalorder %s703_s0, %s703_s0  ;;  %p4942_p8 = scmp.lt.s32.totalorder %s4940_s19, %s4933_s20 }
  0x37   : > { %p4936_p2 = pnand %p4934_p0, %p5463_p6 }
  0x38   : > { %p4943_p3 = por %p4942_p8, %p4941_p7 }
  0x39   : > { %p4937_p4 = pneg %p4936_p2 }
  0x3a   : > { %4654 = dma.hbm_to_vmem [thread:$0]  (!%p5455_p5), %s7562_s24, 16, %s692_s9, [#allocation3]  }
  0x3b   : > { %p4944_p1 = pnand %p4943_p3, %p4937_p4 }
  0x3d   : > { %4947 = shalt.err (!%p4944_p1)
}
  0x3e   : > { %s7563_s14 = sld [smem:[#allocation35_spill]]  ;;  %s4959_s23 = scalar_lea.vmem %s5459_s21, 16 }
  0x3f   : > { %p4960_p9 = scmp.ne.s32.totalorder %s5459_s21, %s4959_s23  ;;  %s4966_s19 = scalar_lea.vmem %s5459_s21, 32 }
  0x40   : > { %p4967_p3 = scmp.lt.s32.totalorder %s5459_s21, %s5459_s21  ;;  %p4968_p1 = scmp.lt.s32.totalorder %s4966_s19, %s4959_s23 }
  0x41   : > { %p4962_p10 = pnand %p4960_p9, %p5463_p6 }
  0x42   : > { %p4969_p12 = por %p4968_p1, %p4967_p3 }
  0x43   : > { %p4963_p11 = pneg %p4962_p10 }
  0x44   : > { %4657 = dma.hbm_to_vmem [thread:$0]  (!%p5455_p5), %s7563_s14, 16, %s703_s0, [#allocation5]  }
  0x45   : > { %p4970_p13 = pnand %p4969_p12, %p4963_p11 }
  0x47   : > { %4973 = shalt.err (!%p4970_p13)
}
  0x48   : > { %s7564_s9 = sld [smem:[#allocation40_spill]]  ;;  %s5259_s14 = smov [#allocation7]  }
  0x49   : > { %s730_s0 = sshll.u32 %s5259_s14, 4  ;;  %s731_s0 = int_to_ptr.vmem [resolvable:$true] %s730_s0 }
  0x4a   : > { %s4985_s25 = scalar_lea.vmem %s731_s0, 16  ;;  %s4992_s28 = scalar_lea.vmem %s731_s0, 32 }
  0x4b   : > { %p4986_p0 = scmp.ne.s32.totalorder %s731_s0, %s4985_s25  ;;  %p4993_p7 = scmp.lt.s32.totalorder %s731_s0, %s731_s0 }
  0x4c   : > { %p4994_p8 = scmp.lt.s32.totalorder %s4992_s28, %s4985_s25 }
  0x4d   : > { %p4988_p2 = pnand %p4986_p0, %p5463_p6 }
  0x4e   : > { %4660 = dma.hbm_to_vmem [thread:$0]  (!%p5455_p5), %s7564_s9, 16, %s5459_s21, [#allocation5]  }
  0x4f   : > { %p4989_p4 = pneg %p4988_p2  ;;  %p4995_p9 = por %p4994_p8, %p4993_p7 }
  0x51   : > { %p4996_p10 = pnand %p4995_p9, %p4989_p4 }
  0x53   : > { %4999 = shalt.err (!%p4996_p10)
}
  0x54   : > { %s7565_s10 = sld [smem:[#allocation41_spill]]  ;;  %s50_s21 = sadd.s32 1, %s5246_s3 }
  0x55   : > { %s53_s19 = sadd.s32 1, %s5250_s26  ;;  %p51_p11 = scmp.ge.s32.totalorder %s50_s21, 3 }
  0x56   : > { %s312_s20 = sadd.s32 1, %s5234_s6  ;;  %p319_p3 = scmp.ne.s32.totalorder %s5234_s6, %s5230_s2 }
  0x57   : > { %p320_p1 = scmp.eq.s32.totalorder %s5254_s1, 0  ;;  %s7613_s21 = smov (%p51_p11, %s50_s21), 0 }
  0x58   : > { %7566 = sst [smem:[#allocation28_spill]] %s7613_s21  ;;  %s7615_s19 = smov (!%p51_p11, %s53_s19), %s5250_s26 }
  0x59   : > { %s307_s24 = ssub.s32 %s5246_s3, %s7613_s21  ;;  %p5512_p12 = por %p320_p1, %p319_p3 }
  0x5a   : > { %4663 = dma.hbm_to_vmem [thread:$0]  (!%p5455_p5), %s7565_s10, 16, %s731_s0, [#allocation8]  }
  0x5b   : > { %p55_p13 = scmp.ge.s32.totalorder %s7615_s19, 2  ;;  %p325_p0 = scmp.ne.s32.totalorder %s5230_s2, %s5226_s29 }
  0x5c   : > { %p4689_p2 = scmp.lt.s32.totalorder %s5254_s1, 6  ;;  %p7569_p4 = scmp.ne.s32.totalorder %s7558_s27, 0 }
  0x5d   : > { %s7617_s19 = smov (%p55_p13, %s7615_s19), 0  ;;  %s818_s28 = sand.u32 1, %s5234_s6  }
  0x5e   : > { %7568 = sst [smem:[#allocation29_spill]] %s7617_s19  ;;  %p5524_p7 = por %p7569_p4, %p325_p0 }
  0x5f   : > { %s308_s25 = ssub.s32 %s5250_s26, %s7617_s19  ;;  %s5531_s23 = sshll.u32 %s818_s28, 7 }
  0x60   : > { %s7570_s0 = scalar_select %p5524_p7, 1, 0 }
  0x61   : > { %s309_s5 = sor.u32 %s308_s25, %s307_s24  ;;  %s3920_s29 = sshll.u32 %s5250_s26, 4 }
  0x62   : > { %7571 = sst [smem:[#allocation30_spill]] %s7570_s0  ;;  %p310_p8 = scmp.eq.s32.totalorder %s309_s5, 0 }
  0x63   : > { %s3921_s14 = sshll.u32 %s5246_s3, 5  ;;  %s820_s13 = scalar_lea.vmem [#allocation9], %s5531_s23 }
  0x64   : > { %s5536_s10 = scalar_select %p310_p8, %s5234_s6, %s312_s20  }
  0x65   : > { %s826_s21 = sadd.s32 %s3921_s14, %s3920_s29  ;;  %s829_s30 = sshll.u32 %s820_s13, 4  ;;  %s830_s30 = int_to_ptr.vmem [resolvable:$true] %s829_s30 }
  0x66   : > { %s5539_s7 = sshll.u32 %s826_s21, 7  ;;  %s7572_s11 = sld [smem:[#allocation42_spill]] }
  0x67   : > { %p5549_p9 = pnand %p4689_p2, %p5512_p12  ;;  %s7574_s25 = sand.u32 1, %s5254_s1  }
  0x68   : > { %s5555_s20 = scalar_lea.sflag [#allocation3], %s7574_s25  ;;  %s5013_s13 = scalar_lea.vmem %s830_s30, 2048 }
  0x69   : > { %p7531_p10 = pneg %p5549_p9  ;;  %p5014_p11 = scmp.ne.s32.totalorder %s830_s30, %s5013_s13 }
  0x6a   : > { %s5260_s2 = smov [#allocation9]  }
  0x6b   : > { %p5016_p3 = pnand %p5014_p11, %p7531_p10  ;;  %s5018_s21 = sshll.u32 %s5260_s2, 4  ;;  %s5019_s21 = int_to_ptr.vmem [resolvable:$false] %s5018_s21 }
  0x6c   : > { %s828_s19 = scalar_lea.hbm %s7572_s11, %s5539_s7  ;;  %s5020_s9 = scalar_lea.vmem %s5019_s21, 4096 }
  0x6d   : > { %p5017_p1 = pneg %p5016_p3  ;;  %p5021_p12 = scmp.lt.s32.totalorder %s830_s30, %s5019_s21 }
  0x6e   : > { %p5022_p13 = scmp.lt.s32.totalorder %s5020_s9, %s5013_s13 }
  0x70   : > { %p5023_p0 = por %p5022_p13, %p5021_p12 }
  0x72   : > { %p5024_p2 = pnand %p5023_p0, %p5017_p1 }
  0x74   : > { %5027 = shalt.err (!%p5024_p2)
}
  0x75   : > { %s5261_s14 = smov 128   ;;  %s5262_s0 = smov 8  }
  0x76   : > { %4673 = dma.hbm_to_vmem [thread:$0]  (!%p5549_p9), %s828_s19, 2048, %s830_s30, %s5555_s20, %s5261_s14, %s5261_s14, %s5262_s0  }
  0x77   : > { %s874_s29 = scalar_lea.hbm %s7504_s17, %s5539_s7  ;;  %s866_s25 = scalar_lea.vmem [#allocation13], %s5531_s23 }
  0x78   : > { %s875_s13 = sshll.u32 %s866_s25, 4  ;;  %s5263_s2 = smov [#allocation11]   ;;  %s876_s13 = int_to_ptr.vmem [resolvable:$true] %s875_s13 }
  0x79   : > { %s747_s21 = sshll.u32 %s5263_s2, 4  ;;  %s7575_s9 = sand.u32 1, %s5254_s1   ;;  %s748_s21 = int_to_ptr.vmem [resolvable:$true] %s747_s21 }
  0x7a   : > { %s5575_s11 = scalar_lea.sflag [#allocation14], %s7575_s9  ;;  %s5041_s26 = scalar_lea.vmem %s876_s13, 2048 }
  0x7b   : > { %p5042_p4 = scmp.ne.s32.totalorder %s876_s13, %s5041_s26  ;;  %s5264_s3 = smov [#allocation13]  }
  0x7c   : > { %s5046_s30 = sshll.u32 %s5264_s3, 4  ;;  %s5047_s30 = int_to_ptr.vmem [resolvable:$false] %s5046_s30 }
  0x7d   : > { %p5044_p8 = pnand %p5042_p4, %p7531_p10  ;;  %s5048_s19 = scalar_lea.vmem %s5047_s30, 4096 }
  0x7e   : > { %p5049_p3 = scmp.lt.s32.totalorder %s876_s13, %s5047_s30  ;;  %p5050_p1 = scmp.lt.s32.totalorder %s5048_s19, %s5041_s26 }
  0x7f   : > { %p5045_p11 = pneg %p5044_p8 }
  0x80   : > { %p5051_p12 = por %p5050_p1, %p5049_p3 }
  0x82   : > { %p5052_p13 = pnand %p5051_p12, %p5045_p11 }
  0x84   : > { %5055 = shalt.err (!%p5052_p13)
}
  0x85   : > { %4679 = dma.hbm_to_vmem [thread:$0]  (!%p5549_p9), %s874_s29, 2048, %s876_s13, %s5575_s11, %s5261_s14, %s5261_s14, %s5262_s0  }
  0x86   : > { %s5067_s28 = scalar_lea.vmem %s748_s21, 16  ;;  %s5074_s3 = scalar_lea.vmem %s748_s21, 32 }
  0x87   : > { %p5068_p0 = scmp.ne.s32.totalorder %s748_s21, %s5067_s28  ;;  %p5075_p8 = scmp.lt.s32.totalorder %s748_s21, %s748_s21 }
  0x88   : > { %p5076_p10 = scmp.lt.s32.totalorder %s5074_s3, %s5067_s28 }
  0x89   : > { %p5070_p2 = pnand %p5068_p0, %p5463_p6 }
  0x8a   : > { %p5077_p3 = por %p5076_p10, %p5075_p8 }
  0x8b   : > { %p5071_p4 = pneg %p5070_p2 }
  0x8d   : > { %p5078_p11 = pnand %p5077_p3, %p5071_p4 }
  0x8f   : > { %5081 = shalt.err (!%p5078_p11)
}
  0x90   : > { %4666 = dma.hbm_to_vmem [thread:$0]  (!%p5455_p5), %s7502_s15, 16, %s748_s21, [#allocation5]  }
  0x91   : > { %s5265_s29 = smov [#allocation12]   ;;  %s851_s9 = scalar_lea.hbm %s7499_s12, %s5539_s7 }
  0x92   : > { %s758_s25 = sshll.u32 %s5265_s29, 4  ;;  %s759_s25 = int_to_ptr.vmem [resolvable:$true] %s758_s25 }
  0x93   : > { %s5093_s30 = scalar_lea.vmem %s759_s25, 16  ;;  %s5100_s19 = scalar_lea.vmem %s759_s25, 32 }
  0x94   : > { %p5094_p1 = scmp.ne.s32.totalorder %s759_s25, %s5093_s30  ;;  %p5101_p13 = scmp.lt.s32.totalorder %s759_s25, %s759_s25 }
  0x95   : > { %p5102_p0 = scmp.lt.s32.totalorder %s5100_s19, %s5093_s30 }
  0x96   : > { %p5096_p10 = pnand %p5094_p1, %p5463_p6 }
  0x97   : > { %p5103_p2 = por %p5102_p0, %p5101_p13 }
  0x98   : > { %p5097_p12 = pneg %p5096_p10 }
  0x9a   : > { %p5104_p4 = pnand %p5103_p2, %p5097_p12 }
  0x9c   : > { %5107 = shalt.err (!%p5104_p4)
}
  0x9d   : > { %4669 = dma.hbm_to_vmem [thread:$0]  (!%p5455_p5), %s7503_s16, 16, %s759_s25, [#allocation8]  }
  0x9e   : > { %s843_s3 = scalar_lea.vmem [#allocation10], %s5531_s23  ;;  %s897_s29 = scalar_lea.hbm %s7505_s18, %s5539_s7 }
  0x9f   : > { %s852_s26 = sshll.u32 %s843_s3, 4  ;;  %p7576_p8 = pneg %p5549_p9  ;;  %s853_s26 = int_to_ptr.vmem [resolvable:$true] %s852_s26 }
  0xa0   : > { %s5121_s13 = scalar_lea.vmem %s853_s26, 2048  ;;  %s5266_s8 = smov [#allocation10]  }
  0xa1   : > { %p5122_p6 = scmp.ne.s32.totalorder %s853_s26, %s5121_s13  ;;  %s5126_s2 = sshll.u32 %s5266_s8, 4  ;;  %s5127_s2 = int_to_ptr.vmem [resolvable:$false] %s5126_s2 }
  0xa2   : > { %s5128_s30 = scalar_lea.vmem %s5127_s2, 4096  ;;  %p5129_p1 = scmp.lt.s32.totalorder %s853_s26, %s5127_s2 }
  0xa3   : > { %p5124_p3 = pnand %p5122_p6, %p7576_p8  ;;  %p5130_p10 = scmp.lt.s32.totalorder %s5128_s30, %s5121_s13 }
  0xa5   : > { %p5125_p11 = pneg %p5124_p3  ;;  %p5131_p5 = por %p5130_p10, %p5129_p1 }
  0xa7   : > { %p5132_p12 = pnand %p5131_p5, %p5125_p11 }
  0xa9   : > { %5135 = shalt.err (!%p5132_p12)
}
  0xaa   : > { %4676 = dma.hbm_to_vmem [thread:$0]  (!%p5549_p9), %s851_s9, 2048, %s853_s26, %s5555_s20, %s5261_s14, %s5261_s14, %s5262_s0  }
  0xab   : > { %s889_s21 = scalar_lea.vmem [#allocation15], %s5531_s23  ;;  %p7577_p0 = pmov %p7576_p8 }
  0xac   : > { %s898_s28 = sshll.u32 %s889_s21, 4  ;;  %s5267_s22 = smov [#allocation15]   ;;  %s899_s28 = int_to_ptr.vmem [resolvable:$true] %s898_s28 }
  0xad   : > { %s5149_s3 = scalar_lea.vmem %s899_s28, 2048  ;;  %s5154_s5 = sshll.u32 %s5267_s22, 4  ;;  %s5155_s5 = int_to_ptr.vmem [resolvable:$false] %s5154_s5 }
  0xae   : > { %p5150_p13 = scmp.ne.s32.totalorder %s899_s28, %s5149_s3  ;;  %s5156_s13 = scalar_lea.vmem %s5155_s5, 4096 }
  0xaf   : > { %p5157_p6 = scmp.lt.s32.totalorder %s899_s28, %s5155_s5  ;;  %p5158_p8 = scmp.lt.s32.totalorder %s5156_s13, %s5149_s3 }
  0xb0   : > { %p5152_p2 = pnand %p5150_p13, %p7577_p0 }
  0xb1   : > { %p5159_p3 = por %p5158_p8, %p5157_p6 }
  0xb2   : > { %p5153_p4 = pneg %p5152_p2 }
  0xb4   : > { %p5160_p11 = pnand %p5159_p3, %p5153_p4 }
  0xb6   : > { %5163 = shalt.err (!%p5160_p11)
}
  0xb7   : > { %4682 = dma.hbm_to_vmem [thread:$0]  (!%p5549_p9), %s897_s29, 2048, %s899_s28, %s5575_s11, %s5261_s14, %s5261_s14, %s5262_s0  }
  0xb8   : > { %p7578_p1 = scmp.ne.s32.totalorder %s7559_s4, 0 }
  0xb9   : > { %p7579_p10 = scmp.ne.s32.totalorder (!%p7578_p1), %s7558_s27, 0 }
  0xba   : > { %936 = sbr.rel (%p7578_p1) target bundleno = 1189 (0x4a5), region = 120 }
  0xbf   : > { %5197 = dma.done.wait (%p7579_p10), [#allocation3], 16  }
  0xc0   : > { %5199 = vsyncadd (%p7579_p10), [#allocation3], 4294967280 }
  0xc1   : > { %5201 = dma.done.wait (%p7579_p10), [#allocation5], 32  }
  0xc2   : > { %5203 = vsyncadd (%p7579_p10), [#allocation5], 4294967264 }
  0xc3   : > { %5205 = dma.done.wait (%p7579_p10), [#allocation8], 16  }
  0xc4   : > { %5207 = vsyncadd (%p7579_p10), [#allocation8], 4294967280  ;;  %s7580_s11 = sadd.s32 4294967295, %s5254_s1   ;;  %s7581_s7 = sld [smem:[#allocation23_spill]] }
  0xc5   : > { %s954_s24 = sand.u32 1, %s7580_s11  }
  0xc6   : > { %s955_s9 = scalar_lea.sflag [#allocation3], %s954_s24 }
  0xca   : > { %s956_s14 = sand.u32 1, %s7581_s7  }
  0xcb   : > { %s5655_s0 = sshll.u32 %s956_s14, 7 }
  0xcc   : > { %s5658_s26 = scalar_lea.vmem [#allocation9], %s5655_s0 }
  0xcd   : > { %5209 = dma.done.wait (%p5524_p7), %s955_s9, 4096  }
  0xce   : > { %5211 = vsyncadd (%p5524_p7), %s955_s9, 4294963200  ;;  %s5665_s29 = scalar_lea.vmem [#allocation10], %s5655_s0 }
  0xcf   : > { %5213 = dma.done.wait (%p7579_p10), [#allocation5], 16  }
  0xd0   : > { %5215 = vsyncadd (%p7579_p10), [#allocation5], 4294967280 }
  0xd1   : > { %5217 = dma.done.wait (%p7579_p10), [#allocation8], 16  }
  0xd2   : > { %5219 = vsyncadd (%p7579_p10), [#allocation8], 4294967280  ;;  %s981_s8 = scalar_lea.sflag [#allocation14], %s954_s24  ;;  %s5676_s2 = scalar_lea.vmem [#allocation13], %s5655_s0 }
  0xd3   : > { %5221 = dma.done.wait (%p5524_p7), %s981_s8, 4096  }
  0xd4   : > { %5223 = vsyncadd (%p5524_p7), %s981_s8, 4294963200  ;;  %s7583_s30 = sld [smem:[#allocation25_spill]]  ;;  %vm1214_vm0 = vcmask 64512  }
  0xd5   : > { %s7584_s28 = sld [smem:[#allocation31_spill]] }
  0xd6   : > { %s7585_s13 = sld [smem:[#allocation33_spill]] }
  0xd7   : > { %s7586_s11 = sld [smem:[#allocation32_spill]] }
  0xd8   : > { %s7587_s24 = sld [smem:[#allocation38_spill]] }
  0xd9   : > { %s7588_s8 = sld [smem:[#allocation39_spill]] }
  0xda   : > { %s3946_s25 = sshll.u32 %s7583_s30, 4  ;;  %s7590_s21 = sld [smem:[#allocation37_spill]] }
  0xdb   : > { %p1121_p9 = scmp.lt.s32.totalorder %s3946_s25, 31  ;;  %s7592_s23 = sld [smem:[#allocation43_spill]] }
  0xdc   : > { %v1213_v0 = vld [vmem:[%s7585_s13] sm:$0xff]  ;;  %s7593_s7 = sld [smem:[#allocation44_spill]] }
  0xdd   : > { %s7619_s25 = smov (!%p1121_p9, %s3946_s25), 31  ;;  %4231 = vmatprep.subr.mxu0 %v1213_v0  ;;  %v1196_v9 = vld [vmem:[%s7586_s11] sm:$0xff]  ;;  %s7603_s20 = sld [smem:[#allocation47_spill]] }
  0xde   : > { %s3947_s19 = sshll.u32 %s7619_s25, 3  ;;  %4232 = vmatpush3.msra.mxu0 %v1213_v0  ;;  %4257 = vmatprep.subr.mxu1 %v1196_v9  ;;  %v1854_v34 = vld [vmem:[%s7587_s24 + $0x78] sm:$0xff]  ;;  %v1853_v36 = vld [vmem:[%s7587_s24 + $0x70] sm:$0xff]  ;;  %v1852_v38 = vld [vmem:[%s7587_s24 + $0x68] sm:$0xff] }
  0xdf   : > { %s5689_s3 = scalar_lea.vmem %s7584_s28, %s3947_s19  ;;  %4258 = vmatpush3.msra.mxu1 %v1196_v9  ;;  %v1886_v35 = vld [vmem:[%s7588_s8 + $0x78] sm:$0xff]  ;;  %v1885_v37 = vld [vmem:[%s7588_s8 + $0x70] sm:$0xff]  ;;  %v1884_v39 = vld [vmem:[%s7588_s8 + $0x68] sm:$0xff]  ;;  %s7589_s28 = sld [smem:[#allocation24_spill]] }
  0xe0   : > { %v1180_v1 = vld [vmem:[%s5689_s3] sm:$0xff]  ;;  %v1181_v2 = vld [vmem:[%s5689_s3 + $0x8] sm:$0xff]  ;;  %v1182_v5 = vld [vmem:[%s5689_s3 + $0x10] sm:$0xff]  ;;  %4339 = vmatprep.subr.mxu1 %v1854_v34  ;;  %4283 = vmatprep.subr.mxu0 %v1886_v35 }
  0xe1   : > { %v1197_v3 = vmul.f32 %v1180_v1, %v1180_v1  ;;  %v1198_v4 = vmul.f32 %v1181_v2, %v1181_v2  ;;  %v1183_v6 = vld [vmem:[%s5689_s3 + $0x18] sm:$0xff]  ;;  %4259 = vmatprep.mubr.msk.f32.mxu1 %vm1214_vm0, %v1180_v1  ;;  %v1199_v7 = vmul.f32 %v1182_v5, %v1182_v5  ;;  %v1184_v8 = vld [vmem:[%s5689_s3 + $0x20] sm:$0xff]  ;;  %v1185_v12 = vld [vmem:[%s5689_s3 + $0x28] sm:$0xff] }
  0xe2   : > { %v1200_v10 = vmul.f32 %v1183_v6, %v1183_v6  ;;  %v1201_v11 = vmul.f32 %v1184_v8, %v1184_v8  ;;  %v1186_v13 = vld [vmem:[%s5689_s3 + $0x30] sm:$0xff]  ;;  %4260 = vmatmul.mubr.msk.f32.vlgmr.msra.gmra.mxu1 %vm1214_vm0, %v1181_v2  ;;  %v1202_v14 = vmul.f32 %v1185_v12, %v1185_v12  ;;  %v1187_v16 = vld [vmem:[%s5689_s3 + $0x38] sm:$0xff]  ;;  %v1188_v17 = vld [vmem:[%s5689_s3 + $0x40] sm:$0xff] }
  0xe3   : > { %4233 = vmatprep.mubr.msk.f32.mxu0 %vm1214_vm0, %v1197_v3  ;;  %4262 = vmatprep.mubr.msk.f32.mxu1 %vm1214_vm0, %v1182_v5  ;;  %v1203_v15 = vmul.f32 %v1186_v13, %v1186_v13  ;;  %v1204_v18 = vmul.f32 %v1187_v16, %v1187_v16  ;;  %v1205_v19 = vmul.f32 %v1188_v17, %v1188_v17  ;;  %v1189_v20 = vld [vmem:[%s5689_s3 + $0x48] sm:$0xff]  ;;  %v1190_v21 = vld [vmem:[%s5689_s3 + $0x50] sm:$0xff]  ;;  %v1191_v24 = vld [vmem:[%s5689_s3 + $0x58] sm:$0xff] }
  0xe4   : > { %4234 = vmatmul.mubr.msk.f32.vlgmr.msra.gmra.mxu0 %vm1214_vm0, %v1198_v4  ;;  %v1206_v22 = vmul.f32 %v1189_v20, %v1189_v20  ;;  %v1207_v23 = vmul.f32 %v1190_v21, %v1190_v21  ;;  %v1192_v25 = vld [vmem:[%s5689_s3 + $0x60] sm:$0xff]  ;;  %v1208_v26 = vmul.f32 %v1191_v24, %v1191_v24  ;;  %v1193_v28 = vld [vmem:[%s5689_s3 + $0x68] sm:$0xff]  ;;  %v1194_v29 = vld [vmem:[%s5689_s3 + $0x70] sm:$0xff]  ;;  %4340 = vmatpush3.msra.mxu1 %v1854_v34 }
  0xe5   : > { %4236 = vmatprep.mubr.msk.f32.mxu0 %vm1214_vm0, %v1199_v7  ;;  %v1209_v27 = vmul.f32 %v1192_v25, %v1192_v25  ;;  %v1210_v30 = vmul.f32 %v1193_v28, %v1193_v28  ;;  %v1211_v31 = vmul.f32 %v1194_v29, %v1194_v29  ;;  %v1195_v32 = vld [vmem:[%s5689_s3 + $0x78] sm:$0xff]  ;;  %4341 = vmatprep.subr.mxu1 %v1853_v36  ;;  %v1851_v40 = vld [vmem:[%s7587_s24 + $0x60] sm:$0xff]  ;;  %v1849_v44 = vld [vmem:[%s7587_s24 + $0x50] sm:$0xff]  ;;  %p1127_p7 = scmp.lt.s32.totalorder %s7589_s28, 2  ;;  %s7591_s3 = sld [smem:[#allocation36_spill]] }
  0xe6   : > { %4263 = vmatmul.mubr.msk.f32.gmra.mxu1 %vm1214_vm0, %v1183_v6  ;;  %v1212_v33 = vmul.f32 %v1195_v32, %v1195_v32  ;;  %4284 = vmatpush3.msra.mxu0 %v1886_v35  ;;  %v1883_v41 = vld [vmem:[%s7588_s8 + $0x60] sm:$0xff]  ;;  %v1850_v42 = vld [vmem:[%s7587_s24 + $0x58] sm:$0xff]  ;;  %v1881_v45 = vld [vmem:[%s7588_s8 + $0x50] sm:$0xff] }
  0xe7   : > { %4265 = vmatprep.mubr.msk.f32.mxu1 %vm1214_vm0, %v1184_v8  ;;  %4342 = vmatpush3.msra.mxu1 %v1853_v36  ;;  %v1882_v43 = vld [vmem:[%s7588_s8 + $0x58] sm:$0xff]  ;;  %v1848_v46 = vld [vmem:[%s7587_s24 + $0x48] sm:$0xff]  ;;  %v1847_v48 = vld [vmem:[%s7587_s24 + $0x40] sm:$0xff]  ;;  %s7621_s28 = smov (!%p1127_p7, %s7589_s28), 2 }
  0xe8   : > { %4237 = vmatmul.mubr.msk.f32.gmra.mxu0 %vm1214_vm0, %v1200_v10  ;;  %4285 = vmatprep.subr.mxu0 %v1885_v37  ;;  %v1880_v47 = vld [vmem:[%s7588_s8 + $0x48] sm:$0xff]  ;;  %v1879_v49 = vld [vmem:[%s7588_s8 + $0x40] sm:$0xff]  ;;  %v1846_v50 = vld [vmem:[%s7587_s24 + $0x38] sm:$0xff]  ;;  %s3949_s4 = sshll.u32 %s7621_s28, 5 }
  0xe9   : > { %4239 = vmatprep.mubr.msk.f32.mxu0 %vm1214_vm0, %v1201_v11  ;;  %4343 = vmatprep.subr.mxu1 %v1852_v38  ;;  %v1878_v51 = vld [vmem:[%s7588_s8 + $0x38] sm:$0xff]  ;;  %v1845_v52 = vld [vmem:[%s7587_s24 + $0x30] sm:$0xff]  ;;  %v1844_v54 = vld [vmem:[%s7587_s24 + $0x28] sm:$0xff]  ;;  %s1132_s14 = sadd.s32 %s3949_s4, %s7619_s25  ;;  %s7594_s4 = smov %s7593_s7 }
  0xea   : > { %4266 = vmatmul.mubr.msk.f32.gmra.mxu1 %vm1214_vm0, %v1185_v12  ;;  %4286 = vmatpush3.msra.mxu0 %v1885_v37  ;;  %v1877_v53 = vld [vmem:[%s7588_s8 + $0x30] sm:$0xff]  ;;  %v1876_v55 = vld [vmem:[%s7588_s8 + $0x28] sm:$0xff]  ;;  %v1843_v56 = vld [vmem:[%s7587_s24 + $0x20] sm:$0xff]  ;;  %s5848_s9 = sshll.u32 %s1132_s14, 3  ;;  %s7600_s14 = sld [smem:[#allocation50_spill]] }
  0xeb   : > { %4268 = vmatprep.mubr.msk.f32.mxu1 %vm1214_vm0, %v1186_v13  ;;  %4344 = vmatpush3.msra.mxu1 %v1852_v38  ;;  %v1875_v57 = vld [vmem:[%s7588_s8 + $0x20] sm:$0xff]  ;;  %v1842_v58 = vld [vmem:[%s7587_s24 + $0x18] sm:$0xff]  ;;  %v1841_v60 = vld [vmem:[%s7587_s24 + $0x10] sm:$0xff]  ;;  %s5857_s27 = scalar_lea.vmem %s7590_s21, %s5848_s9  ;;  %s5942_s22 = scalar_lea.vmem %s7591_s3, %s5848_s9 }
  0xec   : > { %4240 = vmatmul.mubr.msk.f32.gmra.mxu0 %vm1214_vm0, %v1202_v14  ;;  %4287 = vmatprep.subr.mxu0 %v1884_v39  ;;  %v1874_v59 = vld [vmem:[%s7588_s8 + $0x18] sm:$0xff]  ;;  %v1873_v61 = vld [vmem:[%s7588_s8 + $0x10] sm:$0xff]  ;;  %v1840_v62 = vld [vmem:[%s7587_s24 + $0x8] sm:$0xff]  ;;  %s7598_s3 = sld [smem:[#allocation46_spill]] }
  0xed   : > { %4242 = vmatprep.mubr.msk.f32.mxu0 %vm1214_vm0, %v1203_v15  ;;  %4345 = vmatprep.subr.mxu1 %v1851_v40  ;;  %v1872_v63 = vld [vmem:[%s7588_s8 + $0x8] sm:$0xff]  ;;  %v1839_v0 = vld [vmem:[%s7587_s24] sm:$0xff] }
  0xee   : > { %4269 = vmatmul.mubr.msk.f32.gmra.mxu1 %vm1214_vm0, %v1187_v16  ;;  %4288 = vmatpush3.msra.mxu0 %v1884_v39  ;;  %v1871_v1 = vld [vmem:[%s7588_s8] sm:$0xff]  ;;  %v1770_v13 = vld [vmem:[%s5857_s27 + $0x8] sm:$0xff] }
  0xef   : > { %4271 = vmatprep.mubr.msk.f32.mxu1 %vm1214_vm0, %v1188_v17  ;;  %4346 = vmatpush3.msra.mxu1 %v1851_v40  ;;  %v5867_v12 = vld [vmem:[#allocation4] ss:$0 sm:$0xff]  ;;  %v1771_v17 = vld [vmem:[%s5857_s27 + $0x10] sm:$0xff]  ;;  %v1782_v40 = vld [vmem:[%s5857_s27 + $0x68] sm:$0xff] }
  0xf0   : > { %4243 = vmatmul.mubr.msk.f32.gmra.mxu0 %vm1214_vm0, %v1204_v18  ;;  %4289 = vmatprep.subr.mxu0 %v1883_v41  ;;  %v1769_v16 = vld [vmem:[%s5857_s27] sm:$0xff]  ;;  %v1772_v18 = vld [vmem:[%s5857_s27 + $0x18] sm:$0xff]  ;;  %v5902_v36 = vmul.f32 %v5867_v12, %v1771_v17  ;;  %s7212_s30 = scalar_lea.vmem %s7600_s14, %s5848_s9 }
  0xf1   : > { %4245 = vmatprep.mubr.msk.f32.mxu0 %vm1214_vm0, %v1205_v19  ;;  %4347 = vmatprep.subr.mxu1 %v1850_v42 }
  0xf2   : > { %4272 = vmatmul.mubr.msk.f32.gmra.mxu1 %vm1214_vm0, %v1189_v20  ;;  %4290 = vmatpush3.msra.mxu0 %v1883_v41  ;;  %v1773_v20 = vld [vmem:[%s5857_s27 + $0x20] sm:$0xff] }
  0xf3   : > { %4274 = vmatprep.mubr.msk.f32.mxu1 %vm1214_vm0, %v1190_v21  ;;  %4348 = vmatpush3.msra.mxu1 %v1850_v42  ;;  %v1774_v21 = vld [vmem:[%s5857_s27 + $0x28] sm:$0xff]  ;;  %v5905_v37 = vmul.f32 %v5867_v12, %v1773_v20  ;;  %v5988_v20 = vld [vmem:[#allocation2] ss:$0 sm:$0xff] }
  0xf4   : > { %4246 = vmatmul.mubr.msk.f32.gmra.mxu0 %vm1214_vm0, %v1206_v22  ;;  %4291 = vmatprep.subr.mxu0 %v1882_v43  ;;  %v1775_v22 = vld [vmem:[%s5857_s27 + $0x30] sm:$0xff]  ;;  %v5908_v38 = vmul.f32 %v5867_v12, %v1774_v21 }
  0xf5   : > { %4248 = vmatprep.mubr.msk.f32.mxu0 %vm1214_vm0, %v1207_v23  ;;  %4349 = vmatprep.subr.mxu1 %v1849_v44  ;;  %v5911_v39 = vmul.f32 %v5867_v12, %v1775_v22 }
  0xf6   : > { %4275 = vmatmul.mubr.msk.f32.gmra.mxu1 %vm1214_vm0, %v1191_v24  ;;  %4292 = vmatpush3.msra.mxu0 %v1882_v43  ;;  %v5882_v24 = vmul.f32 %v5867_v12, %v1770_v13 }
  0xf7   : > { %4277 = vmatprep.mubr.msk.f32.mxu1 %vm1214_vm0, %v1192_v25  ;;  %4350 = vmatpush3.msra.mxu1 %v1849_v44  ;;  %v1776_v25 = vld [vmem:[%s5857_s27 + $0x38] sm:$0xff] }
  0xf8   : > { %4249 = vmatmul.mubr.msk.f32.gmra.mxu0 %vm1214_vm0, %v1208_v26  ;;  %4293 = vmatprep.subr.mxu0 %v1881_v45  ;;  %v1777_v26 = vld [vmem:[%s5857_s27 + $0x40] sm:$0xff]  ;;  %v5918_v42 = vmul.f32 %v5867_v12, %v1776_v25 }
  0xf9   : > { %4251 = vmatprep.mubr.msk.f32.mxu0 %vm1214_vm0, %v1209_v27  ;;  %4351 = vmatprep.subr.mxu1 %v1848_v46  ;;  %v1778_v27 = vld [vmem:[%s5857_s27 + $0x48] sm:$0xff]  ;;  %v5921_v43 = vmul.f32 %v5867_v12, %v1777_v26 }
  0xfa   : > { %4278 = vmatmul.mubr.msk.f32.gmra.mxu1 %vm1214_vm0, %v1193_v28  ;;  %4294 = vmatpush3.msra.mxu0 %v1881_v45  ;;  %v5924_v45 = vmul.f32 %v5867_v12, %v1778_v27 }
  0xfb   : > { %4280 = vmatprep.mubr.msk.f32.mxu1 %vm1214_vm0, %v1194_v29  ;;  %4352 = vmatpush3.msra.mxu1 %v1848_v46  ;;  %v5891_v29 = vmul.f32 %v5867_v12, %v1769_v16 }
  0xfc   : > { %4252 = vmatmul.mubr.msk.f32.gmra.mxu0 %vm1214_vm0, %v1210_v30  ;;  %4295 = vmatprep.subr.mxu0 %v1880_v47  ;;  %v5894_v30 = vmul.f32 %v5867_v12, %v1772_v18 }
  0xfd   : > { %4254 = vmatprep.mubr.msk.f32.mxu0 %vm1214_vm0, %v1211_v31  ;;  %4353 = vmatprep.subr.mxu1 %v1847_v48  ;;  %v1779_v31 = vld [vmem:[%s5857_s27 + $0x50] sm:$0xff] }
  0xfe   : > { %4281 = vmatmul.mubr.msk.f32.gmra.mxu1 %vm1214_vm0, %v1195_v32  ;;  %4296 = vmatpush3.msra.mxu0 %v1880_v47  ;;  %v1780_v32 = vld [vmem:[%s5857_s27 + $0x58] sm:$0xff]  ;;  %v5927_v46 = vmul.f32 %v5867_v12, %v1779_v31 }
  0xff   : > { %4354 = vmatpush3.msra.mxu1 %v1847_v48  ;;  %4297 = vmatprep.subr.mxu0 %v1879_v49  ;;  %v5930_v47 = vmul.f32 %v5867_v12, %v1780_v32 }
 0x100   : > { %4255 = vmatmul.mubr.msk.f32.gmra.mxu0 %vm1214_vm0, %v1212_v33  ;;  %4355 = vmatprep.subr.mxu1 %v1846_v50  ;;  %v1781_v33 = vld [vmem:[%s5857_s27 + $0x60] sm:$0xff] }
 0x101   : > { %4298 = vmatpush3.msra.mxu0 %v1879_v49  ;;  %4356 = vmatpush3.msra.mxu1 %v1846_v50  ;;  %v5933_v48 = vmul.f32 %v5867_v12, %v1781_v33  ;;  %v5946_v50 = vmul.f32 %v5867_v12, %v1782_v40  ;;  %v1523_v40 = vld [vmem:[%s5942_s22 + $0x18] sm:$0xff] }
 0x102   : > { %4299 = vmatprep.subr.mxu0 %v1878_v51  ;;  %4357 = vmatprep.subr.mxu1 %v1845_v52 }
 0x103   : > { %4300 = vmatpush3.msra.mxu0 %v1878_v51  ;;  %4358 = vmatpush3.msra.mxu1 %v1845_v52 }
 0x104   : > { %4301 = vmatprep.subr.mxu0 %v1877_v53  ;;  %4359 = vmatprep.subr.mxu1 %v1844_v54 }
 0x105   : > { %4302 = vmatpush3.msra.mxu0 %v1877_v53  ;;  %4360 = vmatpush3.msra.mxu1 %v1844_v54 }
 0x106   : > { %4303 = vmatprep.subr.mxu0 %v1876_v55  ;;  %4361 = vmatprep.subr.mxu1 %v1843_v56 }
 0x107   : > { %4304 = vmatpush3.msra.mxu0 %v1876_v55  ;;  %4362 = vmatpush3.msra.mxu1 %v1843_v56 }
 0x108   : > { %4305 = vmatprep.subr.mxu0 %v1875_v57  ;;  %4363 = vmatprep.subr.mxu1 %v1842_v58 }
 0x109   : > { %4306 = vmatpush3.msra.mxu0 %v1875_v57  ;;  %4364 = vmatpush3.msra.mxu1 %v1842_v58 }
 0x10a   : > { %4307 = vmatprep.subr.mxu0 %v1874_v59  ;;  %4365 = vmatprep.subr.mxu1 %v1841_v60 }
 0x10b   : > { %4308 = vmatpush3.msra.mxu0 %v1874_v59  ;;  %4366 = vmatpush3.msra.mxu1 %v1841_v60  ;;  %v1521_v60 = vld [vmem:[%s5942_s22 + $0x8] sm:$0xff] }
 0x10c   : > { %4309 = vmatprep.subr.mxu0 %v1873_v61  ;;  %4367 = vmatprep.subr.mxu1 %v1840_v62 }
 0x10d   : > { %4310 = vmatpush3.msra.mxu0 %v1873_v61  ;;  %4368 = vmatpush3.msra.mxu1 %v1840_v62 }
 0x10e   : > { %4311 = vmatprep.subr.mxu0 %v1872_v63  ;;  %4369 = vmatprep.subr.mxu1 %v1839_v0 }
 0x10f   : > { %4312 = vmatpush3.msra.mxu0 %v1872_v63  ;;  %4370 = vmatpush3.msra.mxu1 %v1839_v0 }
 0x110   : > { %4313 = vmatprep.subr.mxu0 %v1871_v1 }
 0x111   : > { %4314 = vmatpush3.msra.mxu0 %v1871_v1 }
 0x1a2   : > { %v5846_v5 = vpop.f32.mrf.mxu1 }
 0x1a4   : > { %v4235_v2 = vpop.f32.mrf.mxu0  ;;  %v5859_v8 = vpop.f32.mrf.mxu1 }
 0x1a5   : > { %v5844_v3 = vadd.f32 0.0001, %v4235_v2 }
 0x1a6   : > { %v1329_v4 = vpop.f32.mrf.mxu0  ;;  %v5870_v15 = vpop.f32.mrf.mxu1 }
 0x1a7   : > { %4768 = vrsqrt.f32 %v5844_v3  ;;  %v5851_v6 = vadd.f32 0.0001, %v1329_v4  ;;  %vm1417_vm1 = vcmp.eq.f32.partialorder %v5844_v3, inf  ;;  %vm1419_vm2 = vcmp.eq.f32.partialorder %v5844_v3, 0.0 }
 0x1a8   : > { %v4238_v7 = vpop.f32.mrf.mxu0  ;;  %v5899_v35 = vpop.f32.mrf.mxu1  ;;  %v1420_v53 = vand.u32 2147483648, %v5844_v3 }
 0x1a9   : > { %4770 = vrsqrt.f32 %v5851_v6  ;;  %v5862_v9 = vadd.f32 0.0001, %v4238_v7  ;;  %vm1410_vm3 = vcmp.eq.f32.partialorder %v5851_v6, inf  ;;  %vm1412_vm4 = vcmp.eq.f32.partialorder %v5851_v6, 0.0  ;;  %v1520_v7 = vld [vmem:[%s5942_s22] sm:$0xff] }
 0x1aa   : > { %v1339_v10 = vpop.f32.mrf.mxu0  ;;  %v5952_v54 = vpop.f32.mrf.mxu1  ;;  %v1413_v57 = vand.u32 2147483648, %v5851_v6 }
 0x1ab   : > { %4772 = vrsqrt.f32 %v5862_v9  ;;  %v5865_v11 = vadd.f32 0.0001, %v1339_v10  ;;  %vm1431_vm5 = vcmp.eq.f32.partialorder %v5862_v9, inf  ;;  %vm1433_vm6 = vcmp.eq.f32.partialorder %v5862_v9, 0.0 }
 0x1ac   : > { %v4241_v14 = vpop.f32.mrf.mxu0  ;;  %v1434_v61 = vand.u32 2147483648, %v5862_v9 }
 0x1ad   : > { %4774 = vrsqrt.f32 %v5865_v11  ;;  %v5876_v19 = vadd.f32 0.0001, %v4241_v14  ;;  %vm1424_vm7 = vcmp.eq.f32.partialorder %v5865_v11, inf  ;;  %vm1426_vm8 = vcmp.eq.f32.partialorder %v5865_v11, 0.0  ;;  %v5978_v14 = vpop.f32.mrf.mxu1 }
 0x1ae   : > { %v1349_v23 = vpop.f32.mrf.mxu0  ;;  %v1427_v10 = vand.u32 2147483648, %v5865_v11 }
 0x1af   : > { %4776 = vrsqrt.f32 %v5876_v19  ;;  %v5888_v28 = vadd.f32 0.0001, %v1349_v23  ;;  %vm1445_vm9 = vcmp.eq.f32.partialorder %v5876_v19, inf  ;;  %v1448_v13 = vand.u32 2147483648, %v5876_v19 }
 0x1b0   : > { %v4244_v34 = vpop.f32.mrf.mxu0  ;;  %vm1447_vm10 = vcmp.eq.f32.partialorder %v5876_v19, 0.0 }
 0x1b1   : > { %4778 = vrsqrt.f32 %v5888_v28  ;;  %v5915_v41 = vadd.f32 0.0001, %v4244_v34  ;;  %vm1438_vm11 = vcmp.eq.f32.partialorder %v5888_v28, inf  ;;  %v1441_v25 = vand.u32 2147483648, %v5888_v28 }
 0x1b2   : > { %v1359_v44 = vpop.f32.mrf.mxu0  ;;  %vm1440_vm12 = vcmp.eq.f32.partialorder %v5888_v28, 0.0 }
 0x1b3   : > { %4780 = vrsqrt.f32 %v5915_v41  ;;  %v5936_v49 = vadd.f32 0.0001, %v1359_v44  ;;  %v1462_v26 = vand.u32 2147483648, %v5915_v41  ;;  %vm1459_vm13 = vcmp.eq.f32.partialorder %v5915_v41, inf }
 0x1b4   : > { %v4769_v51 = vpop.eup %4768  ;;  %v4247_v52 = vpop.f32.mrf.mxu0  ;;  %vm1461_vm14 = vcmp.eq.f32.partialorder %v5915_v41, 0.0 }
 0x1b5   : > { %v5954_v55 = vadd.f32 0.0001, %v4247_v52  ;;  %v1416_v56 = vmul.f32 %v4769_v51, %v5844_v3  ;;  %4782 = vrsqrt.f32 %v5936_v49  ;;  %v1455_v51 = vand.u32 2147483648, %v5936_v49 }
 0x1b6   : > { %v4771_v58 = vpop.eup %4770  ;;  %v1369_v59 = vpop.f32.mrf.mxu0  ;;  %vm1452_vm15 = vcmp.eq.f32.partialorder %v5936_v49, inf }
 0x1b7   : > { %4784 = vrsqrt.f32 %v5954_v55  ;;  %v5965_v62 = vadd.f32 0.0001, %v1369_v59  ;;  %v1418_v63 = vsel %vm1417_vm1, %v5844_v3, %v1416_v56  ;;  %v1409_v0 = vmul.f32 %v4771_v58, %v5851_v6 }
 0x1b8   : > { %v4773_v1 = vpop.eup %4772  ;;  %v4250_v2 = vpop.f32.mrf.mxu0  ;;  %v1421_v4 = vsel %vm1419_vm2, %v1420_v53, %v1418_v63  ;;  %v1476_v52 = vand.u32 2147483648, %v5954_v55  ;;  %vm1454_vm1 = vcmp.eq.f32.partialorder %v5936_v49, 0.0  ;;  %vm1473_vm2 = vcmp.eq.f32.partialorder %v5954_v55, inf }
 0x1b9   : > { %4786 = vrsqrt.f32 %v5965_v62  ;;  %v5981_v16 = vadd.f32 0.0001, %v4250_v2  ;;  %v1537_v17 = vmul.f32 %v1521_v60, %v1421_v4  ;;  %v1411_v18 = vsel %vm1410_vm3, %v5851_v6, %v1409_v0 }
 0x1ba   : > { %v4775_v3 = vpop.eup %4774  ;;  %v1379_v21 = vpop.f32.mrf.mxu0  ;;  %v1414_v22 = vsel %vm1412_vm4, %v1413_v57, %v1411_v18  ;;  %v1430_v23 = vmul.f32 %v4773_v1, %v5862_v9  ;;  %v1469_v58 = vand.u32 2147483648, %v5965_v62  ;;  %v1522_v1 = vld [vmem:[%s5942_s22 + $0x10] sm:$0xff]  ;;  %vm1475_vm3 = vcmp.eq.f32.partialorder %v5954_v55, 0.0 }
 0x1bb   : > { %4788 = vrsqrt.f32 %v5981_v16  ;;  %v1672_v27 = vadd.f32 %v5846_v5, %v1537_v17  ;;  %v5997_v31 = vadd.f32 0.0001, %v1379_v21  ;;  %v1536_v32 = vmul.f32 %v1520_v7, %v1414_v22  ;;  %v6007_v5 = vpop.f32.mrf.mxu1 }
 0x1bc   : > { %v4777_v33 = vpop.eup %4776  ;;  %v4253_v6 = vpop.f32.mrf.mxu0  ;;  %v1432_v34 = vsel %vm1431_vm5, %v5862_v9, %v1430_v23  ;;  %v1423_v44 = vmul.f32 %v4775_v3, %v5865_v11  ;;  %vm1466_vm4 = vcmp.eq.f32.partialorder %v5965_v62, inf  ;;  %vm1468_vm5 = vcmp.eq.f32.partialorder %v5965_v62, 0.0 }
 0x1bd   : > { %v1753_v53 = vadd.f32 %v5988_v20, %v1672_v27  ;;  %v1667_v56 = vadd.f32 %v5859_v8, %v1536_v32  ;;  %v6013_v57 = vadd.f32 0.0001, %v4253_v6  ;;  %4790 = vrsqrt.f32 %v5997_v31  ;;  %v6037_v21 = vpop.f32.mrf.mxu1  ;;  %v1525_v27 = vld [vmem:[%s5942_s22 + $0x28] sm:$0xff] }
 0x1be   : > { %v4779_v59 = vpop.eup %4778  ;;  %v1435_v60 = vsel %vm1433_vm6, %v1434_v61, %v1432_v34  ;;  %v1389_v63 = vpop.f32.mrf.mxu0  ;;  %v1425_v0 = vsel %vm1424_vm7, %v5865_v11, %v1423_v44  ;;  %v1444_v2 = vmul.f32 %v4777_v33, %v5876_v19  ;;  %vm1487_vm6 = vcmp.eq.f32.partialorder %v5981_v16, inf }
 0x1bf   : > { %v1808_v8 = vadd.f32 %v5882_v24, %v1753_v53  ;;  %v1752_v4 = vadd.f32 %v5988_v20, %v1667_v56  ;;  %4792 = vrsqrt.f32 %v6013_v57  ;;  %v1539_v7 = vmul.f32 %v1523_v40, %v1435_v60 }
 0x1c0   : > { %v4781_v9 = vpop.eup %4780  ;;  %v6028_v61 = vadd.f32 0.0001, %v1389_v63  ;;  %v1428_v17 = vsel %vm1426_vm8, %v1427_v10, %v1425_v0  ;;  %v4256_v18 = vpop.f32.mrf.mxu0  ;;  %v1446_v24 = vsel %vm1445_vm9, %v5876_v19, %v1444_v2  ;;  %v1437_v3 = vmul.f32 %v4779_v59, %v5888_v28  ;;  %v1527_v19 = vld [vmem:[%s5942_s22 + $0x38] sm:$0xff] }
 0x1c1   : > { %v6040_v22 = vmax.f32 %v1808_v8, 0.0  ;;  %v1682_v23 = vadd.f32 %v5870_v15, %v1539_v7  ;;  %v1538_v11 = vmul.f32 %v1522_v1, %v1428_v17  ;;  %v6043_v10 = vadd.f32 0.0001, %v4256_v18  ;;  %v1524_v15 = vld [vmem:[%s5942_s22 + $0x20] sm:$0xff] }
 0x1c2   : > { %4794 = vrsqrt.f32 %v6028_v61  ;;  %v1449_v32 = vsel %vm1447_vm10, %v1448_v13, %v1446_v24  ;;  %v1399_v33 = vpop.f32.mrf.mxu0  ;;  %v1439_v6 = vsel %vm1438_vm11, %v5888_v28, %v1437_v3  ;;  %v1458_v34 = vmul.f32 %v4781_v9, %v5915_v41  ;;  %v4783_v40 = vpop.eup %4782  ;;  %v1526_v3 = vld [vmem:[%s5942_s22 + $0x30] sm:$0xff] }
 0x1c3   : > { %v1856_v44 = vmul.f32 %v6040_v22, %v6040_v22  ;;  %v1755_v53 = vadd.f32 %v5988_v20, %v1682_v23  ;;  %v1677_v56 = vadd.f32 %v5899_v35, %v1538_v11  ;;  %4796 = vrsqrt.f32 %v6043_v10  ;;  %v4273_v35 = vpop.f32.mrf.mxu1  ;;  %v1529_v11 = vld [vmem:[%s5942_s22 + $0x48] sm:$0xff] }
 0x1c4   : > { %v4785_v13 = vpop.eup %4784  ;;  %v1541_v59 = vmul.f32 %v1525_v27, %v1449_v32  ;;  %v6065_v60 = vadd.f32 0.0001, %v1399_v33  ;;  %v1442_v63 = vsel %vm1440_vm12, %v1441_v25, %v1439_v6  ;;  %v1460_v0 = vsel %vm1459_vm13, %v5915_v41, %v1458_v34 }
 0x1c5   : > { %v1754_v1 = vadd.f32 %v5988_v20, %v1677_v56  ;;  %v1540_v2 = vmul.f32 %v1524_v15, %v1442_v63  ;;  %v1463_v8 = vsel %vm1461_vm14, %v1462_v26, %v1460_v0  ;;  %v1807_v7 = vadd.f32 %v5891_v29, %v1752_v4  ;;  %v1706_v27 = vpop.f32.mrf.mxu1 }
 0x1c6   : > { %vm1489_vm7 = vcmp.eq.f32.partialorder %v5981_v16, 0.0  ;;  %v4787_v28 = vpop.eup %4786  ;;  %v1692_v25 = vadd.f32 %v5952_v54, %v1541_v59  ;;  %4798 = vrsqrt.f32 %v6065_v60  ;;  %v1543_v9 = vmul.f32 %v1527_v19, %v1463_v8 }
 0x1c7   : > { %v1451_v17 = vmul.f32 %v4783_v40, %v5936_v49  ;;  %v1687_v18 = vadd.f32 %v5978_v14, %v1540_v2  ;;  %v6086_v24 = vmax.f32 %v1807_v7, 0.0  ;;  %v1472_v41 = vmul.f32 %v4785_v13, %v5954_v55  ;;  %v1531_v2 = vld [vmem:[%s5942_s22 + $0x58] sm:$0xff] }
 0x1c8   : > { %v1809_v29 = vadd.f32 %v5902_v36, %v1754_v1  ;;  %v4789_v26 = vpop.eup %4788  ;;  %v1757_v4 = vadd.f32 %v5988_v20, %v1692_v25  ;;  %v1702_v54 = vadd.f32 %v6007_v5, %v1543_v9  ;;  %v1465_v14 = vmul.f32 %v4787_v28, %v5965_v62 }
 0x1c9   : > { %v1453_v23 = vsel %vm1452_vm15, %v5936_v49, %v1451_v17  ;;  %v1756_v32 = vadd.f32 %v5988_v20, %v1687_v18  ;;  %4371 = vmatprep.mubr.f32.mxu1 %v6086_v24  ;;  %v1855_v5 = vmul.f32 %v6086_v24, %v6086_v24  ;;  %v1474_v33 = vsel %vm1473_vm2, %v5954_v55, %v1472_v41 }
 0x1ca   : > { %v1456_v36 = vsel %vm1454_vm1, %v1455_v51, %v1453_v23  ;;  %v6110_v6 = vadd.f32 %v5988_v20, %v1702_v54  ;;  %4372 = vmatmul.mubr.f32.vlgmr.msra.gmra.mxu1 %v6040_v22  ;;  %v1477_v34 = vsel %vm1475_vm3, %v1476_v52, %v1474_v33  ;;  %v6117_v49 = vmax.f32 %v1809_v29, 0.0  ;;  %v1528_v51 = vld [vmem:[%s5942_s22 + $0x40] sm:$0xff]  ;;  %v4791_v40 = vpop.eup %4790 }
 0x1cb   : > { %v1542_v15 = vmul.f32 %v1526_v3, %v1456_v36  ;;  %4315 = vmatprep.mubr.f32.mxu0 %v1855_v5  ;;  %v1545_v56 = vmul.f32 %v1529_v11, %v1477_v34  ;;  %v1467_v19 = vsel %vm1466_vm4, %v5965_v62, %v1465_v14  ;;  %v1810_v13 = vadd.f32 %v5894_v30, %v1755_v53  ;;  %v4276_v30 = vpop.f32.mrf.mxu1 }
 0x1cc   : > { %v1486_v59 = vmul.f32 %v4789_v26, %v5981_v16  ;;  %v4793_v63 = vpop.eup %4792  ;;  %4316 = vmatmul.mubr.f32.vlgmr.msra.gmra.mxu0 %v1856_v44  ;;  %4374 = vmatprep.mubr.f32.mxu1 %v6117_v49  ;;  %v1470_v55 = vsel %vm1468_vm5, %v1469_v58, %v1467_v19  ;;  %v1857_v52 = vmul.f32 %v6117_v49, %v6117_v49  ;;  %v1490_v1 = vand.u32 2147483648, %v5981_v16 }
 0x1cd   : > { %v1697_v0 = vadd.f32 %v6037_v21, %v1542_v15  ;;  %v1712_v53 = vadd.f32 %v4273_v35, %v1545_v56  ;;  %v1544_v8 = vmul.f32 %v1528_v51, %v1470_v55  ;;  %v6135_v7 = vmax.f32 %v1810_v13, 0.0  ;;  %v1716_v29 = vpop.f32.mrf.mxu1 }
 0x1ce   : > { %v1488_v21 = vsel %vm1487_vm6, %v5981_v16, %v1486_v59  ;;  %4318 = vmatprep.mubr.f32.mxu0 %v1857_v52  ;;  %v1811_v58 = vadd.f32 %v5905_v37, %v1756_v32  ;;  %v1479_v28 = vmul.f32 %v4791_v40, %v5997_v31  ;;  %vm1480_vm8 = vcmp.eq.f32.partialorder %v5997_v31, inf  ;;  %v1530_v16 = vld [vmem:[%s5942_s22 + $0x50] sm:$0xff] }
 0x1cf   : > { %v1758_v44 = vadd.f32 %v5988_v20, %v1697_v0  ;;  %v1491_v62 = vsel %vm1489_vm7, %v1490_v1, %v1488_v21  ;;  %v4795_v25 = vpop.eup %4794  ;;  %v6146_v35 = vadd.f32 %v5988_v20, %v1712_v53  ;;  %v1707_v9 = vadd.f32 %v1706_v27, %v1544_v8  ;;  %4375 = vmatmul.mubr.f32.gmra.mxu1 %v6135_v7  ;;  %v4279_v34 = vpop.f32.mrf.mxu1 }
 0x1d0   : > { %v1547_v17 = vmul.f32 %v1531_v2, %v1491_v62  ;;  %v1858_v18 = vmul.f32 %v6135_v7, %v6135_v7  ;;  %v4797_v3 = vpop.eup %4796  ;;  %v6151_v41 = vmax.f32 %v1811_v58, 0.0  ;;  %vm1482_vm9 = vcmp.eq.f32.partialorder %v5997_v31, 0.0 }
 0x1d1   : > { %v1483_v37 = vand.u32 2147483648, %v5997_v31  ;;  %v1760_v26 = vadd.f32 %v5988_v20, %v1707_v9  ;;  %v1481_v23 = vsel %vm1480_vm8, %v5997_v31, %v1479_v28  ;;  %v1812_v11 = vadd.f32 %v5908_v38, %v1757_v4  ;;  %v1533_v4 = vld [vmem:[%s5942_s22 + $0x68] sm:$0xff] }
 0x1d2   : > { %v1722_v54 = vadd.f32 %v4276_v30, %v1547_v17  ;;  %4319 = vmatmul.mubr.f32.gmra.mxu0 %v1858_v18  ;;  %4377 = vmatprep.mubr.f32.mxu1 %v6151_v41  ;;  %v1859_v27 = vmul.f32 %v6151_v41, %v6151_v41  ;;  %v1500_v32 = vmul.f32 %v4793_v63, %v6013_v57  ;;  %vm1501_vm10 = vcmp.eq.f32.partialorder %v6013_v57, inf  ;;  %v1726_v30 = vpop.f32.mrf.mxu1  ;;  %v1783_v17 = vld [vmem:[%s5857_s27 + $0x70] sm:$0xff] }
 0x1d3   : > { %v1484_v14 = vsel %vm1482_vm9, %v1483_v37, %v1481_v23  ;;  %v4799_v36 = vpop.eup %4798  ;;  %v6168_v15 = vmax.f32 %v1812_v11, 0.0  ;;  %vm1503_vm11 = vcmp.eq.f32.partialorder %v6013_v57, 0.0  ;;  %v1504_v31 = vand.u32 2147483648, %v6013_v57 }
 0x1d4   : > { %v6166_v5 = vadd.f32 %v5988_v20, %v1722_v54  ;;  %v1546_v33 = vmul.f32 %v1530_v16, %v1484_v14  ;;  %4321 = vmatprep.mubr.f32.mxu0 %v1859_v27  ;;  %v1502_v38 = vsel %vm1501_vm10, %v6013_v57, %v1500_v32  ;;  %v1813_v51 = vadd.f32 %v5911_v39, %v1758_v44  ;;  %v1532_v39 = vld [vmem:[%s5942_s22 + $0x60] sm:$0xff]  ;;  %v1535_v44 = vld [vmem:[%s5942_s22 + $0x78] sm:$0xff] }
 0x1d5   : > { %v1493_v40 = vmul.f32 %v4795_v25, %v6028_v61  ;;  %4378 = vmatmul.mubr.f32.gmra.mxu1 %v6168_v15  ;;  %v1860_v19 = vmul.f32 %v6168_v15, %v6168_v15  ;;  %vm1494_vm12 = vcmp.eq.f32.partialorder %v6028_v61, inf  ;;  %vm1496_vm13 = vcmp.eq.f32.partialorder %v6028_v61, 0.0  ;;  %v1784_v14 = vld [vmem:[%s5857_s27 + $0x78] sm:$0xff]  ;;  %s7597_s27 = sld [smem:[#allocation45_spill]] }
 0x1d6   : > { %v1717_v56 = vadd.f32 %v1716_v29, %v1546_v33  ;;  %v1505_v13 = vsel %vm1503_vm11, %v1504_v31, %v1502_v38  ;;  %v6181_v59 = vmax.f32 %v1813_v51, 0.0  ;;  %v1497_v63 = vand.u32 2147483648, %v6028_v61  ;;  %v1534_v29 = vld [vmem:[%s5942_s22 + $0x70] sm:$0xff]  ;;  %s7599_s22 = smov %s7598_s3 }
 0x1d7   : > { %v1495_v57 = vsel %vm1494_vm12, %v6028_v61, %v1493_v40  ;;  %v1549_v55 = vmul.f32 %v1533_v4, %v1505_v13  ;;  %4322 = vmatmul.mubr.f32.gmra.mxu0 %v1860_v19  ;;  %v1814_v52 = vadd.f32 %v5918_v42, %v6110_v6  ;;  %v1514_v1 = vmul.f32 %v4797_v3, %v6043_v10 }
 0x1d8   : > { %v1762_v0 = vadd.f32 %v5988_v20, %v1717_v56  ;;  %4380 = vmatprep.mubr.f32.mxu1 %v6181_v59  ;;  %v1498_v2 = vsel %vm1496_vm13, %v1497_v63, %v1495_v57  ;;  %v1861_v53 = vmul.f32 %v6181_v59, %v6181_v59  ;;  %vm1515_vm14 = vcmp.eq.f32.partialorder %v6043_v10, inf }
 0x1d9   : > { %vm1517_vm15 = vcmp.eq.f32.partialorder %v6043_v10, 0.0  ;;  %v1732_v61 = vadd.f32 %v4279_v34, %v1549_v55  ;;  %v1548_v8 = vmul.f32 %v1532_v39, %v1498_v2  ;;  %v6195_v21 = vmax.f32 %v1814_v52, 0.0  ;;  %v2446_v52 = vld [vmem:[%s7592_s23 + $0x78] sm:$0xff]  ;;  %v2445_v2 = vld [vmem:[%s7592_s23 + $0x70] sm:$0xff] }
 0x1da   : > { %v1516_v42 = vsel %vm1515_vm14, %v6043_v10, %v1514_v1  ;;  %4324 = vmatprep.mubr.f32.mxu0 %v1861_v53  ;;  %v1518_v6 = vand.u32 2147483648, %v6043_v10  ;;  %v1815_v62 = vadd.f32 %v5921_v43, %v1760_v26  ;;  %v1507_v58 = vmul.f32 %v4799_v36, %v6065_v60  ;;  %v4282_v43 = vpop.f32.mrf.mxu1  ;;  %v2478_v1 = vld [vmem:[%s7593_s7 + $0x78] sm:$0xff]  ;;  %4451 = vmatprep.subr.mxu1 %v2446_v52  ;;  %v2444_v53 = vld [vmem:[%s7592_s23 + $0x68] sm:$0xff]  ;;  %s6879_s7 = scalar_lea.vmem [#allocation15], %s5655_s0  ;;  %s7604_s0 = sld [smem:[#allocation51_spill]] }
 0x1db   : > { %vm1508_vm1 = vcmp.eq.f32.partialorder %v6065_v60, inf  ;;  %v1765_v28 = vadd.f32 %v5988_v20, %v1732_v61  ;;  %v1727_v25 = vadd.f32 %v1726_v30, %v1548_v8  ;;  %4381 = vmatmul.mubr.f32.gmra.mxu1 %v6195_v21  ;;  %v1862_v9 = vmul.f32 %v6195_v21, %v6195_v21  ;;  %4395 = vmatprep.subr.mxu0 %v2478_v1  ;;  %v2477_v30 = vld [vmem:[%s7594_s4 + $0x70] sm:$0xff]  ;;  %v2476_v61 = vld [vmem:[%s7594_s4 + $0x68] sm:$0xff]  ;;  %v2443_v8 = vld [vmem:[%s7592_s23 + $0x60] sm:$0xff] }
 0x1dc   : > { %vm1510_vm2 = vcmp.eq.f32.partialorder %v6065_v60, 0.0  ;;  %v1519_v18 = vsel %vm1517_vm15, %v1518_v6, %v1516_v42  ;;  %v6211_v3 = vmax.f32 %v1815_v62, 0.0  ;;  %v1509_v37 = vsel %vm1508_vm1, %v6065_v60, %v1507_v58  ;;  %4452 = vmatpush3.msra.mxu1 %v2446_v52  ;;  %4396 = vmatpush3.msra.mxu0 %v2478_v1  ;;  %v2475_v42 = vld [vmem:[%s7594_s4 + $0x60] sm:$0xff]  ;;  %v2442_v6 = vld [vmem:[%s7592_s23 + $0x58] sm:$0xff]  ;;  %v2441_v62 = vld [vmem:[%s7592_s23 + $0x50] sm:$0xff] }
 0x1dd   : > { %v1511_v16 = vand.u32 2147483648, %v6065_v60  ;;  %v1764_v26 = vadd.f32 %v5988_v20, %v1727_v25  ;;  %v1551_v54 = vmul.f32 %v1535_v44, %v1519_v18  ;;  %4325 = vmatmul.mubr.f32.gmra.mxu0 %v1862_v9  ;;  %v1816_v23 = vadd.f32 %v5924_v45, %v6146_v35  ;;  %v1736_v45 = vpop.f32.mrf.mxu1  ;;  %4453 = vmatprep.subr.mxu1 %v2445_v2  ;;  %v2474_v44 = vld [vmem:[%s7594_s4 + $0x58] sm:$0xff]  ;;  %v2473_v58 = vld [vmem:[%s7594_s4 + $0x50] sm:$0xff]  ;;  %v2472_v25 = vld [vmem:[%s7594_s4 + $0x48] sm:$0xff] }
 0x1de   : > { %v1817_v11 = vadd.f32 %v5927_v46, %v1762_v0  ;;  %4383 = vmatprep.mubr.f32.mxu1 %v6211_v3  ;;  %v1863_v27 = vmul.f32 %v6211_v3, %v6211_v3  ;;  %v1818_v60 = vadd.f32 %v5930_v47, %v6166_v5  ;;  %v1805_v32 = vmul.f32 %v5867_v12, %v1783_v17  ;;  %v2439_v9 = vld [vmem:[%s7592_s23 + $0x40] sm:$0xff]  ;;  %v2438_v18 = vld [vmem:[%s7592_s23 + $0x38] sm:$0xff]  ;;  %v2349_v1 = vld [vmem:[%s5665_s29 + $0x20] sm:$0xff] }
 0x1df   : > { %v1512_v10 = vsel %vm1510_vm2, %v1511_v16, %v1509_v37  ;;  %v1742_v36 = vadd.f32 %v4282_v43, %v1551_v54  ;;  %v6227_v38 = vmax.f32 %v1816_v23, 0.0  ;;  %v1819_v35 = vadd.f32 %v5933_v48, %v1764_v26  ;;  %4397 = vmatprep.subr.mxu0 %v2477_v30  ;;  %4454 = vmatpush3.msra.mxu1 %v2445_v2  ;;  %v2471_v17 = vld [vmem:[%s7594_s4 + $0x40] sm:$0xff]  ;;  %v2470_v43 = vld [vmem:[%s7594_s4 + $0x38] sm:$0xff]  ;;  %v2437_v37 = vld [vmem:[%s7592_s23 + $0x30] sm:$0xff] }
 0x1e0   : > { %v1550_v33 = vmul.f32 %v1534_v29, %v1512_v10  ;;  %v6229_v31 = vmax.f32 %v1817_v11, 0.0  ;;  %4327 = vmatprep.mubr.f32.mxu0 %v1863_v27  ;;  %v6231_v46 = vmax.f32 %v1818_v60, 0.0  ;;  %v1820_v4 = vadd.f32 %v5946_v50, %v1765_v28  ;;  %4398 = vmatpush3.msra.mxu0 %v2477_v30  ;;  %v2440_v28 = vld [vmem:[%s7592_s23 + $0x48] sm:$0xff]  ;;  %v2469_v16 = vld [vmem:[%s7594_s4 + $0x30] sm:$0xff]  ;;  %v2435_v54 = vld [vmem:[%s7592_s23 + $0x20] sm:$0xff] }
 0x1e1   : > { %v1806_v34 = vmul.f32 %v5867_v12, %v1784_v14  ;;  %v1767_v47 = vadd.f32 %v5988_v20, %v1742_v36  ;;  %4384 = vmatmul.mubr.f32.gmra.mxu1 %v6227_v38  ;;  %v1864_v51 = vmul.f32 %v6227_v38, %v6227_v38  ;;  %v6243_v56 = vmax.f32 %v1819_v35, 0.0  ;;  %4455 = vmatprep.subr.mxu1 %v2444_v53  ;;  %v2436_v29 = vld [vmem:[%s7592_s23 + $0x28] sm:$0xff]  ;;  %v2467_v23 = vld [vmem:[%s7594_s4 + $0x20] sm:$0xff]  ;;  %v2434_v11 = vld [vmem:[%s7592_s23 + $0x18] sm:$0xff] }
 0x1e2   : > { %v1737_v5 = vadd.f32 %v1736_v45, %v1550_v33  ;;  %v1865_v40 = vmul.f32 %v6229_v31, %v6229_v31  ;;  %4386 = vmatprep.mubr.f32.mxu1 %v6229_v31  ;;  %v1866_v50 = vmul.f32 %v6231_v46, %v6231_v46  ;;  %v6251_v19 = vmax.f32 %v1820_v4, 0.0  ;;  %4456 = vmatpush3.msra.mxu1 %v2444_v53  ;;  %v2468_v26 = vld [vmem:[%s7594_s4 + $0x28] sm:$0xff]  ;;  %v2466_v14 = vld [vmem:[%s7594_s4 + $0x18] sm:$0xff]  ;;  %v2433_v10 = vld [vmem:[%s7592_s23 + $0x10] sm:$0xff] }
 0x1e3   : > { %4328 = vmatmul.mubr.f32.gmra.mxu0 %v1864_v51  ;;  %v1867_v12 = vmul.f32 %v6243_v56, %v6243_v56  ;;  %v1822_v57 = vadd.f32 %v1806_v34, %v1767_v47  ;;  %4399 = vmatprep.subr.mxu0 %v2476_v61  ;;  %v2465_v27 = vld [vmem:[%s7594_s4 + $0x10] sm:$0xff]  ;;  %v2432_v60 = vld [vmem:[%s7592_s23 + $0x8] sm:$0xff]  ;;  %v2431_v36 = vld [vmem:[%s7592_s23] sm:$0xff] }
 0x1e4   : > { %v1766_v48 = vadd.f32 %v5988_v20, %v1737_v5  ;;  %4330 = vmatprep.mubr.f32.mxu0 %v1865_v40  ;;  %v1868_v20 = vmul.f32 %v6251_v19, %v6251_v19  ;;  %4457 = vmatprep.subr.mxu1 %v2443_v8  ;;  %v2463_v33 = vld [vmem:[%s7594_s4] sm:$0xff]  ;;  %v2351_v2 = vld [vmem:[%s5665_s29 + $0x30] sm:$0xff] }
 0x1e5   : > { %4387 = vmatmul.mubr.f32.gmra.mxu1 %v6231_v46  ;;  %v6259_v39 = vmax.f32 %v1822_v57, 0.0  ;;  %4400 = vmatpush3.msra.mxu0 %v2476_v61  ;;  %v2352_v30 = vld [vmem:[%s5665_s29 + $0x38] sm:$0xff] }
 0x1e6   : > { %v1821_v13 = vadd.f32 %v1805_v32, %v1766_v48  ;;  %4389 = vmatprep.mubr.f32.mxu1 %v6243_v56  ;;  %4458 = vmatpush3.msra.mxu1 %v2443_v8  ;;  %v2464_v32 = vld [vmem:[%s7594_s4 + $0x8] sm:$0xff] }
 0x1e7   : > { %4331 = vmatmul.mubr.f32.gmra.mxu0 %v1866_v50  ;;  %v1870_v55 = vmul.f32 %v6259_v39, %v6259_v39  ;;  %4401 = vmatprep.subr.mxu0 %v2475_v42  ;;  %v2345_v50 = vld [vmem:[%s5665_s29] sm:$0xff] }
 0x1e8   : > { %v6254_v63 = vmax.f32 %v1821_v13, 0.0  ;;  %4333 = vmatprep.mubr.f32.mxu0 %v1867_v12  ;;  %4459 = vmatprep.subr.mxu1 %v2442_v6  ;;  %v6376_v12 = vld [vmem:[#allocation7] ss:$0 sm:$0xff]  ;;  %v2346_v13 = vld [vmem:[%s5665_s29 + $0x8] sm:$0xff]  ;;  %v2353_v8 = vld [vmem:[%s5665_s29 + $0x40] sm:$0xff] }
 0x1e9   : > { %4390 = vmatmul.mubr.f32.gmra.mxu1 %v6251_v19  ;;  %4402 = vmatpush3.msra.mxu0 %v2475_v42  ;;  %v6392_v61 = vmul.f32 %v6376_v12, %v2346_v13  ;;  %v2354_v42 = vld [vmem:[%s5665_s29 + $0x48] sm:$0xff] }
 0x1ea   : > { %v1869_v0 = vmul.f32 %v6254_v63, %v6254_v63  ;;  %4392 = vmatprep.mubr.f32.mxu1 %v6254_v63  ;;  %4460 = vmatpush3.msra.mxu1 %v2442_v6  ;;  %v2355_v6 = vld [vmem:[%s5665_s29 + $0x50] sm:$0xff] }
 0x1eb   : > { %4334 = vmatmul.mubr.f32.gmra.mxu0 %v1868_v20  ;;  %4403 = vmatprep.subr.mxu0 %v2474_v44  ;;  %v2347_v20 = vld [vmem:[%s5665_s29 + $0x10] sm:$0xff] }
 0x1ec   : > { %4336 = vmatprep.mubr.f32.mxu0 %v1869_v0  ;;  %4461 = vmatprep.subr.mxu1 %v2441_v62  ;;  %v2348_v0 = vld [vmem:[%s5665_s29 + $0x18] sm:$0xff] }
 0x1ed   : > { %4393 = vmatmul.mubr.f32.gmra.mxu1 %v6259_v39  ;;  %4404 = vmatpush3.msra.mxu0 %v2474_v44 }
 0x1ee   : > { %4462 = vmatpush3.msra.mxu1 %v2441_v62  ;;  %4405 = vmatprep.subr.mxu0 %v2473_v58  ;;  %v6398_v62 = vmul.f32 %v6376_v12, %v2345_v50 }
 0x1ef   : > { %4337 = vmatmul.mubr.f32.gmra.mxu0 %v1870_v55  ;;  %4463 = vmatprep.subr.mxu1 %v2440_v28  ;;  %v2350_v55 = vld [vmem:[%s5665_s29 + $0x28] sm:$0xff] }
 0x1f0   : > { %4406 = vmatpush3.msra.mxu0 %v2473_v58  ;;  %4464 = vmatpush3.msra.mxu1 %v2440_v28  ;;  %v6401_v58 = vmul.f32 %v6376_v12, %v2347_v20  ;;  %v6404_v28 = vmul.f32 %v6376_v12, %v2348_v0 }
 0x1f1   : > { %4407 = vmatprep.subr.mxu0 %v2472_v25  ;;  %4465 = vmatprep.subr.mxu1 %v2439_v9 }
 0x1f2   : > { %4408 = vmatpush3.msra.mxu0 %v2472_v25  ;;  %4466 = vmatpush3.msra.mxu1 %v2439_v9  ;;  %v6407_v25 = vmul.f32 %v6376_v12, %v2350_v55  ;;  %v2356_v9 = vld [vmem:[%s5665_s29 + $0x58] sm:$0xff] }
 0x1f3   : > { %4409 = vmatprep.subr.mxu0 %v2471_v17  ;;  %4467 = vmatprep.subr.mxu1 %v2438_v18 }
 0x1f4   : > { %4410 = vmatpush3.msra.mxu0 %v2471_v17  ;;  %4468 = vmatpush3.msra.mxu1 %v2438_v18  ;;  %v2357_v17 = vld [vmem:[%s5665_s29 + $0x60] sm:$0xff]  ;;  %v2358_v18 = vld [vmem:[%s5665_s29 + $0x68] sm:$0xff] }
 0x1f5   : > { %4411 = vmatprep.subr.mxu0 %v2470_v43  ;;  %4469 = vmatprep.subr.mxu1 %v2437_v37 }
 0x1f6   : > { %4412 = vmatpush3.msra.mxu0 %v2470_v43  ;;  %4470 = vmatpush3.msra.mxu1 %v2437_v37 }
 0x1f7   : > { %4413 = vmatprep.subr.mxu0 %v2469_v16  ;;  %4471 = vmatprep.subr.mxu1 %v2436_v29 }
 0x1f8   : > { %4414 = vmatpush3.msra.mxu0 %v2469_v16  ;;  %4472 = vmatpush3.msra.mxu1 %v2436_v29  ;;  %v6418_v16 = vmul.f32 %v6376_v12, %v2349_v1  ;;  %v6421_v29 = vmul.f32 %v6376_v12, %v2351_v2 }
 0x1f9   : > { %4415 = vmatprep.subr.mxu0 %v2468_v26  ;;  %4473 = vmatprep.subr.mxu1 %v2435_v54 }
 0x1fa   : > { %4416 = vmatpush3.msra.mxu0 %v2468_v26  ;;  %4474 = vmatpush3.msra.mxu1 %v2435_v54  ;;  %v6424_v26 = vmul.f32 %v6376_v12, %v2352_v30  ;;  %v6427_v54 = vmul.f32 %v6376_v12, %v2353_v8  ;;  %v2144_v30 = vld [vmem:[%s5658_s26] sm:$0xff] }
 0x1fb   : > { %4417 = vmatprep.subr.mxu0 %v2467_v23  ;;  %4475 = vmatprep.subr.mxu1 %v2434_v11 }
 0x1fc   : > { %4418 = vmatpush3.msra.mxu0 %v2467_v23  ;;  %4476 = vmatpush3.msra.mxu1 %v2434_v11  ;;  %v6430_v23 = vmul.f32 %v6376_v12, %v2354_v42  ;;  %v6433_v11 = vmul.f32 %v6376_v12, %v2355_v6 }
 0x1fd   : > { %4419 = vmatprep.subr.mxu0 %v2466_v14  ;;  %4477 = vmatprep.subr.mxu1 %v2433_v10 }
 0x1fe   : > { %4420 = vmatpush3.msra.mxu0 %v2466_v14  ;;  %4478 = vmatpush3.msra.mxu1 %v2433_v10  ;;  %v6437_v10 = vmul.f32 %v6376_v12, %v2356_v9  ;;  %v6476_v9 = vld [vmem:[#allocation6] ss:$0 sm:$0xff] }
 0x1ff   : > { %4421 = vmatprep.subr.mxu0 %v2465_v27  ;;  %4479 = vmatprep.subr.mxu1 %v2432_v60 }
 0x200   : > { %4422 = vmatpush3.msra.mxu0 %v2465_v27  ;;  %4480 = vmatpush3.msra.mxu1 %v2432_v60  ;;  %v6440_v27 = vmul.f32 %v6376_v12, %v2357_v17  ;;  %v6443_v60 = vmul.f32 %v6376_v12, %v2358_v18 }
 0x201   : > { %4423 = vmatprep.subr.mxu0 %v2464_v32  ;;  %4481 = vmatprep.subr.mxu1 %v2431_v36 }
 0x202   : > { %4424 = vmatpush3.msra.mxu0 %v2464_v32  ;;  %4482 = vmatpush3.msra.mxu1 %v2431_v36 }
 0x203   : > { %4425 = vmatprep.subr.mxu0 %v2463_v33 }
 0x204   : > { %4426 = vmatpush3.msra.mxu0 %v2463_v33 }
 0x28a   : > { %v6368_v5 = vpop.f32.mrf.mxu1 }
 0x28c   : > { %v4317_v45 = vpop.f32.mrf.mxu0  ;;  %v6380_v57 = vpop.f32.mrf.mxu1 }
 0x28d   : > { %v6363_v35 = vadd.f32 0.0001, %v4317_v45 }
 0x28e   : > { %v1953_v4 = vpop.f32.mrf.mxu0 }
 0x28f   : > { %4800 = vrsqrt.f32 %v6363_v35  ;;  %v6366_v34 = vadd.f32 0.0001, %v1953_v4  ;;  %v6412_v43 = vpop.f32.mrf.mxu1  ;;  %vm2041_vm3 = vcmp.eq.f32.partialorder %v6363_v35, inf  ;;  %vm2043_vm4 = vcmp.eq.f32.partialorder %v6363_v35, 0.0 }
 0x290   : > { %v2044_v36 = vand.u32 2147483648, %v6363_v35 }
 0x291   : > { %4802 = vrsqrt.f32 %v6366_v34  ;;  %v6449_v45 = vpop.f32.mrf.mxu1  ;;  %vm2034_vm5 = vcmp.eq.f32.partialorder %v6366_v34, inf  ;;  %vm2036_vm6 = vcmp.eq.f32.partialorder %v6366_v34, 0.0 }
 0x292   : > { %v4320_v47 = vpop.f32.mrf.mxu0 }
 0x293   : > { %v6371_v51 = vadd.f32 0.0001, %v4320_v47  ;;  %v2037_v47 = vand.u32 2147483648, %v6366_v34 }
 0x294   : > { %v1963_v40 = vpop.f32.mrf.mxu0 }
 0x295   : > { %4804 = vrsqrt.f32 %v6371_v51  ;;  %v6374_v48 = vadd.f32 0.0001, %v1963_v40  ;;  %v2145_v40 = vld [vmem:[%s5658_s26 + $0x8] sm:$0xff]  ;;  %vm2055_vm7 = vcmp.eq.f32.partialorder %v6371_v51, inf  ;;  %vm2057_vm8 = vcmp.eq.f32.partialorder %v6371_v51, 0.0  ;;  %v6470_v6 = vpop.f32.mrf.mxu1 }
 0x296   : > { %v2058_v0 = vand.u32 2147483648, %v6371_v51 }
 0x297   : > { %4806 = vrsqrt.f32 %v6374_v48  ;;  %v4323_v52 = vpop.f32.mrf.mxu0  ;;  %vm2048_vm9 = vcmp.eq.f32.partialorder %v6374_v48, inf  ;;  %vm2050_vm10 = vcmp.eq.f32.partialorder %v6374_v48, 0.0 }
 0x298   : > { %v6389_v53 = vadd.f32 0.0001, %v4323_v52 }
 0x299   : > { %v1973_v44 = vpop.f32.mrf.mxu0 }
 0x29a   : > { %4808 = vrsqrt.f32 %v6389_v53  ;;  %v6415_v37 = vadd.f32 0.0001, %v1973_v44  ;;  %vm2069_vm11 = vcmp.eq.f32.partialorder %v6389_v53, inf  ;;  %vm2071_vm14 = vcmp.eq.f32.partialorder %v6389_v53, 0.0 }
 0x29c   : > { %v4801_v14 = vpop.eup %4800  ;;  %4810 = vrsqrt.f32 %v6415_v37  ;;  %vm2062_vm12 = vcmp.eq.f32.partialorder %v6415_v37, inf  ;;  %vm2064_vm13 = vcmp.eq.f32.partialorder %v6415_v37, 0.0 }
 0x29d   : > { %v2040_v32 = vmul.f32 %v4801_v14, %v6363_v35  ;;  %v4326_v33 = vpop.f32.mrf.mxu0 }
 0x29e   : > { %v6451_v4 = vadd.f32 0.0001, %v4326_v33  ;;  %v4803_v50 = vpop.eup %4802 }
 0x29f   : > { %v2042_v13 = vsel %vm2041_vm3, %v6363_v35, %v2040_v32  ;;  %v1983_v20 = vpop.f32.mrf.mxu0  ;;  %v2033_v52 = vmul.f32 %v4803_v50, %v6366_v34  ;;  %v2051_v35 = vand.u32 2147483648, %v6374_v48 }
 0x2a0   : > { %v2045_v55 = vsel %vm2043_vm4, %v2044_v36, %v2042_v13  ;;  %4812 = vrsqrt.f32 %v6451_v4  ;;  %v6463_v1 = vadd.f32 0.0001, %v1983_v20  ;;  %v2147_v20 = vld [vmem:[%s5658_s26 + $0x18] sm:$0xff]  ;;  %vm2083_vm1 = vcmp.eq.f32.partialorder %v6451_v4, inf }
 0x2a1   : > { %v2161_v8 = vmul.f32 %v2145_v40, %v2045_v55  ;;  %v2035_v44 = vsel %vm2034_vm5, %v6366_v34, %v2033_v52  ;;  %v6496_v52 = vpop.f32.mrf.mxu1  ;;  %vm2085_vm3 = vcmp.eq.f32.partialorder %v6451_v4, 0.0 }
 0x2a2   : > { %v4805_v2 = vpop.eup %4804  ;;  %4814 = vrsqrt.f32 %v6463_v1  ;;  %v2038_v14 = vsel %vm2036_vm6, %v2037_v47, %v2035_v44  ;;  %v2065_v47 = vand.u32 2147483648, %v6415_v37  ;;  %vm2076_vm15 = vcmp.eq.f32.partialorder %v6463_v1, inf }
 0x2a3   : > { %v2054_v42 = vmul.f32 %v4805_v2, %v6371_v51  ;;  %v4329_v18 = vpop.f32.mrf.mxu0  ;;  %v2248_v32 = vadd.f32 %v6368_v5, %v2161_v8  ;;  %v2160_v50 = vmul.f32 %v2144_v30, %v2038_v14  ;;  %vm2078_vm2 = vcmp.eq.f32.partialorder %v6463_v1, 0.0 }
 0x2a4   : > { %v4807_v17 = vpop.eup %4806  ;;  %v6485_v40 = vadd.f32 0.0001, %v4329_v18 }
 0x2a5   : > { %v2047_v33 = vmul.f32 %v4807_v17, %v6374_v48  ;;  %v2056_v13 = vsel %vm2055_vm7, %v6371_v51, %v2054_v42  ;;  %v1993_v55 = vpop.f32.mrf.mxu0  ;;  %v2329_v34 = vadd.f32 %v6476_v9, %v2248_v32  ;;  %v2243_v30 = vadd.f32 %v6380_v57, %v2160_v50  ;;  %v2146_v42 = vld [vmem:[%s5658_s26 + $0x10] sm:$0xff] }
 0x2a6   : > { %v2059_v5 = vsel %vm2057_vm8, %v2058_v0, %v2056_v13  ;;  %4816 = vrsqrt.f32 %v6485_v40  ;;  %v6499_v2 = vadd.f32 0.0001, %v1993_v55  ;;  %vm2097_vm4 = vcmp.eq.f32.partialorder %v6485_v40, inf }
 0x2a7   : > { %v2049_v8 = vsel %vm2048_vm9, %v6374_v48, %v2047_v33  ;;  %v4809_v51 = vpop.eup %4808  ;;  %v4332_v0 = vpop.f32.mrf.mxu0  ;;  %v2384_v44 = vadd.f32 %v6392_v61, %v2329_v34  ;;  %v2163_v18 = vmul.f32 %v2147_v20, %v2059_v5  ;;  %v2328_v33 = vadd.f32 %v6476_v9, %v2243_v30 }
 0x2a8   : > { %v2052_v17 = vsel %vm2050_vm10, %v2051_v35, %v2049_v8  ;;  %v2068_v32 = vmul.f32 %v4809_v51, %v6389_v53  ;;  %4818 = vrsqrt.f32 %v6499_v2  ;;  %v6513_v57 = vadd.f32 0.0001, %v4332_v0  ;;  %v6521_v20 = vpop.f32.mrf.mxu1 }
 0x2a9   : > { %v4811_v50 = vpop.eup %4810  ;;  %v2003_v13 = vpop.f32.mrf.mxu0  ;;  %v2400_v55 = vmax.f32 %v2384_v44, 0.0  ;;  %v2162_v36 = vmul.f32 %v2146_v42, %v2052_v17  ;;  %v2258_v61 = vadd.f32 %v6412_v43, %v2163_v18  ;;  %v2079_v48 = vand.u32 2147483648, %v6463_v1 }
 0x2aa   : > { %v2061_v35 = vmul.f32 %v4811_v50, %v6415_v37  ;;  %4820 = vrsqrt.f32 %v6513_v57  ;;  %v6524_v34 = vadd.f32 0.0001, %v2003_v13  ;;  %v2383_v5 = vadd.f32 %v6398_v62, %v2328_v33  ;;  %v2272_v13 = vpop.f32.mrf.mxu1 }
 0x2ab   : > { %v4335_v30 = vpop.f32.mrf.mxu0  ;;  %v6528_v43 = vadd.f32 %v2400_v55, %v6040_v22  ;;  %v2253_v8 = vadd.f32 %v6449_v45, %v2162_v36  ;;  %v2331_v42 = vadd.f32 %v6476_v9, %v2258_v61  ;;  %v2070_v51 = vsel %vm2069_vm11, %v6389_v53, %v2068_v32  ;;  %v2148_v45 = vld [vmem:[%s5658_s26 + $0x20] sm:$0xff] }
 0x2ac   : > { %4822 = vrsqrt.f32 %v6524_v34  ;;  %v6538_v62 = vadd.f32 0.0001, %v4335_v30  ;;  %v2399_v0 = vmax.f32 %v2383_v5, 0.0  ;;  %v2063_v22 = vsel %vm2062_vm12, %v6415_v37, %v2061_v35  ;;  %v2149_v35 = vld [vmem:[%s5658_s26 + $0x28] sm:$0xff] }
 0x2ad   : > { %v4813_v36 = vpop.eup %4812  ;;  %v2013_v44 = vpop.f32.mrf.mxu0  ;;  %v2448_v17 = vmul.f32 %v6528_v43, %v6528_v43  ;;  %v2330_v18 = vadd.f32 %v6476_v9, %v2253_v8  ;;  %v2386_v32 = vadd.f32 %v6404_v28, %v2331_v42  ;;  %v2066_v33 = vsel %vm2064_vm13, %v2065_v47, %v2063_v22 }
 0x2ae   : > { %v2082_v50 = vmul.f32 %v4813_v36, %v6451_v4  ;;  %4824 = vrsqrt.f32 %v6538_v62  ;;  %v6552_v55 = vadd.f32 0.0001, %v2013_v44  ;;  %v6555_v61 = vadd.f32 %v2399_v0, %v6086_v24  ;;  %v6576_v36 = vpop.f32.mrf.mxu1 }
 0x2af   : > { %v4815_v5 = vpop.eup %4814  ;;  %v4338_v30 = vpop.f32.mrf.mxu0  ;;  %v2385_v8 = vadd.f32 %v6401_v58, %v2330_v18  ;;  %v2402_v14 = vmax.f32 %v2386_v32, 0.0  ;;  %v2164_v28 = vmul.f32 %v2148_v45, %v2066_v33  ;;  %v7595_v37 = vand.u32 2147483648, %v6389_v53  ;;  %v2150_v32 = vld [vmem:[%s5658_s26 + $0x30] sm:$0xff] }
 0x2b0   : > { %v2075_v42 = vmul.f32 %v4815_v5, %v6463_v1  ;;  %4826 = vrsqrt.f32 %v6552_v55  ;;  %v6566_v24 = vadd.f32 0.0001, %v4338_v30  ;;  %4483 = vmatprep.mubr.f32.mxu1 %v6555_v61  ;;  %v2447_v58 = vmul.f32 %v6555_v61, %v6555_v61  ;;  %v2151_v5 = vld [vmem:[%s5658_s26 + $0x38] sm:$0xff] }
 0x2b1   : > { %v2073_v47 = vsel %vm2071_vm14, %v7595_v37, %v2070_v51  ;;  %v2023_v0 = vpop.f32.mrf.mxu0  ;;  %4484 = vmatmul.mubr.f32.vlgmr.msra.gmra.mxu1 %v6528_v43  ;;  %v2401_v22 = vmax.f32 %v2385_v8, 0.0  ;;  %v6573_v53 = vadd.f32 %v2402_v14, %v6135_v7  ;;  %v2263_v51 = vadd.f32 %v6496_v52, %v2164_v28 }
 0x2b2   : > { %v2165_v45 = vmul.f32 %v2149_v35, %v2073_v47  ;;  %4828 = vrsqrt.f32 %v6566_v24  ;;  %v6579_v44 = vadd.f32 0.0001, %v2023_v0  ;;  %4427 = vmatprep.mubr.f32.mxu0 %v2447_v58  ;;  %v2077_v18 = vsel %vm2076_vm15, %v6463_v1, %v2075_v42  ;;  %v2282_v42 = vpop.f32.mrf.mxu1 }
 0x2b3   : > { %v2084_v7 = vsel %vm2083_vm1, %v6451_v4, %v2082_v50  ;;  %v4817_v14 = vpop.eup %4816  ;;  %4428 = vmatmul.mubr.f32.vlgmr.msra.gmra.mxu0 %v2448_v17  ;;  %v6589_v52 = vadd.f32 %v2401_v22, %v6117_v49  ;;  %v2332_v33 = vadd.f32 %v6476_v9, %v2263_v51  ;;  %vm2090_vm5 = vcmp.eq.f32.partialorder %v6499_v2, inf }
 0x2b4   : > { %v2268_v35 = vadd.f32 %v6470_v6, %v2165_v45  ;;  %v2096_v30 = vmul.f32 %v4817_v14, %v6485_v40  ;;  %4830 = vrsqrt.f32 %v6579_v44  ;;  %v2080_v50 = vsel %vm2078_vm2, %v2079_v48, %v2077_v18  ;;  %v2152_v45 = vld [vmem:[%s5658_s26 + $0x40] sm:$0xff] }
 0x2b5   : > { %v7596_v17 = vand.u32 2147483648, %v6451_v4  ;;  %v4819_v8 = vpop.eup %4818  ;;  %4486 = vmatprep.mubr.f32.mxu1 %v6589_v52  ;;  %v2449_v6 = vmul.f32 %v6589_v52, %v6589_v52  ;;  %v2387_v28 = vadd.f32 %v6418_v16, %v2332_v33  ;;  %v2166_v47 = vmul.f32 %v2150_v32, %v2080_v50  ;;  %v6632_v50 = vpop.f32.mrf.mxu1 }
 0x2b6   : > { %v2333_v37 = vadd.f32 %v6476_v9, %v2268_v35  ;;  %v2089_v1 = vmul.f32 %v4819_v8, %v6499_v2  ;;  %4487 = vmatmul.mubr.f32.gmra.mxu1 %v6573_v53  ;;  %v2450_v4 = vmul.f32 %v6573_v53, %v6573_v53  ;;  %vm2092_vm6 = vcmp.eq.f32.partialorder %v6499_v2, 0.0 }
 0x2b7   : > { %v2087_v49 = vsel %vm2085_vm3, %v7596_v17, %v2084_v7  ;;  %v4821_v58 = vpop.eup %4820  ;;  %4430 = vmatprep.mubr.f32.mxu0 %v2449_v6  ;;  %v2403_v0 = vmax.f32 %v2387_v28, 0.0  ;;  %v2273_v16 = vadd.f32 %v2272_v13, %v2166_v47  ;;  %v2093_v51 = vand.u32 2147483648, %v6499_v2 }
 0x2b8   : > { %v2167_v48 = vmul.f32 %v2151_v5, %v2087_v49  ;;  %v2388_v22 = vadd.f32 %v6407_v25, %v2333_v37  ;;  %v2110_v18 = vmul.f32 %v4821_v58, %v6513_v57  ;;  %4431 = vmatmul.mubr.f32.gmra.mxu0 %v2450_v4  ;;  %v2091_v7 = vsel %vm2090_vm5, %v6499_v2, %v2089_v1 }
 0x2b9   : > { %v2098_v14 = vsel %vm2097_vm4, %v6485_v40, %v2096_v30  ;;  %v4823_v33 = vpop.eup %4822  ;;  %v6627_v25 = vadd.f32 %v2403_v0, %v6151_v41  ;;  %v2334_v35 = vadd.f32 %v6476_v9, %v2273_v16  ;;  %v2094_v5 = vsel %vm2092_vm6, %v2093_v51, %v2091_v7  ;;  %v2153_v30 = vld [vmem:[%s5658_s26 + $0x48] sm:$0xff]  ;;  %v2292_v0 = vpop.f32.mrf.mxu1  ;;  %v2154_v7 = vld [vmem:[%s5658_s26 + $0x50] sm:$0xff] }
 0x2ba   : > { %v2278_v32 = vadd.f32 %v6521_v20, %v2167_v48  ;;  %v2404_v13 = vmax.f32 %v2388_v22, 0.0  ;;  %v2103_v20 = vmul.f32 %v4823_v33, %v6524_v34  ;;  %v2168_v49 = vmul.f32 %v2152_v45, %v2094_v5 }
 0x2bb   : > { %v2100_v8 = vand.u32 2147483648, %v6485_v40  ;;  %v4825_v6 = vpop.eup %4824  ;;  %4489 = vmatprep.mubr.f32.mxu1 %v6627_v25  ;;  %v2451_v2 = vmul.f32 %v6627_v25, %v6627_v25  ;;  %v2389_v28 = vadd.f32 %v6421_v29, %v2334_v35  ;;  %vm2099_vm7 = vcmp.eq.f32.partialorder %v6485_v40, 0.0 }
 0x2bc   : > { %v2335_v17 = vadd.f32 %v6476_v9, %v2278_v32  ;;  %v6640_v41 = vadd.f32 %v2404_v13, %v6168_v15  ;;  %v2283_v47 = vadd.f32 %v2282_v42, %v2168_v49  ;;  %vm2104_vm8 = vcmp.eq.f32.partialorder %v6524_v34, inf }
 0x2bd   : > { %v2101_v1 = vsel %vm2099_vm7, %v2100_v8, %v2098_v14  ;;  %v4827_v4 = vpop.eup %4826  ;;  %v2124_v48 = vmul.f32 %v4825_v6, %v6538_v62  ;;  %4433 = vmatprep.mubr.f32.mxu0 %v2451_v2  ;;  %v2405_v58 = vmax.f32 %v2389_v28, 0.0  ;;  %v2105_v22 = vsel %vm2104_vm8, %v6524_v34, %v2103_v20  ;;  %v4391_v20 = vpop.f32.mrf.mxu1  ;;  %v2155_v6 = vld [vmem:[%s5658_s26 + $0x58] sm:$0xff] }
 0x2be   : > { %v2390_v37 = vadd.f32 %v6424_v26, %v2335_v17  ;;  %4490 = vmatmul.mubr.f32.gmra.mxu1 %v6640_v41  ;;  %v2452_v15 = vmul.f32 %v6640_v41, %v6640_v41  ;;  %v2169_v29 = vmul.f32 %v2153_v30, %v2101_v1  ;;  %v2117_v40 = vmul.f32 %v4827_v4, %v6552_v55 }
 0x2bf   : > { %v2336_v42 = vadd.f32 %v6476_v9, %v2283_v47  ;;  %v4829_v16 = vpop.eup %4828  ;;  %v6656_v51 = vadd.f32 %v2405_v58, %v6181_v59  ;;  %vm2106_vm9 = vcmp.eq.f32.partialorder %v6524_v34, 0.0  ;;  %v2107_v32 = vand.u32 2147483648, %v6524_v34  ;;  %v2156_v47 = vld [vmem:[%s5658_s26 + $0x60] sm:$0xff] }
 0x2c0   : > { %v2406_v26 = vmax.f32 %v2390_v37, 0.0  ;;  %4434 = vmatmul.mubr.f32.gmra.mxu0 %v2452_v15  ;;  %v2288_v45 = vadd.f32 %v6576_v36, %v2169_v29  ;;  %v6663_v14 = vmul.f32 %v4829_v16, %v6566_v24  ;;  %vm2111_vm10 = vcmp.eq.f32.partialorder %v6513_v57, inf }
 0x2c1   : > { %v2391_v13 = vadd.f32 %v6427_v54, %v2336_v42  ;;  %v4831_v35 = vpop.eup %4830  ;;  %4492 = vmatprep.mubr.f32.mxu1 %v6656_v51  ;;  %v2453_v59 = vmul.f32 %v6656_v51, %v6656_v51  ;;  %v2108_v36 = vsel %vm2106_vm9, %v2107_v32, %v2105_v22  ;;  %v2112_v5 = vsel %vm2111_vm10, %v6513_v57, %v2110_v18 }
 0x2c2   : > { %v6666_v33 = vadd.f32 %v2406_v26, %v6195_v21  ;;  %v2337_v34 = vadd.f32 %v6476_v9, %v2288_v45  ;;  %v2170_v17 = vmul.f32 %v2154_v7, %v2108_v36  ;;  %vm2113_vm11 = vcmp.eq.f32.partialorder %v6513_v57, 0.0  ;;  %v2157_v26 = vld [vmem:[%s5658_s26 + $0x68] sm:$0xff] }
 0x2c3   : > { %v2407_v54 = vmax.f32 %v2391_v13, 0.0  ;;  %v2131_v49 = vmul.f32 %v4831_v35, %v6579_v44  ;;  %4436 = vmatprep.mubr.f32.mxu0 %v2453_v59  ;;  %v2114_v30 = vand.u32 2147483648, %v6513_v57  ;;  %vm2118_vm12 = vcmp.eq.f32.partialorder %v6552_v55, inf  ;;  %v2158_v13 = vld [vmem:[%s5658_s26 + $0x70] sm:$0xff] }
 0x2c4   : > { %4493 = vmatmul.mubr.f32.gmra.mxu1 %v6666_v33  ;;  %v2454_v21 = vmul.f32 %v6666_v33, %v6666_v33  ;;  %v2392_v8 = vadd.f32 %v6430_v23, %v2337_v34  ;;  %v2293_v2 = vadd.f32 %v2292_v0, %v2170_v17  ;;  %v2119_v28 = vsel %vm2118_vm12, %v6552_v55, %v2117_v40  ;;  %v2302_v23 = vpop.f32.mrf.mxu1  ;;  %v2159_v17 = vld [vmem:[%s5658_s26 + $0x78] sm:$0xff]  ;;  %s7601_s26 = sld [smem:[#allocation49_spill]] }
 0x2c5   : > { %v6685_v18 = vadd.f32 %v2407_v54, %v6211_v3  ;;  %v2121_v37 = vand.u32 2147483648, %v6552_v55  ;;  %v2115_v4 = vsel %vm2113_vm11, %v2114_v30, %v2112_v5  ;;  %vm2120_vm13 = vcmp.eq.f32.partialorder %v6552_v55, 0.0  ;;  %v2359_v54 = vld [vmem:[%s5665_s29 + $0x70] sm:$0xff] }
 0x2c6   : > { %4437 = vmatmul.mubr.f32.gmra.mxu0 %v2454_v21  ;;  %v2408_v1 = vmax.f32 %v2392_v8, 0.0  ;;  %vm2125_vm14 = vcmp.eq.f32.partialorder %v6538_v62, inf  ;;  %v2338_v57 = vadd.f32 %v6476_v9, %v2293_v2  ;;  %v2171_v15 = vmul.f32 %v2155_v6, %v2115_v4  ;;  %v4394_v32 = vpop.f32.mrf.mxu1  ;;  %v2360_v2 = vld [vmem:[%s5665_s29 + $0x78] sm:$0xff] }
 0x2c7   : > { %4495 = vmatprep.mubr.f32.mxu1 %v6685_v18  ;;  %v2455_v3 = vmul.f32 %v6685_v18, %v6685_v18  ;;  %v2122_v58 = vsel %vm2120_vm13, %v2121_v37, %v2119_v28  ;;  %v2126_v40 = vsel %vm2125_vm14, %v6538_v62, %v2124_v48  ;;  %v2128_v55 = vand.u32 2147483648, %v6538_v62 }
 0x2c8   : > { %v6697_v29 = vadd.f32 %v2408_v1, %v6227_v38  ;;  %v2172_v0 = vmul.f32 %v2156_v47, %v2122_v58  ;;  %v2393_v42 = vadd.f32 %v6433_v11, %v2338_v57  ;;  %v2298_v22 = vadd.f32 %v6632_v50, %v2171_v15  ;;  %v2312_v30 = vpop.f32.mrf.mxu1 }
 0x2c9   : > { %4439 = vmatprep.mubr.f32.mxu0 %v2455_v3  ;;  %vm2127_vm15 = vcmp.eq.f32.partialorder %v6538_v62, 0.0  ;;  %vm2132_vm1 = vcmp.eq.f32.partialorder %v6579_v44, inf  ;;  %v2135_v62 = vand.u32 2147483648, %v6579_v44  ;;  %vm2134_vm2 = vcmp.eq.f32.partialorder %v6579_v44, 0.0 }
 0x2ca   : > { %4496 = vmatmul.mubr.f32.gmra.mxu1 %v6697_v29  ;;  %v2456_v38 = vmul.f32 %v6697_v29, %v6697_v29  ;;  %v2303_v16 = vadd.f32 %v2302_v23, %v2172_v0  ;;  %v2129_v48 = vsel %vm2127_vm15, %v2128_v55, %v2126_v40  ;;  %v2133_v45 = vsel %vm2132_vm1, %v6579_v44, %v2131_v49  ;;  %s7220_s29 = scalar_lea.vmem %s7601_s26, %s5848_s9 }
 0x2cb   : > { %v2409_v7 = vmax.f32 %v2393_v42, 0.0  ;;  %v2339_v11 = vadd.f32 %v6476_v9, %v2298_v22  ;;  %v2173_v50 = vmul.f32 %v2157_v26, %v2129_v48  ;;  %vm2139_vm3 = vcmp.eq.f32.partialorder %v6566_v24, inf  ;;  %v3070_v22 = vld [vmem:[%s7598_s3 + $0x78] sm:$0xff]  ;;  %v3068_v48 = vld [vmem:[%s7599_s22 + $0x68] sm:$0xff]  ;;  %s7602_s3 = sld [smem:[#allocation48_spill]] }
 0x2cc   : > { %4440 = vmatmul.mubr.f32.gmra.mxu0 %v2456_v38  ;;  %v2340_v35 = vadd.f32 %v6476_v9, %v2303_v16  ;;  %v2142_v59 = vand.u32 2147483648, %v6566_v24  ;;  %v2136_v21 = vsel %vm2134_vm2, %v2135_v62, %v2133_v45  ;;  %v2140_v44 = vsel %vm2139_vm3, %v6566_v24, %v6663_v14  ;;  %4507 = vmatprep.subr.mxu0 %v3070_v22  ;;  %v3069_v38 = vld [vmem:[%s7599_s22 + $0x70] sm:$0xff]  ;;  %v3036_v16 = vld [vmem:[%s7597_s27 + $0x68] sm:$0xff]  ;;  %v3035_v45 = vld [vmem:[%s7597_s27 + $0x60] sm:$0xff] }
 0x2cd   : > { %v6718_v34 = vadd.f32 %v2409_v7, %v6229_v31  ;;  %v2394_v36 = vadd.f32 %v6437_v10, %v2339_v11  ;;  %v2308_v5 = vadd.f32 %v4391_v20, %v2173_v50  ;;  %v2174_v8 = vmul.f32 %v2158_v13, %v2136_v21  ;;  %4508 = vmatpush3.msra.mxu0 %v3070_v22  ;;  %v3034_v7 = vld [vmem:[%s7597_s27 + $0x58] sm:$0xff]  ;;  %v3033_v50 = vld [vmem:[%s7597_s27 + $0x50] sm:$0xff]  ;;  %v3032_v13 = vld [vmem:[%s7597_s27 + $0x48] sm:$0xff] }
 0x2ce   : > { %v2395_v49 = vadd.f32 %v6440_v27, %v2340_v35  ;;  %vm2141_vm4 = vcmp.eq.f32.partialorder %v6566_v24, 0.0  ;;  %v2381_v27 = vmul.f32 %v6376_v12, %v2359_v54  ;;  %v2382_v3 = vmul.f32 %v6376_v12, %v2360_v2  ;;  %4509 = vmatprep.subr.mxu0 %v3069_v38  ;;  %v3066_v11 = vld [vmem:[%s7599_s22 + $0x58] sm:$0xff]  ;;  %v3065_v62 = vld [vmem:[%s7599_s22 + $0x50] sm:$0xff]  ;;  %v3064_v35 = vld [vmem:[%s7599_s22 + $0x48] sm:$0xff] }
 0x2cf   : > { %4498 = vmatprep.mubr.f32.mxu1 %v6718_v34  ;;  %v2410_v31 = vmax.f32 %v2394_v36, 0.0  ;;  %v2457_v6 = vmul.f32 %v6718_v34, %v6718_v34  ;;  %v2341_v10 = vadd.f32 %v6476_v9, %v2308_v5  ;;  %v2143_v20 = vsel %vm2141_vm4, %v2142_v59, %v2140_v44  ;;  %4510 = vmatpush3.msra.mxu0 %v3069_v38  ;;  %v3031_v59 = vld [vmem:[%s7597_s27 + $0x40] sm:$0xff]  ;;  %v3030_v5 = vld [vmem:[%s7597_s27 + $0x38] sm:$0xff]  ;;  %v3029_v54 = vld [vmem:[%s7597_s27 + $0x30] sm:$0xff] }
 0x2d0   : > { %v2411_v28 = vmax.f32 %v2395_v49, 0.0  ;;  %v2313_v37 = vadd.f32 %v2312_v30, %v2174_v8  ;;  %v2175_v47 = vmul.f32 %v2159_v17, %v2143_v20  ;;  %4511 = vmatprep.subr.mxu0 %v3068_v48  ;;  %v3063_v36 = vld [vmem:[%s7599_s22 + $0x40] sm:$0xff]  ;;  %v3062_v21 = vld [vmem:[%s7599_s22 + $0x38] sm:$0xff]  ;;  %v3061_v17 = vld [vmem:[%s7599_s22 + $0x30] sm:$0xff] }
 0x2d1   : > { %v6734_v14 = vadd.f32 %v2410_v31, %v6231_v46  ;;  %4442 = vmatprep.mubr.f32.mxu0 %v2457_v6  ;;  %v2396_v24 = vadd.f32 %v6443_v60, %v2341_v10  ;;  %4512 = vmatpush3.msra.mxu0 %v3068_v48  ;;  %v3028_v49 = vld [vmem:[%s7597_s27 + $0x28] sm:$0xff]  ;;  %v3027_v44 = vld [vmem:[%s7597_s27 + $0x20] sm:$0xff]  ;;  %v3026_v31 = vld [vmem:[%s7597_s27 + $0x18] sm:$0xff] }
 0x2d2   : > { %v6738_v1 = vadd.f32 %v2411_v28, %v6243_v56  ;;  %v2342_v4 = vadd.f32 %v6476_v9, %v2313_v37  ;;  %v2318_v23 = vadd.f32 %v4394_v32, %v2175_v47  ;;  %v3067_v32 = vld [vmem:[%s7599_s22 + $0x60] sm:$0xff]  ;;  %v3060_v8 = vld [vmem:[%s7599_s22 + $0x28] sm:$0xff]  ;;  %v3058_v6 = vld [vmem:[%s7599_s22 + $0x18] sm:$0xff] }
 0x2d3   : > { %4499 = vmatmul.mubr.f32.gmra.mxu1 %v6734_v14  ;;  %v2458_v57 = vmul.f32 %v6734_v14, %v6734_v14  ;;  %v2412_v15 = vmax.f32 %v2396_v24, 0.0  ;;  %4513 = vmatprep.subr.mxu0 %v3067_v32  ;;  %v3059_v30 = vld [vmem:[%s7599_s22 + $0x20] sm:$0xff]  ;;  %v3025_v10 = vld [vmem:[%s7597_s27 + $0x10] sm:$0xff]  ;;  %v3024_v2 = vld [vmem:[%s7597_s27 + $0x8] sm:$0xff] }
 0x2d4   : > { %4501 = vmatprep.mubr.f32.mxu1 %v6738_v1  ;;  %v2459_v46 = vmul.f32 %v6738_v1, %v6738_v1  ;;  %v2397_v60 = vadd.f32 %v2381_v27, %v2342_v4  ;;  %v2343_v56 = vadd.f32 %v6476_v9, %v2318_v23  ;;  %4514 = vmatpush3.msra.mxu0 %v3067_v32  ;;  %v3057_v20 = vld [vmem:[%s7599_s22 + $0x10] sm:$0xff]  ;;  %v3056_v28 = vld [vmem:[%s7599_s22 + $0x8] sm:$0xff]  ;;  %v3023_v37 = vld [vmem:[%s7597_s27] sm:$0xff] }
 0x2d5   : > { %4443 = vmatmul.mubr.f32.gmra.mxu0 %v2458_v57  ;;  %v6750_v58 = vadd.f32 %v2412_v15, %v6251_v19  ;;  %4515 = vmatprep.subr.mxu0 %v3066_v11  ;;  %v3055_v27 = vld [vmem:[%s7599_s22] sm:$0xff]  ;;  %v2945_v48 = vld [vmem:[%s6879_s7 + $0x40] sm:$0xff] }
 0x2d6   : > { %4445 = vmatprep.mubr.f32.mxu0 %v2459_v46  ;;  %v2413_v12 = vmax.f32 %v2397_v60, 0.0  ;;  %v2398_v0 = vadd.f32 %v2382_v3, %v2343_v56  ;;  %4516 = vmatpush3.msra.mxu0 %v3066_v11  ;;  %v6876_v56 = vld [vmem:[#allocation12] ss:$0 sm:$0xff]  ;;  %v2943_v22 = vld [vmem:[%s6879_s7 + $0x30] sm:$0xff] }
 0x2d7   : > { %4502 = vmatmul.mubr.f32.gmra.mxu1 %v6750_v58  ;;  %v2460_v40 = vmul.f32 %v6750_v58, %v6750_v58  ;;  %4517 = vmatprep.subr.mxu0 %v3065_v62  ;;  %v2947_v32 = vld [vmem:[%s6879_s7 + $0x50] sm:$0xff] }
 0x2d8   : > { %v6756_v55 = vadd.f32 %v2413_v12, %v6254_v63  ;;  %v2414_v26 = vmax.f32 %v2398_v0, 0.0  ;;  %v3038_v63 = vld [vmem:[%s7597_s27 + $0x78] sm:$0xff]  ;;  %4518 = vmatpush3.msra.mxu0 %v3065_v62  ;;  %v2937_v12 = vld [vmem:[%s6879_s7] sm:$0xff] }
 0x2d9   : > { %4446 = vmatmul.mubr.f32.gmra.mxu0 %v2460_v40  ;;  %4563 = vmatprep.subr.mxu1 %v3038_v63  ;;  %v2938_v0 = vld [vmem:[%s6879_s7 + $0x8] sm:$0xff]  ;;  %v6901_v11 = vmul.f32 %v6876_v56, %v2937_v12 }
 0x2da   : > { %4504 = vmatprep.mubr.f32.mxu1 %v6756_v55  ;;  %v6760_v9 = vadd.f32 %v2414_v26, %v6259_v39  ;;  %v2461_v19 = vmul.f32 %v6756_v55, %v6756_v55  ;;  %4564 = vmatpush3.msra.mxu1 %v3038_v63  ;;  %v3037_v39 = vld [vmem:[%s7597_s27 + $0x70] sm:$0xff]  ;;  %v2939_v26 = vld [vmem:[%s6879_s7 + $0x10] sm:$0xff] }
 0x2db   : > { %4565 = vmatprep.subr.mxu1 %v3037_v39  ;;  %4519 = vmatprep.subr.mxu0 %v3064_v35  ;;  %v2942_v63 = vld [vmem:[%s6879_s7 + $0x28] sm:$0xff] }
 0x2dc   : > { %4505 = vmatmul.mubr.f32.gmra.mxu1 %v6760_v9  ;;  %4448 = vmatprep.mubr.f32.mxu0 %v2461_v19  ;;  %v2462_v42 = vmul.f32 %v6760_v9, %v6760_v9  ;;  %v2940_v19 = vld [vmem:[%s6879_s7 + $0x18] sm:$0xff] }
 0x2dd   : > { %4566 = vmatpush3.msra.mxu1 %v3037_v39  ;;  %4520 = vmatpush3.msra.mxu0 %v3064_v35  ;;  %v2944_v39 = vld [vmem:[%s6879_s7 + $0x38] sm:$0xff]  ;;  %v6907_v62 = vmul.f32 %v6876_v56, %v2940_v19  ;;  %v2949_v35 = vld [vmem:[%s6879_s7 + $0x60] sm:$0xff] }
 0x2de   : > { %4449 = vmatmul.mubr.f32.gmra.mxu0 %v2462_v42  ;;  %4567 = vmatprep.subr.mxu1 %v3036_v16  ;;  %v2941_v42 = vld [vmem:[%s6879_s7 + $0x20] sm:$0xff] }
 0x2df   : > { %4568 = vmatpush3.msra.mxu1 %v3036_v16  ;;  %4521 = vmatprep.subr.mxu0 %v3063_v36  ;;  %v6893_v16 = vmul.f32 %v6876_v56, %v2938_v0 }
 0x2e0   : > { %4569 = vmatprep.subr.mxu1 %v3035_v45  ;;  %4522 = vmatpush3.msra.mxu0 %v3063_v36 }
 0x2e1   : > { %4570 = vmatpush3.msra.mxu1 %v3035_v45  ;;  %4523 = vmatprep.subr.mxu0 %v3062_v21  ;;  %v2946_v45 = vld [vmem:[%s6879_s7 + $0x48] sm:$0xff] }
 0x2e2   : > { %4571 = vmatprep.subr.mxu1 %v3034_v7  ;;  %4524 = vmatpush3.msra.mxu0 %v3062_v21  ;;  %v6915_v21 = vmul.f32 %v6876_v56, %v2941_v42 }
 0x2e3   : > { %4572 = vmatpush3.msra.mxu1 %v3034_v7  ;;  %4525 = vmatprep.subr.mxu0 %v3061_v17 }
 0x2e4   : > { %4573 = vmatprep.subr.mxu1 %v3033_v50  ;;  %4526 = vmatpush3.msra.mxu0 %v3061_v17  ;;  %v6921_v17 = vmul.f32 %v6876_v56, %v2943_v22 }
 0x2e5   : > { %4574 = vmatpush3.msra.mxu1 %v3033_v50  ;;  %4527 = vmatprep.subr.mxu0 %v3060_v8  ;;  %v6904_v50 = vmul.f32 %v6876_v56, %v2939_v26 }
 0x2e6   : > { %4575 = vmatprep.subr.mxu1 %v3032_v13  ;;  %4528 = vmatpush3.msra.mxu0 %v3060_v8 }
 0x2e7   : > { %4576 = vmatpush3.msra.mxu1 %v3032_v13  ;;  %4529 = vmatprep.subr.mxu0 %v3059_v30  ;;  %v2948_v13 = vld [vmem:[%s6879_s7 + $0x58] sm:$0xff] }
 0x2e8   : > { %4577 = vmatprep.subr.mxu1 %v3031_v59  ;;  %4530 = vmatpush3.msra.mxu0 %v3059_v30  ;;  %v6933_v30 = vmul.f32 %v6876_v56, %v2946_v45 }
 0x2e9   : > { %4578 = vmatpush3.msra.mxu1 %v3031_v59  ;;  %4531 = vmatprep.subr.mxu0 %v3058_v6  ;;  %v2950_v59 = vld [vmem:[%s6879_s7 + $0x68] sm:$0xff] }
 0x2ea   : > { %4579 = vmatprep.subr.mxu1 %v3030_v5  ;;  %4532 = vmatpush3.msra.mxu0 %v3058_v6  ;;  %v6936_v6 = vmul.f32 %v6876_v56, %v2947_v32 }
 0x2eb   : > { %4580 = vmatpush3.msra.mxu1 %v3030_v5  ;;  %4533 = vmatprep.subr.mxu0 %v3057_v20 }
 0x2ec   : > { %4581 = vmatprep.subr.mxu1 %v3029_v54  ;;  %4534 = vmatpush3.msra.mxu0 %v3057_v20  ;;  %v6942_v20 = vmul.f32 %v6876_v56, %v2949_v35 }
 0x2ed   : > { %4582 = vmatpush3.msra.mxu1 %v3029_v54  ;;  %4535 = vmatprep.subr.mxu0 %v3056_v28  ;;  %v6918_v54 = vmul.f32 %v6876_v56, %v2942_v63 }
 0x2ee   : > { %4583 = vmatprep.subr.mxu1 %v3028_v49  ;;  %4536 = vmatpush3.msra.mxu0 %v3056_v28 }
 0x2ef   : > { %4584 = vmatpush3.msra.mxu1 %v3028_v49  ;;  %4537 = vmatprep.subr.mxu0 %v3055_v27  ;;  %v6924_v49 = vmul.f32 %v6876_v56, %v2944_v39  ;;  %v2736_v39 = vld [vmem:[%s5676_s2] sm:$0xff] }
 0x2f0   : > { %4585 = vmatprep.subr.mxu1 %v3027_v44  ;;  %4538 = vmatpush3.msra.mxu0 %v3055_v27 }
 0x2f1   : > { %4586 = vmatpush3.msra.mxu1 %v3027_v44  ;;  %v6930_v44 = vmul.f32 %v6876_v56, %v2945_v48 }
 0x2f2   : > { %4587 = vmatprep.subr.mxu1 %v3026_v31 }
 0x2f3   : > { %4588 = vmatpush3.msra.mxu1 %v3026_v31 }
 0x2f4   : > { %4589 = vmatprep.subr.mxu1 %v3025_v10 }
 0x2f5   : > { %4590 = vmatpush3.msra.mxu1 %v3025_v10  ;;  %v6939_v10 = vmul.f32 %v6876_v56, %v2948_v13  ;;  %v6978_v13 = vld [vmem:[#allocation11] ss:$0 sm:$0xff] }
 0x2f6   : > { %4591 = vmatprep.subr.mxu1 %v3024_v2 }
 0x2f7   : > { %4592 = vmatpush3.msra.mxu1 %v3024_v2  ;;  %v6945_v2 = vmul.f32 %v6876_v56, %v2950_v59 }
 0x2f8   : > { %4593 = vmatprep.subr.mxu1 %v3023_v37 }
 0x2f9   : > { %4594 = vmatpush3.msra.mxu1 %v3023_v37 }
 0x371   : > { %v6868_v57 = vpop.f32.mrf.mxu1 }
 0x373   : > { %v4429_v47 = vpop.f32.mrf.mxu0  ;;  %v6883_v40 = vpop.f32.mrf.mxu1 }
 0x374   : > { %v6863_v24 = vadd.f32 0.0001, %v4429_v47 }
 0x375   : > { %v2545_v4 = vpop.f32.mrf.mxu0 }
 0x376   : > { %4832 = vrsqrt.f32 %v6863_v24  ;;  %v6866_v23 = vadd.f32 0.0001, %v2545_v4  ;;  %v6912_v36 = vpop.f32.mrf.mxu1  ;;  %vm2633_vm5 = vcmp.eq.f32.partialorder %v6863_v24, inf  ;;  %vm2635_vm6 = vcmp.eq.f32.partialorder %v6863_v24, 0.0 }
 0x377   : > { %v2636_v27 = vand.u32 2147483648, %v6863_v24 }
 0x378   : > { %v4432_v3 = vpop.f32.mrf.mxu0  ;;  %4834 = vrsqrt.f32 %v6866_v23  ;;  %v6952_v47 = vpop.f32.mrf.mxu1  ;;  %vm2626_vm7 = vcmp.eq.f32.partialorder %v6866_v23, inf  ;;  %vm2628_vm8 = vcmp.eq.f32.partialorder %v6866_v23, 0.0  ;;  %v2629_v26 = vand.u32 2147483648, %v6866_v23 }
 0x379   : > { %v6871_v15 = vadd.f32 0.0001, %v4432_v3  ;;  %v2737_v3 = vld [vmem:[%s5676_s2 + $0x8] sm:$0xff] }
 0x37a   : > { %v2555_v46 = vpop.f32.mrf.mxu0 }
 0x37b   : > { %4836 = vrsqrt.f32 %v6871_v15  ;;  %v6874_v60 = vadd.f32 0.0001, %v2555_v46  ;;  %vm2647_vm9 = vcmp.eq.f32.partialorder %v6871_v15, inf  ;;  %vm2649_vm10 = vcmp.eq.f32.partialorder %v6871_v15, 0.0 }
 0x37d   : > { %4838 = vrsqrt.f32 %v6874_v60  ;;  %vm2640_vm11 = vcmp.eq.f32.partialorder %v6874_v60, inf  ;;  %vm2642_vm12 = vcmp.eq.f32.partialorder %v6874_v60, 0.0  ;;  %v2643_v35 = vand.u32 2147483648, %v6874_v60 }
 0x37e   : > { %v6972_v45 = vpop.f32.mrf.mxu1 }
 0x380   : > { %v4435_v38 = vpop.f32.mrf.mxu0 }
 0x381   : > { %v6898_v7 = vadd.f32 0.0001, %v4435_v38 }
 0x382   : > { %v2565_v5 = vpop.f32.mrf.mxu0 }
 0x383   : > { %4840 = vrsqrt.f32 %v6898_v7  ;;  %v6927_v8 = vadd.f32 0.0001, %v2565_v5  ;;  %v4833_v31 = vpop.eup %4832  ;;  %vm2661_vm13 = vcmp.eq.f32.partialorder %v6898_v7, inf  ;;  %vm2663_vm14 = vcmp.eq.f32.partialorder %v6898_v7, 0.0 }
 0x384   : > { %v2632_v28 = vmul.f32 %v4833_v31, %v6863_v24 }
 0x385   : > { %4842 = vrsqrt.f32 %v6927_v8  ;;  %v4835_v46 = vpop.eup %4834  ;;  %vm2654_vm15 = vcmp.eq.f32.partialorder %v6927_v8, inf  ;;  %vm2656_vm1 = vcmp.eq.f32.partialorder %v6927_v8, 0.0 }
 0x386   : > { %v4438_v37 = vpop.f32.mrf.mxu0  ;;  %v2634_v12 = vsel %vm2633_vm5, %v6863_v24, %v2632_v28  ;;  %v2625_v42 = vmul.f32 %v4835_v46, %v6866_v23  ;;  %v2650_v24 = vand.u32 2147483648, %v6871_v15  ;;  %v2739_v28 = vld [vmem:[%s5676_s2 + $0x18] sm:$0xff] }
 0x387   : > { %v6954_v4 = vadd.f32 0.0001, %v4438_v37  ;;  %v2637_v19 = vsel %vm2635_vm6, %v2636_v27, %v2634_v12  ;;  %v2664_v12 = vand.u32 2147483648, %v6898_v7 }
 0x388   : > { %v2575_v0 = vpop.f32.mrf.mxu0  ;;  %v4837_v22 = vpop.eup %4836  ;;  %v2753_v38 = vmul.f32 %v2737_v3, %v2637_v19  ;;  %v2627_v32 = vsel %vm2626_vm7, %v6866_v23, %v2625_v42 }
 0x389   : > { %4844 = vrsqrt.f32 %v6954_v4  ;;  %v6965_v63 = vadd.f32 0.0001, %v2575_v0  ;;  %v2646_v48 = vmul.f32 %v4837_v22, %v6871_v15  ;;  %v2630_v5 = vsel %vm2628_vm8, %v2629_v26, %v2627_v32  ;;  %v6999_v19 = vpop.f32.mrf.mxu1 }
 0x38a   : > { %v4839_v59 = vpop.eup %4838  ;;  %v2840_v31 = vadd.f32 %v6868_v57, %v2753_v38  ;;  %v2752_v3 = vmul.f32 %v2736_v39, %v2630_v5  ;;  %v2738_v57 = vld [vmem:[%s5676_s2 + $0x10] sm:$0xff]  ;;  %vm2675_vm2 = vcmp.eq.f32.partialorder %v6954_v4, inf  ;;  %vm2677_vm4 = vcmp.eq.f32.partialorder %v6954_v4, 0.0 }
 0x38b   : > { %4846 = vrsqrt.f32 %v6965_v63  ;;  %v2639_v37 = vmul.f32 %v4839_v59, %v6874_v60  ;;  %v2648_v46 = vsel %vm2647_vm9, %v6871_v15, %v2646_v48  ;;  %vm2668_vm3 = vcmp.eq.f32.partialorder %v6965_v63, inf }
 0x38c   : > { %v4441_v27 = vpop.f32.mrf.mxu0  ;;  %v2921_v23 = vadd.f32 %v6978_v13, %v2840_v31  ;;  %v2651_v26 = vsel %vm2649_vm10, %v2650_v24, %v2648_v46  ;;  %v2835_v22 = vadd.f32 %v6883_v40, %v2752_v3  ;;  %v2657_v31 = vand.u32 2147483648, %v6927_v8  ;;  %v2741_v46 = vld [vmem:[%s5676_s2 + $0x28] sm:$0xff] }
 0x38d   : > { %v6992_v0 = vadd.f32 0.0001, %v4441_v27  ;;  %v2641_v39 = vsel %vm2640_vm11, %v6874_v60, %v2639_v37  ;;  %v2755_v38 = vmul.f32 %v2739_v28, %v2651_v26  ;;  %v7018_v27 = vpop.f32.mrf.mxu1  ;;  %vm2670_vm5 = vcmp.eq.f32.partialorder %v6965_v63, 0.0 }
 0x38e   : > { %v2585_v42 = vpop.f32.mrf.mxu0  ;;  %v2976_v15 = vadd.f32 %v6893_v16, %v2921_v23  ;;  %v2644_v24 = vsel %vm2642_vm12, %v2643_v35, %v2641_v39  ;;  %v2920_v40 = vadd.f32 %v6978_v13, %v2835_v22 }
 0x38f   : > { %4848 = vrsqrt.f32 %v6992_v0  ;;  %v7007_v48 = vadd.f32 0.0001, %v2585_v42  ;;  %v2754_v59 = vmul.f32 %v2738_v57, %v2644_v24  ;;  %v2850_v5 = vadd.f32 %v6912_v36, %v2755_v38 }
 0x390   : > { %v4841_v32 = vpop.eup %4840  ;;  %v2992_v37 = vmax.f32 %v2976_v15, 0.0  ;;  %v2975_v60 = vadd.f32 %v6901_v11, %v2920_v40  ;;  %v2678_v36 = vand.u32 2147483648, %v6954_v4  ;;  %v2671_v24 = vand.u32 2147483648, %v6965_v63  ;;  %v7042_v40 = vpop.f32.mrf.mxu1 }
 0x391   : > { %v2660_v28 = vmul.f32 %v4841_v32, %v6898_v7  ;;  %4850 = vrsqrt.f32 %v7007_v48  ;;  %v2845_v35 = vadd.f32 %v6952_v47, %v2754_v59  ;;  %v2923_v3 = vadd.f32 %v6978_v13, %v2850_v5 }
 0x392   : > { %v4843_v16 = vpop.eup %4842  ;;  %v3008_v57 = vadd.f32 %v2992_v37, %v6528_v43  ;;  %v2991_v11 = vmax.f32 %v2975_v60, 0.0  ;;  %vm2689_vm6 = vcmp.eq.f32.partialorder %v6992_v0, inf  ;;  %vm2682_vm7 = vcmp.eq.f32.partialorder %v7007_v48, inf }
 0x393   : > { %v2653_v23 = vmul.f32 %v4843_v16, %v6927_v8  ;;  %v2662_v26 = vsel %vm2661_vm13, %v6898_v7, %v2660_v28  ;;  %v2922_v47 = vadd.f32 %v6978_v13, %v2845_v35  ;;  %v2978_v42 = vadd.f32 %v6907_v62, %v2923_v3 }
 0x394   : > { %v2665_v22 = vsel %vm2663_vm14, %v2664_v12, %v2662_v26  ;;  %v3007_v7 = vadd.f32 %v2991_v11, %v6555_v61  ;;  %v2740_v12 = vld [vmem:[%s5676_s2 + $0x20] sm:$0xff]  ;;  %v3040_v37 = vmul.f32 %v3008_v57, %v3008_v57  ;;  %vm2684_vm8 = vcmp.eq.f32.partialorder %v7007_v48, 0.0 }
 0x395   : > { %v4444_v38 = vpop.f32.mrf.mxu0  ;;  %v2655_v43 = vsel %vm2654_vm15, %v6927_v8, %v2653_v23  ;;  %v2757_v15 = vmul.f32 %v2741_v46, %v2665_v22  ;;  %v2977_v62 = vadd.f32 %v6904_v50, %v2922_v47  ;;  %v2994_v16 = vmax.f32 %v2978_v42, 0.0 }
 0x396   : > { %v4845_v39 = vpop.eup %4844  ;;  %v7044_v59 = vadd.f32 0.0001, %v4444_v38  ;;  %v2658_v60 = vsel %vm2656_vm1, %v2657_v31, %v2655_v43  ;;  %4595 = vmatprep.mubr.f32.mxu1 %v3007_v7  ;;  %v3039_v61 = vmul.f32 %v3007_v7, %v3007_v7  ;;  %v7060_v31 = vpop.f32.mrf.mxu1  ;;  %v2742_v38 = vld [vmem:[%s5676_s2 + $0x30] sm:$0xff]  ;;  %v2743_v43 = vld [vmem:[%s5676_s2 + $0x38] sm:$0xff]  ;;  %vm2691_vm9 = vcmp.eq.f32.partialorder %v6992_v0, 0.0 }
 0x397   : > { %v2674_v32 = vmul.f32 %v4845_v39, %v6954_v4  ;;  %v2595_v28 = vpop.f32.mrf.mxu0  ;;  %v2860_v35 = vadd.f32 %v6972_v45, %v2757_v15  ;;  %4596 = vmatmul.mubr.f32.vlgmr.msra.gmra.mxu1 %v3008_v57  ;;  %v2993_v23 = vmax.f32 %v2977_v62, 0.0  ;;  %v3010_v26 = vadd.f32 %v2994_v16, %v6573_v53 }
 0x398   : > { %v4847_v5 = vpop.eup %4846  ;;  %4852 = vrsqrt.f32 %v7044_v59  ;;  %v7055_v46 = vadd.f32 0.0001, %v2595_v28  ;;  %v2756_v8 = vmul.f32 %v2740_v12, %v2658_v60  ;;  %4539 = vmatprep.mubr.f32.mxu0 %v3039_v61  ;;  %v2685_v15 = vand.u32 2147483648, %v7007_v48 }
 0x399   : > { %v2667_v3 = vmul.f32 %v4847_v5, %v6965_v63  ;;  %v4447_v50 = vpop.f32.mrf.mxu0  ;;  %v2925_v45 = vadd.f32 %v6978_v13, %v2860_v35  ;;  %v2676_v53 = vsel %vm2675_vm2, %v6954_v4, %v2674_v32  ;;  %4540 = vmatmul.mubr.f32.vlgmr.msra.gmra.mxu0 %v3040_v37  ;;  %v3009_v42 = vadd.f32 %v2993_v23, %v6589_v52  ;;  %v2874_v37 = vpop.f32.mrf.mxu1 }
 0x39a   : > { %4854 = vrsqrt.f32 %v7055_v46  ;;  %v7063_v11 = vadd.f32 0.0001, %v4447_v50  ;;  %v2855_v22 = vadd.f32 %v6999_v19, %v2756_v8  ;;  %v2679_v12 = vsel %vm2677_vm4, %v2678_v36, %v2676_v53  ;;  %v2744_v53 = vld [vmem:[%s5676_s2 + $0x40] sm:$0xff] }
 0x39b   : > { %v2669_v57 = vsel %vm2668_vm3, %v6965_v63, %v2667_v3  ;;  %v2605_v47 = vpop.f32.mrf.mxu0  ;;  %v2980_v39 = vadd.f32 %v6918_v54, %v2925_v45  ;;  %4598 = vmatprep.mubr.f32.mxu1 %v3009_v42  ;;  %v3041_v19 = vmul.f32 %v3009_v42, %v3009_v42  ;;  %v3042_v60 = vmul.f32 %v3010_v26, %v3010_v26  ;;  %v2745_v45 = vld [vmem:[%s5676_s2 + $0x48] sm:$0xff] }
 0x39c   : > { %v4849_v7 = vpop.eup %4848  ;;  %4856 = vrsqrt.f32 %v7063_v11  ;;  %v7079_v62 = vadd.f32 0.0001, %v2605_v47  ;;  %v2672_v32 = vsel %vm2670_vm5, %v2671_v24, %v2669_v57  ;;  %v2924_v54 = vadd.f32 %v6978_v13, %v2855_v22  ;;  %4599 = vmatmul.mubr.f32.gmra.mxu1 %v3010_v26  ;;  %v7105_v47 = vpop.f32.mrf.mxu1 }
 0x39d   : > { %v2688_v52 = vmul.f32 %v4849_v7, %v6992_v0  ;;  %v2996_v5 = vmax.f32 %v2980_v39, 0.0  ;;  %v2758_v63 = vmul.f32 %v2742_v38, %v2672_v32  ;;  %v2759_v24 = vmul.f32 %v2743_v43, %v2679_v12  ;;  %4542 = vmatprep.mubr.f32.mxu0 %v3041_v19 }
 0x39e   : > { %v4851_v28 = vpop.eup %4850  ;;  %4858 = vrsqrt.f32 %v7079_v62  ;;  %v4450_v16 = vpop.f32.mrf.mxu0  ;;  %v2979_v35 = vadd.f32 %v6915_v21, %v2924_v54  ;;  %v2692_v3 = vand.u32 2147483648, %v6992_v0  ;;  %4543 = vmatmul.mubr.f32.gmra.mxu0 %v3042_v60  ;;  %vm2696_vm10 = vcmp.eq.f32.partialorder %v7055_v46, inf }
 0x39f   : > { %v2681_v4 = vmul.f32 %v4851_v28, %v7007_v48  ;;  %v7089_v36 = vadd.f32 0.0001, %v4450_v16  ;;  %v3012_v50 = vadd.f32 %v2996_v5, %v6640_v41  ;;  %v2865_v23 = vadd.f32 %v7042_v40, %v2758_v63 }
 0x3a0   : > { %v2615_v61 = vpop.f32.mrf.mxu0  ;;  %v2870_v26 = vadd.f32 %v7018_v27, %v2759_v24  ;;  %v2690_v8 = vsel %vm2689_vm6, %v6992_v0, %v2688_v52  ;;  %v2995_v21 = vmax.f32 %v2979_v35, 0.0  ;;  %vm2698_vm11 = vcmp.eq.f32.partialorder %v7055_v46, 0.0 }
 0x3a1   : > { %4860 = vrsqrt.f32 %v7089_v36  ;;  %v7101_v57 = vadd.f32 0.0001, %v2615_v61  ;;  %v2926_v41 = vadd.f32 %v6978_v13, %v2865_v23  ;;  %v2683_v27 = vsel %vm2682_vm7, %v7007_v48, %v2681_v4  ;;  %v2884_v48 = vpop.f32.mrf.mxu1 }
 0x3a2   : > { %v2927_v40 = vadd.f32 %v6978_v13, %v2870_v26  ;;  %v2693_v42 = vsel %vm2691_vm9, %v2692_v3, %v2690_v8  ;;  %v3011_v22 = vadd.f32 %v2995_v21, %v6627_v25  ;;  %v2686_v0 = vsel %vm2684_vm8, %v2685_v15, %v2683_v27  ;;  %v2747_v3 = vld [vmem:[%s5676_s2 + $0x58] sm:$0xff]  ;;  %v2746_v26 = vld [vmem:[%s5676_s2 + $0x50] sm:$0xff] }
 0x3a3   : > { %4862 = vrsqrt.f32 %v7101_v57  ;;  %v2761_v39 = vmul.f32 %v2745_v45, %v2693_v42  ;;  %v3044_v38 = vmul.f32 %v3012_v50, %v3012_v50  ;;  %v2981_v43 = vadd.f32 %v6921_v17, %v2926_v41 }
 0x3a4   : > { %v2982_v7 = vadd.f32 %v6924_v49, %v2927_v40  ;;  %v2760_v32 = vmul.f32 %v2744_v53, %v2686_v0  ;;  %4601 = vmatprep.mubr.f32.mxu1 %v3011_v22  ;;  %v3043_v52 = vmul.f32 %v3011_v22, %v3011_v22  ;;  %v2699_v54 = vand.u32 2147483648, %v7055_v46  ;;  %v2748_v0 = vld [vmem:[%s5676_s2 + $0x60] sm:$0xff] }
 0x3a5   : > { %v4853_v12 = vpop.eup %4852  ;;  %v2880_v19 = vadd.f32 %v7060_v31, %v2761_v39  ;;  %vm2703_vm12 = vcmp.eq.f32.partialorder %v7044_v59, inf  ;;  %4602 = vmatmul.mubr.f32.gmra.mxu1 %v3012_v50  ;;  %v2997_v15 = vmax.f32 %v2981_v43, 0.0  ;;  %vm2705_vm13 = vcmp.eq.f32.partialorder %v7044_v59, 0.0  ;;  %v4503_v50 = vpop.f32.mrf.mxu1 }
 0x3a6   : > { %v2702_v25 = vmul.f32 %v4853_v12, %v7044_v59  ;;  %v2998_v5 = vmax.f32 %v2982_v7, 0.0  ;;  %v2875_v17 = vadd.f32 %v2874_v37, %v2760_v32  ;;  %4545 = vmatprep.mubr.f32.mxu0 %v3043_v52  ;;  %v2706_v31 = vand.u32 2147483648, %v7044_v59  ;;  %v2749_v32 = vld [vmem:[%s5676_s2 + $0x68] sm:$0xff] }
 0x3a7   : > { %v4855_v28 = vpop.eup %4854  ;;  %v2929_v49 = vadd.f32 %v6978_v13, %v2880_v19  ;;  %vm2710_vm14 = vcmp.eq.f32.partialorder %v7079_v62, inf  ;;  %4546 = vmatmul.mubr.f32.gmra.mxu0 %v3044_v38  ;;  %v3013_v60 = vadd.f32 %v2997_v15, %v6656_v51  ;;  %vm2712_vm15 = vcmp.eq.f32.partialorder %v7079_v62, 0.0  ;;  %v2894_v38 = vpop.f32.mrf.mxu1 }
 0x3a8   : > { %v2695_v16 = vmul.f32 %v4855_v28, %v7055_v46  ;;  %v3014_v63 = vadd.f32 %v2998_v5, %v6666_v33  ;;  %v2928_v37 = vadd.f32 %v6978_v13, %v2875_v17  ;;  %v2704_v35 = vsel %vm2703_vm12, %v7044_v59, %v2702_v25 }
 0x3a9   : > { %v4857_v24 = vpop.eup %4856  ;;  %v2984_v4 = vadd.f32 %v6933_v30, %v2929_v49  ;;  %v2713_v61 = vand.u32 2147483648, %v7079_v62  ;;  %4604 = vmatprep.mubr.f32.mxu1 %v3013_v60  ;;  %v3045_v51 = vmul.f32 %v3013_v60, %v3013_v60  ;;  %vm2717_vm1 = vcmp.eq.f32.partialorder %v7063_v11, inf  ;;  %v4506_v28 = vpop.f32.mrf.mxu1 }
 0x3aa   : > { %v2716_v23 = vmul.f32 %v4857_v24, %v7063_v11  ;;  %v2983_v33 = vadd.f32 %v6930_v44, %v2928_v37  ;;  %4605 = vmatmul.mubr.f32.gmra.mxu1 %v3014_v63  ;;  %v3046_v8 = vmul.f32 %v3014_v63, %v3014_v63  ;;  %v2697_v21 = vsel %vm2696_vm10, %v7055_v46, %v2695_v16  ;;  %v2951_v24 = vld [vmem:[%s6879_s7 + $0x70] sm:$0xff] }
 0x3ab   : > { %v4859_v30 = vpop.eup %4858  ;;  %v3000_v45 = vmax.f32 %v2984_v4, 0.0  ;;  %v2707_v53 = vsel %vm2705_vm13, %v2706_v31, %v2704_v35  ;;  %4548 = vmatprep.mubr.f32.mxu0 %v3045_v51  ;;  %v2700_v40 = vsel %vm2698_vm11, %v2699_v54, %v2697_v21  ;;  %vm2719_vm2 = vcmp.eq.f32.partialorder %v7063_v11, 0.0 }
 0x3ac   : > { %v2709_v41 = vmul.f32 %v4859_v30, %v7079_v62  ;;  %v2999_v44 = vmax.f32 %v2983_v33, 0.0  ;;  %v2763_v27 = vmul.f32 %v2747_v3, %v2707_v53  ;;  %4549 = vmatmul.mubr.f32.gmra.mxu0 %v3046_v8  ;;  %v2762_v22 = vmul.f32 %v2746_v26, %v2700_v40  ;;  %v2904_v33 = vpop.f32.mrf.mxu1 }
 0x3ad   : > { %v3016_v42 = vadd.f32 %v3000_v45, %v6697_v29  ;;  %v2718_v39 = vsel %vm2717_vm1, %v7063_v11, %v2716_v23  ;;  %v2720_v29 = vand.u32 2147483648, %v7063_v11  ;;  %vm2724_vm3 = vcmp.eq.f32.partialorder %v7101_v57, inf  ;;  %v2750_v11 = vld [vmem:[%s5676_s2 + $0x70] sm:$0xff] }
 0x3ae   : > { %v4861_v59 = vpop.eup %4860  ;;  %v3015_v43 = vadd.f32 %v2999_v44, %v6685_v18  ;;  %v2890_v7 = vadd.f32 %v7105_v47, %v2763_v27  ;;  %v2711_v46 = vsel %vm2710_vm14, %v7079_v62, %v2709_v41  ;;  %v2885_v52 = vadd.f32 %v2884_v48, %v2762_v22  ;;  %v2952_v41 = vld [vmem:[%s6879_s7 + $0x78] sm:$0xff] }
 0x3af   : > { %v2730_v12 = vmul.f32 %v4861_v59, %v7089_v36  ;;  %v2714_v19 = vsel %vm2712_vm15, %v2713_v61, %v2711_v46  ;;  %v2721_v15 = vsel %vm2719_vm2, %v2720_v29, %v2718_v39  ;;  %v3048_v48 = vmul.f32 %v3016_v42, %v3016_v42 }
 0x3b0   : > { %v4863_v54 = vpop.eup %4862  ;;  %4607 = vmatprep.mubr.f32.mxu1 %v3015_v43  ;;  %v3047_v18 = vmul.f32 %v3015_v43, %v3015_v43  ;;  %v2931_v47 = vadd.f32 %v6978_v13, %v2890_v7  ;;  %v2764_v25 = vmul.f32 %v2748_v0, %v2714_v19  ;;  %v2930_v62 = vadd.f32 %v6978_v13, %v2885_v52 }
 0x3b1   : > { %v2723_v5 = vmul.f32 %v4863_v54, %v7101_v57  ;;  %4608 = vmatmul.mubr.f32.gmra.mxu1 %v3016_v42  ;;  %v2765_v17 = vmul.f32 %v2749_v32, %v2721_v15  ;;  %vm2726_vm4 = vcmp.eq.f32.partialorder %v7101_v57, 0.0  ;;  %v2727_v16 = vand.u32 2147483648, %v7101_v57 }
 0x3b2   : > { %4551 = vmatprep.mubr.f32.mxu0 %v3047_v18  ;;  %v2986_v49 = vadd.f32 %v6939_v10, %v2931_v47  ;;  %v2895_v31 = vadd.f32 %v2894_v38, %v2764_v25  ;;  %v2985_v60 = vadd.f32 %v6936_v6, %v2930_v62  ;;  %vm2731_vm5 = vcmp.eq.f32.partialorder %v7089_v36, inf }
 0x3b3   : > { %4552 = vmatmul.mubr.f32.gmra.mxu0 %v3048_v48  ;;  %v2900_v63 = vadd.f32 %v4503_v50, %v2765_v17  ;;  %v2725_v37 = vsel %vm2724_vm3, %v7101_v57, %v2723_v5  ;;  %v2732_v3 = vsel %vm2731_vm5, %v7089_v36, %v2730_v12  ;;  %v2734_v6 = vand.u32 2147483648, %v7089_v36  ;;  %v2751_v50 = vld [vmem:[%s5676_s2 + $0x78] sm:$0xff]  ;;  %v7225_v5 = vld [vmem:[%s7602_s3] ss:$0 sm:$0xff]  ;;  %s7267_s2 = scalar_lea.vmem %s7604_s0, %s5848_s9 }
 0x3b4   : > { %v3002_v4 = vmax.f32 %v2986_v49, 0.0  ;;  %v2932_v10 = vadd.f32 %v6978_v13, %v2895_v31  ;;  %v2728_v35 = vsel %vm2726_vm4, %v2727_v16, %v2725_v37  ;;  %v3001_v61 = vmax.f32 %v2985_v60, 0.0  ;;  %v3530_v48 = vld [vmem:[%s7212_s30 + $0x8] sm:$0xff] }
 0x3b5   : > { %v2933_v23 = vadd.f32 %v6978_v13, %v2900_v63  ;;  %v2766_v51 = vmul.f32 %v2750_v11, %v2728_v35  ;;  %v2973_v30 = vmul.f32 %v6876_v56, %v2951_v24  ;;  %vm2733_vm6 = vcmp.eq.f32.partialorder %v7089_v36, 0.0  ;;  %v3329_v11 = vld [vmem:[%s7220_s29 + $0x8] sm:$0xff] }
 0x3b6   : > { %v3018_v57 = vadd.f32 %v3002_v4, %v6734_v14  ;;  %v2987_v26 = vadd.f32 %v6942_v20, %v2932_v10  ;;  %v3017_v8 = vadd.f32 %v3001_v61, %v6718_v34  ;;  %v2735_v53 = vsel %vm2733_vm6, %v2734_v6, %v2732_v3 }
 0x3b7   : > { %v2988_v45 = vadd.f32 %v6945_v2, %v2933_v23  ;;  %v2905_v21 = vadd.f32 %v2904_v33, %v2766_v51  ;;  %v2767_v40 = vmul.f32 %v2751_v50, %v2735_v53  ;;  %v2974_v36 = vmul.f32 %v6876_v56, %v2952_v41  ;;  %v3328_v50 = vld [vmem:[%s7220_s29] sm:$0xff] }
 0x3b8   : > { %v3003_v44 = vmax.f32 %v2987_v26, 0.0  ;;  %4610 = vmatprep.mubr.f32.mxu1 %v3017_v8  ;;  %v3049_v27 = vmul.f32 %v3017_v8, %v3017_v8  ;;  %v3050_v20 = vmul.f32 %v3018_v57, %v3018_v57  ;;  %v3552_v60 = vmul.f32 %v7225_v5, %v3530_v48  ;;  %v7244_v26 = vld [vmem:[%s7603_s20] ss:$0 sm:$0xff] }
 0x3b9   : > { %v3004_v42 = vmax.f32 %v2988_v45, 0.0  ;;  %v2934_v14 = vadd.f32 %v6978_v13, %v2905_v21  ;;  %4611 = vmatmul.mubr.f32.gmra.mxu1 %v3018_v57  ;;  %v2910_v0 = vadd.f32 %v4506_v28, %v2767_v40  ;;  %v3529_v28 = vld [vmem:[%s7212_s30] sm:$0xff] }
 0x3ba   : > { %v3019_v22 = vadd.f32 %v3003_v44, %v6738_v1  ;;  %4554 = vmatprep.mubr.f32.mxu0 %v3049_v27  ;;  %v3551_v10 = vmul.f32 %v7225_v5, %v3529_v28  ;;  %v3331_v27 = vld [vmem:[%s7220_s29 + $0x18] sm:$0xff] }
 0x3bb   : > { %v3020_v34 = vadd.f32 %v3004_v42, %v6750_v58  ;;  %v2989_v2 = vadd.f32 %v2973_v30, %v2934_v14  ;;  %4555 = vmatmul.mubr.f32.gmra.mxu0 %v3050_v20  ;;  %v2935_v59 = vadd.f32 %v6978_v13, %v2910_v0  ;;  %v3532_v0 = vld [vmem:[%s7212_s30 + $0x18] sm:$0xff] }
 0x3bc   : > { %4613 = vmatprep.mubr.f32.mxu1 %v3019_v22  ;;  %v3051_v39 = vmul.f32 %v3019_v22, %v3019_v22 }
 0x3bd   : > { %v3005_v38 = vmax.f32 %v2989_v2, 0.0  ;;  %4614 = vmatmul.mubr.f32.gmra.mxu1 %v3020_v34  ;;  %v3052_v43 = vmul.f32 %v3020_v34, %v3020_v34  ;;  %v2990_v7 = vadd.f32 %v2974_v36, %v2935_v59  ;;  %v3330_v34 = vld [vmem:[%s7220_s29 + $0x10] sm:$0xff] }
 0x3be   : > { %4557 = vmatprep.mubr.f32.mxu0 %v3051_v39 }
 0x3bf   : > { %v3021_v46 = vadd.f32 %v3005_v38, %v6756_v55  ;;  %4558 = vmatmul.mubr.f32.gmra.mxu0 %v3052_v43  ;;  %v3006_v1 = vmax.f32 %v2990_v7, 0.0  ;;  %v3531_v38 = vld [vmem:[%s7212_s30 + $0x10] sm:$0xff]  ;;  %v3534_v7 = vld [vmem:[%s7212_s30 + $0x28] sm:$0xff] }
 0x3c1   : > { %4616 = vmatprep.mubr.f32.mxu1 %v3021_v46  ;;  %v3053_v56 = vmul.f32 %v3021_v46, %v3021_v46  ;;  %v3022_v29 = vadd.f32 %v3006_v1, %v6760_v9 }
 0x3c3   : > { %4560 = vmatprep.mubr.f32.mxu0 %v3053_v56  ;;  %4617 = vmatmul.mubr.f32.gmra.mxu1 %v3022_v29  ;;  %v3054_v58 = vmul.f32 %v3022_v29, %v3022_v29 }
 0x3c5   : > { %4561 = vmatmul.mubr.f32.gmra.mxu0 %v3054_v58 }
 0x457   : > { %v4597_v9 = vpop.f32.mrf.mxu1 }
 0x459   : > { %v4541_v32 = vpop.f32.mrf.mxu0  ;;  %v3426_v25 = vpop.f32.mrf.mxu1 }
 0x45a   : > { %v3143_v13 = vadd.f32 0.0001, %v4541_v32  ;;  %v3533_v32 = vld [vmem:[%s7212_s30 + $0x20] sm:$0xff] }
 0x45b   : > { %v3137_v12 = vpop.f32.mrf.mxu0 }
 0x45c   : > { %4864 = vrsqrt.f32 %v3143_v13  ;;  %v3138_v52 = vadd.f32 0.0001, %v3137_v12  ;;  %vm3225_vm7 = vcmp.eq.f32.partialorder %v3143_v13, inf  ;;  %v3228_v16 = vand.u32 2147483648, %v3143_v13  ;;  %v4600_v63 = vpop.f32.mrf.mxu1 }
 0x45d   : > { %vm3227_vm8 = vcmp.eq.f32.partialorder %v3143_v13, 0.0 }
 0x45e   : > { %v4544_v19 = vpop.f32.mrf.mxu0  ;;  %4866 = vrsqrt.f32 %v3138_v52  ;;  %vm3218_vm9 = vcmp.eq.f32.partialorder %v3138_v52, inf  ;;  %vm3220_vm10 = vcmp.eq.f32.partialorder %v3138_v52, 0.0  ;;  %v3221_v6 = vand.u32 2147483648, %v3138_v52  ;;  %v3436_v8 = vpop.f32.mrf.mxu1 }
 0x45f   : > { %v7202_v55 = vadd.f32 0.0001, %v4544_v19 }
 0x460   : > { %v3147_v54 = vpop.f32.mrf.mxu0 }
 0x461   : > { %v7204_v18 = vadd.f32 0.0001, %v3147_v54  ;;  %4868 = vrsqrt.f32 %v7202_v55  ;;  %vm3239_vm11 = vcmp.eq.f32.partialorder %v7202_v55, inf  ;;  %vm3241_vm12 = vcmp.eq.f32.partialorder %v7202_v55, 0.0 }
 0x462   : > { %v3242_v44 = vand.u32 2147483648, %v7202_v55 }
 0x463   : > { %4870 = vrsqrt.f32 %v7204_v18  ;;  %vm3232_vm13 = vcmp.eq.f32.partialorder %v7204_v18, inf  ;;  %vm3234_vm14 = vcmp.eq.f32.partialorder %v7204_v18, 0.0  ;;  %v3235_v36 = vand.u32 2147483648, %v7204_v18 }
 0x465   : > { %v4603_v43 = vpop.f32.mrf.mxu1 }
 0x467   : > { %v4547_v47 = vpop.f32.mrf.mxu0  ;;  %v3446_v28 = vpop.f32.mrf.mxu1 }
 0x468   : > { %v7214_v15 = vadd.f32 0.0001, %v4547_v47  ;;  %v3556_v47 = vmul.f32 %v7225_v5, %v3534_v7 }
 0x469   : > { %v3157_v62 = vpop.f32.mrf.mxu0  ;;  %v4865_v17 = vpop.eup %4864 }
 0x46a   : > { %4872 = vrsqrt.f32 %v7214_v15  ;;  %v3224_v49 = vmul.f32 %v4865_v17, %v3143_v13  ;;  %v7230_v31 = vadd.f32 0.0001, %v3157_v62  ;;  %vm3253_vm15 = vcmp.eq.f32.partialorder %v7214_v15, inf }
 0x46b   : > { %v4867_v24 = vpop.eup %4866  ;;  %vm3255_vm1 = vcmp.eq.f32.partialorder %v7214_v15, 0.0 }
 0x46c   : > { %v4550_v37 = vpop.f32.mrf.mxu0  ;;  %v3226_v4 = vsel %vm3225_vm7, %v3143_v13, %v3224_v49  ;;  %4874 = vrsqrt.f32 %v7230_v31  ;;  %v3217_v3 = vmul.f32 %v4867_v24, %v3138_v52  ;;  %v7291_v49 = vmul.f32 %v7225_v5, %v3533_v32 }
 0x46d   : > { %v3229_v35 = vsel %vm3227_vm8, %v3228_v16, %v3226_v4  ;;  %v7236_v61 = vadd.f32 0.0001, %v4550_v37  ;;  %vm3246_vm2 = vcmp.eq.f32.partialorder %v7230_v31, inf  ;;  %vm3248_vm3 = vcmp.eq.f32.partialorder %v7230_v31, 0.0 }
 0x46e   : > { %v3167_v23 = vpop.f32.mrf.mxu0  ;;  %v3345_v51 = vmul.f32 %v3329_v11, %v3229_v35  ;;  %v4869_v57 = vpop.eup %4868  ;;  %v3219_v30 = vsel %vm3218_vm9, %v3138_v52, %v3217_v3  ;;  %v3554_v52 = vmul.f32 %v7225_v5, %v3532_v0  ;;  %v3256_v11 = vand.u32 2147483648, %v7214_v15 }
 0x46f   : > { %v7239_v33 = vadd.f32 0.0001, %v3167_v23  ;;  %4876 = vrsqrt.f32 %v7236_v61  ;;  %v3222_v53 = vsel %vm3220_vm10, %v3221_v6, %v3219_v30  ;;  %v3238_v41 = vmul.f32 %v4869_v57, %v7202_v55  ;;  %v3332_v30 = vld [vmem:[%s7220_s29 + $0x20] sm:$0xff] }
 0x470   : > { %v4871_v45 = vpop.eup %4870  ;;  %v3432_v21 = vadd.f32 %v4597_v9, %v3345_v51  ;;  %v3344_v40 = vmul.f32 %v3328_v50, %v3222_v53  ;;  %v3553_v9 = vmul.f32 %v7225_v5, %v3531_v38  ;;  %v3249_v57 = vand.u32 2147483648, %v7230_v31 }
 0x471   : > { %v3231_v42 = vmul.f32 %v4871_v45, %v7204_v18  ;;  %4878 = vrsqrt.f32 %v7239_v33  ;;  %v3240_v22 = vsel %vm3239_vm11, %v7202_v55, %v3238_v41  ;;  %v3536_v55 = vld [vmem:[%s7212_s30 + $0x38] sm:$0xff]  ;;  %vm3267_vm4 = vcmp.eq.f32.partialorder %v7236_v61, inf }
 0x472   : > { %v3513_v20 = vadd.f32 %v7244_v26, %v3432_v21  ;;  %v3427_v2 = vadd.f32 %v3426_v25, %v3344_v40  ;;  %v3243_v39 = vsel %vm3241_vm12, %v3242_v44, %v3240_v22  ;;  %v3535_v25 = vld [vmem:[%s7212_s30 + $0x30] sm:$0xff]  ;;  %vm3269_vm5 = vcmp.eq.f32.partialorder %v7236_v61, 0.0 }
 0x473   : > { %v4553_v14 = vpop.f32.mrf.mxu0  ;;  %v3233_v59 = vsel %vm3232_vm13, %v7204_v18, %v3231_v42  ;;  %v3347_v29 = vmul.f32 %v3331_v27, %v3243_v39  ;;  %vm3260_vm6 = vcmp.eq.f32.partialorder %v7239_v33, inf  ;;  %vm3262_vm7 = vcmp.eq.f32.partialorder %v7239_v33, 0.0 }
 0x474   : > { %v7274_v46 = vadd.f32 0.0001, %v4553_v14  ;;  %v3568_v56 = vadd.f32 %v3552_v60, %v3513_v20  ;;  %v3236_v58 = vsel %vm3234_vm14, %v3235_v36, %v3233_v59  ;;  %v3512_v12 = vadd.f32 %v7244_v26, %v3427_v2  ;;  %v3333_v60 = vld [vmem:[%s7220_s29 + $0x28] sm:$0xff]  ;;  %v3335_v20 = vld [vmem:[%s7220_s29 + $0x38] sm:$0xff] }
 0x475   : > { %v3177_v1 = vpop.f32.mrf.mxu0  ;;  %v3346_v19 = vmul.f32 %v3330_v34, %v3236_v58  ;;  %v3442_v18 = vadd.f32 %v4600_v63, %v3347_v29  ;;  %v7298_v63 = vmul.f32 %v7225_v5, %v3536_v55  ;;  %v3270_v14 = vand.u32 2147483648, %v7236_v61 }
 0x476   : > { %v7277_v13 = vadd.f32 0.0001, %v3177_v1  ;;  %4880 = vrsqrt.f32 %v7274_v46  ;;  %3584 = vst.msk [vmem:[%s7267_s2 + $0x8] sm:$0xff] %vm1214_vm0, %v3568_v56  ;;  %v3567_v48 = vadd.f32 %v3551_v10, %v3512_v12  ;;  %v7306_v10 = vmul.f32 %v7225_v5, %v3535_v25 }
 0x477   : > { %v4873_v54 = vpop.eup %4872  ;;  %v3437_v62 = vadd.f32 %v3436_v8, %v3346_v19  ;;  %v3515_v16 = vadd.f32 %v7244_v26, %v3442_v18  ;;  %v4606_v8 = vpop.f32.mrf.mxu1  ;;  %v3263_v38 = vand.u32 2147483648, %v7239_v33  ;;  %vm3281_vm8 = vcmp.eq.f32.partialorder %v7274_v46, inf }
 0x478   : > { %4882 = vrsqrt.f32 %v7277_v13  ;;  %v3252_v17 = vmul.f32 %v4873_v54, %v7214_v15  ;;  %3583 = vst.msk [vmem:[%s7267_s2] sm:$0xff] %vm1214_vm0, %v3567_v48  ;;  %vm3283_vm9 = vcmp.eq.f32.partialorder %v7274_v46, 0.0  ;;  %vm3274_vm10 = vcmp.eq.f32.partialorder %v7277_v13, inf }
 0x479   : > { %v4875_v37 = vpop.eup %4874  ;;  %v3514_v24 = vadd.f32 %v7244_v26, %v3437_v62  ;;  %v3570_v35 = vadd.f32 %v3554_v52, %v3515_v16  ;;  %v3456_v36 = vpop.f32.mrf.mxu1  ;;  %v3277_v16 = vand.u32 2147483648, %v7277_v13  ;;  %vm3276_vm11 = vcmp.eq.f32.partialorder %v7277_v13, 0.0 }
 0x47a   : > { %v3254_v4 = vsel %vm3253_vm15, %v7214_v15, %v3252_v17  ;;  %v3245_v23 = vmul.f32 %v4875_v37, %v7230_v31 }
 0x47b   : > { %v3257_v3 = vsel %vm3255_vm1, %v3256_v11, %v3254_v4  ;;  %v4556_v51 = vpop.f32.mrf.mxu0  ;;  %v3569_v6 = vadd.f32 %v3553_v9, %v3514_v24  ;;  %3586 = vst.msk [vmem:[%s7267_s2 + $0x18] sm:$0xff] %vm1214_vm0, %v3570_v35  ;;  %v4609_v54 = vpop.f32.mrf.mxu1  ;;  %v3284_v9 = vand.u32 2147483648, %v7274_v46  ;;  %v3336_v11 = vld [vmem:[%s7220_s29 + $0x40] sm:$0xff] }
 0x47c   : > { %v3349_v50 = vmul.f32 %v3333_v60, %v3257_v3  ;;  %v7312_v45 = vadd.f32 0.0001, %v4556_v51  ;;  %v4877_v15 = vpop.eup %4876  ;;  %v3247_v21 = vsel %vm3246_vm2, %v7230_v31, %v3245_v23  ;;  %v3538_v60 = vld [vmem:[%s7212_s30 + $0x48] sm:$0xff] }
 0x47d   : > { %v3187_v53 = vpop.f32.mrf.mxu0  ;;  %3585 = vst.msk [vmem:[%s7267_s2 + $0x10] sm:$0xff] %vm1214_vm0, %v3569_v6  ;;  %v3250_v44 = vsel %vm3248_vm3, %v3249_v57, %v3247_v21  ;;  %v3266_v40 = vmul.f32 %v4877_v15, %v7236_v61  ;;  %v3466_v23 = vpop.f32.mrf.mxu1  ;;  %v3537_v6 = vld [vmem:[%s7212_s30 + $0x40] sm:$0xff] }
 0x47e   : > { %v3452_v41 = vadd.f32 %v4603_v43, %v3349_v50  ;;  %4884 = vrsqrt.f32 %v7312_v45  ;;  %v4879_v27 = vpop.eup %4878  ;;  %v3348_v42 = vmul.f32 %v3332_v30, %v3250_v44  ;;  %v7333_v2 = vadd.f32 0.0001, %v3187_v53  ;;  %v3334_v43 = vld [vmem:[%s7220_s29 + $0x30] sm:$0xff] }
 0x47f   : > { %v4559_v31 = vpop.f32.mrf.mxu0  ;;  %v3268_v0 = vsel %vm3267_vm4, %v7236_v61, %v3266_v40  ;;  %v3259_v34 = vmul.f32 %v4879_v27, %v7239_v33  ;;  %v3560_v30 = vmul.f32 %v7225_v5, %v3538_v60  ;;  %v3559_v21 = vmul.f32 %v7225_v5, %v3537_v6  ;;  %v4612_v44 = vpop.f32.mrf.mxu1  ;;  %v3340_v60 = vld [vmem:[%s7220_s29 + $0x60] sm:$0xff] }
 0x480   : > { %v3517_v22 = vadd.f32 %v7244_v26, %v3452_v41  ;;  %v3447_v39 = vadd.f32 %v3446_v28, %v3348_v42  ;;  %v3271_v59 = vsel %vm3269_vm5, %v3270_v14, %v3268_v0  ;;  %v7339_v7 = vadd.f32 0.0001, %v4559_v31  ;;  %v3339_v42 = vld [vmem:[%s7220_s29 + $0x58] sm:$0xff] }
 0x481   : > { %v3197_v1 = vpop.f32.mrf.mxu0  ;;  %v3351_v29 = vmul.f32 %v3335_v20, %v3271_v59  ;;  %v3261_v58 = vsel %vm3260_vm6, %v7239_v33, %v3259_v34  ;;  %4886 = vrsqrt.f32 %v7333_v2  ;;  %vm3295_vm12 = vcmp.eq.f32.partialorder %v7312_v45, inf }
 0x482   : > { %v3572_v56 = vadd.f32 %v3556_v47, %v3517_v22  ;;  %v3516_v61 = vadd.f32 %v7244_v26, %v3447_v39  ;;  %v3264_v12 = vsel %vm3262_vm7, %v3263_v38, %v3261_v58  ;;  %v3337_v47 = vld [vmem:[%s7220_s29 + $0x48] sm:$0xff]  ;;  %4888 = vrsqrt.f32 %v7339_v7  ;;  %v3476_v39 = vpop.f32.mrf.mxu1 }
 0x483   : > { %v4881_v32 = vpop.eup %4880  ;;  %v3462_v19 = vadd.f32 %v4606_v8, %v3351_v29  ;;  %v3350_v55 = vmul.f32 %v3334_v43, %v3264_v12  ;;  %v7372_v24 = vadd.f32 0.0001, %v3197_v1  ;;  %v3298_v27 = vand.u32 2147483648, %v7312_v45 }
 0x484   : > { %3588 = vst.msk [vmem:[%s7267_s2 + $0x28] sm:$0xff] %vm1214_vm0, %v3572_v56  ;;  %v3280_v18 = vmul.f32 %v4881_v32, %v7274_v46  ;;  %v3571_v33 = vadd.f32 %v7291_v49, %v3516_v61  ;;  %vm3297_vm13 = vcmp.eq.f32.partialorder %v7312_v45, 0.0  ;;  %vm3288_vm14 = vcmp.eq.f32.partialorder %v7333_v2, inf  ;;  %v3539_v32 = vld [vmem:[%s7212_s30 + $0x50] sm:$0xff] }
 0x485   : > { %v4883_v52 = vpop.eup %4882  ;;  %v4562_v48 = vpop.f32.mrf.mxu0  ;;  %v3519_v62 = vadd.f32 %v7244_v26, %v3462_v19  ;;  %v3457_v17 = vadd.f32 %v3456_v36, %v3350_v55  ;;  %4890 = vrsqrt.f32 %v7372_v24  ;;  %v3540_v36 = vld [vmem:[%s7212_s30 + $0x58] sm:$0xff]  ;;  %v3291_v38 = vand.u32 2147483648, %v7333_v2 }
 0x486   : > { %v3273_v25 = vmul.f32 %v4883_v52, %v7277_v13  ;;  %v3282_v28 = vsel %vm3281_vm8, %v7274_v46, %v3280_v18  ;;  %3587 = vst.msk [vmem:[%s7267_s2 + $0x20] sm:$0xff] %vm1214_vm0, %v3571_v33  ;;  %v3562_v56 = vmul.f32 %v7225_v5, %v3540_v36  ;;  %vm3290_vm15 = vcmp.eq.f32.partialorder %v7333_v2, 0.0  ;;  %v4615_v19 = vpop.f32.mrf.mxu1  ;;  %v3542_v18 = vld [vmem:[%s7212_s30 + $0x68] sm:$0xff] }
 0x487   : > { %v3285_v49 = vsel %vm3283_vm9, %v3284_v9, %v3282_v28  ;;  %v3574_v4 = vadd.f32 %v7298_v63, %v3519_v62  ;;  %v3518_v35 = vadd.f32 %v7244_v26, %v3457_v17  ;;  %v3207_v50 = vpop.f32.mrf.mxu0  ;;  %v7382_v63 = vadd.f32 0.0001, %v4562_v48 }
 0x488   : > { %v3275_v37 = vsel %vm3274_vm10, %v7277_v13, %v3273_v25  ;;  %v3353_v3 = vmul.f32 %v3337_v47, %v3285_v49  ;;  %v7385_v53 = vadd.f32 0.0001, %v3207_v50  ;;  %vm3309_vm1 = vcmp.eq.f32.partialorder %v7339_v7, inf  ;;  %v3486_v49 = vpop.f32.mrf.mxu1 }
 0x489   : > { %v3278_v51 = vsel %vm3276_vm11, %v3277_v16, %v3275_v37  ;;  %3590 = vst.msk [vmem:[%s7267_s2 + $0x38] sm:$0xff] %vm1214_vm0, %v3574_v4  ;;  %v3573_v46 = vadd.f32 %v7306_v10, %v3518_v35  ;;  %4892 = vrsqrt.f32 %v7382_v63  ;;  %v3312_v55 = vand.u32 2147483648, %v7339_v7 }
 0x48a   : > { %v3352_v57 = vmul.f32 %v3336_v11, %v3278_v51  ;;  %v3472_v13 = vadd.f32 %v4609_v54, %v3353_v3  ;;  %4894 = vrsqrt.f32 %v7385_v53  ;;  %v3341_v54 = vld [vmem:[%s7220_s29 + $0x68] sm:$0xff]  ;;  %vm3311_vm2 = vcmp.eq.f32.partialorder %v7339_v7, 0.0 }
 0x48b   : > { %v4885_v8 = vpop.eup %4884  ;;  %3589 = vst.msk [vmem:[%s7267_s2 + $0x30] sm:$0xff] %vm1214_vm0, %v3573_v46  ;;  %v3561_v48 = vmul.f32 %v7225_v5, %v3539_v32  ;;  %v3564_v28 = vmul.f32 %v7225_v5, %v3542_v18  ;;  %vm3302_vm3 = vcmp.eq.f32.partialorder %v7372_v24, inf  ;;  %vm3304_vm4 = vcmp.eq.f32.partialorder %v7372_v24, 0.0 }
 0x48c   : > { %v3467_v15 = vadd.f32 %v3466_v23, %v3352_v57  ;;  %v3521_v41 = vadd.f32 %v7244_v26, %v3472_v13  ;;  %v3294_v10 = vmul.f32 %v4885_v8, %v7312_v45  ;;  %vm3323_vm5 = vcmp.eq.f32.partialorder %v7382_v63, inf  ;;  %v4618_v8 = vpop.f32.mrf.mxu1 }
 0x48d   : > { %vm3325_vm6 = vcmp.eq.f32.partialorder %v7382_v63, 0.0  ;;  %v3326_v13 = vand.u32 2147483648, %v7382_v63  ;;  %vm3316_vm7 = vcmp.eq.f32.partialorder %v7385_v53, inf  ;;  %vm3318_vm8 = vcmp.eq.f32.partialorder %v7385_v53, 0.0 }
 0x48e   : > { %v3520_v40 = vadd.f32 %v7244_v26, %v3467_v15  ;;  %v3576_v14 = vadd.f32 %v3560_v30, %v3521_v41  ;;  %v3296_v20 = vsel %vm3295_vm12, %v7312_v45, %v3294_v10  ;;  %v4887_v31 = vpop.eup %4886  ;;  %v3338_v45 = vld [vmem:[%s7220_s29 + $0x50] sm:$0xff]  ;;  %v3343_v30 = vld [vmem:[%s7220_s29 + $0x78] sm:$0xff] }
 0x48f   : > { %v3299_v0 = vsel %vm3297_vm13, %v3298_v27, %v3296_v20  ;;  %v3287_v59 = vmul.f32 %v4887_v31, %v7333_v2  ;;  %v4889_v43 = vpop.eup %4888  ;;  %v3342_v41 = vld [vmem:[%s7220_s29 + $0x70] sm:$0xff]  ;;  %v3544_v27 = vld [vmem:[%s7212_s30 + $0x78] sm:$0xff] }
 0x490   : > { %v3575_v22 = vadd.f32 %v3559_v21, %v3520_v40  ;;  %3592 = vst.msk [vmem:[%s7267_s2 + $0x48] sm:$0xff] %vm1214_vm0, %v3576_v14  ;;  %v3355_v34 = vmul.f32 %v3339_v42, %v3299_v0  ;;  %v3308_v61 = vmul.f32 %v4889_v43, %v7339_v7  ;;  %v3319_v21 = vand.u32 2147483648, %v7385_v53  ;;  %v3543_v31 = vld [vmem:[%s7212_s30 + $0x70] sm:$0xff] }
 0x491   : > { %v3289_v29 = vsel %vm3288_vm14, %v7333_v2, %v3287_v59  ;;  %v3541_v2 = vld [vmem:[%s7212_s30 + $0x60] sm:$0xff]  ;;  %v3566_v36 = vmul.f32 %v7225_v5, %v3544_v27 }
 0x492   : > { %3591 = vst.msk [vmem:[%s7267_s2 + $0x40] sm:$0xff] %vm1214_vm0, %v3575_v22  ;;  %v3482_v1 = vadd.f32 %v4612_v44, %v3355_v34  ;;  %v3292_v58 = vsel %vm3290_vm15, %v3291_v38, %v3289_v29  ;;  %v3310_v9 = vsel %vm3309_vm1, %v7339_v7, %v3308_v61  ;;  %v4891_v33 = vpop.eup %4890  ;;  %v3305_v7 = vand.u32 2147483648, %v7372_v24  ;;  %v3496_v34 = vpop.f32.mrf.mxu1 }
 0x493   : > { %v3354_v52 = vmul.f32 %v3338_v45, %v3292_v58  ;;  %v3313_v62 = vsel %vm3311_vm2, %v3312_v55, %v3310_v9  ;;  %v3301_v16 = vmul.f32 %v4891_v33, %v7372_v24  ;;  %v3563_v37 = vmul.f32 %v7225_v5, %v3541_v2 }
 0x494   : > { %v3523_v12 = vadd.f32 %v7244_v26, %v3482_v1  ;;  %v3357_v17 = vmul.f32 %v3341_v54, %v3313_v62  ;;  %v3565_v38 = vmul.f32 %v7225_v5, %v3543_v31 }
 0x495   : > { %v3477_v25 = vadd.f32 %v3476_v39, %v3354_v52  ;;  %v3303_v3 = vsel %vm3302_vm3, %v7372_v24, %v3301_v16 }
 0x496   : > { %v3578_v47 = vadd.f32 %v3562_v56, %v3523_v12  ;;  %v4893_v4 = vpop.eup %4892  ;;  %v3492_v35 = vadd.f32 %v4615_v19, %v3357_v17  ;;  %v3306_v6 = vsel %vm3304_vm4, %v3305_v7, %v3303_v3 }
 0x497   : > { %v3522_v11 = vadd.f32 %v7244_v26, %v3477_v25  ;;  %v4895_v23 = vpop.eup %4894  ;;  %v3322_v50 = vmul.f32 %v4893_v4, %v7382_v63  ;;  %v3356_v46 = vmul.f32 %v3340_v60, %v3306_v6 }
 0x498   : > { %3594 = vst.msk [vmem:[%s7267_s2 + $0x58] sm:$0xff] %vm1214_vm0, %v3578_v47  ;;  %v3525_v57 = vadd.f32 %v7244_v26, %v3492_v35  ;;  %v3315_v24 = vmul.f32 %v4895_v23, %v7385_v53 }
 0x499   : > { %v3577_v51 = vadd.f32 %v3561_v48, %v3522_v11  ;;  %v3324_v15 = vsel %vm3323_vm5, %v7382_v63, %v3322_v50  ;;  %v3487_v10 = vadd.f32 %v3486_v49, %v3356_v46 }
 0x49a   : > { %v3580_v44 = vadd.f32 %v3564_v28, %v3525_v57  ;;  %v3327_v40 = vsel %vm3325_vm6, %v3326_v13, %v3324_v15  ;;  %v3317_v42 = vsel %vm3316_vm7, %v7385_v53, %v3315_v24 }
 0x49b   : > { %3593 = vst.msk [vmem:[%s7267_s2 + $0x50] sm:$0xff] %vm1214_vm0, %v3577_v51  ;;  %v3359_v14 = vmul.f32 %v3343_v30, %v3327_v40  ;;  %v3320_v20 = vsel %vm3318_vm8, %v3319_v21, %v3317_v42  ;;  %v3524_v63 = vadd.f32 %v7244_v26, %v3487_v10 }
 0x49c   : > { %3596 = vst.msk [vmem:[%s7267_s2 + $0x68] sm:$0xff] %vm1214_vm0, %v3580_v44  ;;  %v3358_v22 = vmul.f32 %v3342_v41, %v3320_v20 }
 0x49d   : > { %v3502_v0 = vadd.f32 %v4618_v8, %v3359_v14  ;;  %v3579_v39 = vadd.f32 %v3563_v37, %v3524_v63 }
 0x49e   : > { %v3497_v59 = vadd.f32 %v3496_v34, %v3358_v22 }
 0x49f   : > { %v3527_v53 = vadd.f32 %v7244_v26, %v3502_v0  ;;  %3595 = vst.msk [vmem:[%s7267_s2 + $0x60] sm:$0xff] %vm1214_vm0, %v3579_v39 }
 0x4a0   : > { %v3526_v45 = vadd.f32 %v7244_v26, %v3497_v59 }
 0x4a1   : > { %v3582_v43 = vadd.f32 %v3566_v36, %v3527_v53 }
 0x4a2   : > { %v3581_v1 = vadd.f32 %v3565_v38, %v3526_v45 }
 0x4a3   : > { %3598 = vst.msk [vmem:[%s7267_s2 + $0x78] sm:$0xff] %vm1214_vm0, %v3582_v43 }
 0x4a4   : > { %3597 = vst.msk [vmem:[%s7267_s2 + $0x70] sm:$0xff] %vm1214_vm0, %v3581_v1 }
 0x4a5 PF: > { %s41_s1 = sadd.s32 1, %s5254_s1   ;;  %s7605_s29 = sld [smem:[#allocation23_spill]] }
 0x4a6   : > { %p38_p5 = scmp.ge.s32.totalorder %s41_s1, 8   ;;  %s7606_s30 = sld [smem:[#allocation26_spill]] }
 0x4a7   : > { %s7607_s7 = sld [smem:[#allocation27_spill]]  ;;  %s7610_s2 = smov %s5234_s6 }
 0x4a8   : > { %s7608_s3 = sld [smem:[#allocation28_spill]]  ;;  %s7611_s6 = smov %s5536_s10 }
 0x4a9   : > { %s7609_s26 = sld [smem:[#allocation29_spill]]  ;;  %40 = sbr.rel (!%p38_p5) target bundleno = 30 (0x1e), region = 233 }
 0x4ae   :  { %3629 = vsyncpa [#allocation3], 1 }
 0x4af   :  { %3631 = vsyncpa [#allocation3 + $0x1], 1 }
 0x4b0   :  { %3632 = vsyncpa [#allocation5], 1 }
 0x4b1   :  { %3633 = vsyncpa [#allocation8], 1 }
 0x4b2   :  { %3634 = vsyncpa [#allocation14], 1 }
 0x4b3   :  { %3636 = vsyncpa [#allocation14 + $0x1], 1 }

</bundles_post_ra>
